<compile_context>
chip_gen: v7x
topology: tpu7x:2x2x1
jax: 0.10.0
libtpu: 0.0.40
codegen_flags: <defaults>
</compile_context>

<pallas_src>
import functools

import jax
import jax.numpy as jnp
from jax import lax
from jax.experimental import pallas as pl
from jax.experimental.pallas import tpu as pltpu


# ----------------------------------------------------------------------------
# small helpers
# ----------------------------------------------------------------------------
def _conv_out(n, k, s):
    return (n - k) // s + 1


def _mm_bias_relu(x, w, b):
    """relu(x @ w + b): bf16 MXU matmul, f32 accumulation/epilogue."""
    y = jnp.dot(x.astype(jnp.bfloat16), w, preferred_element_type=jnp.float32)
    return jnp.maximum(y + b, 0.0)


def _conv_accum(src, H, W, w_ref, b, k, s, Ho, Wo, g_s):
    """Convolution of a single sample held in VMEM.

    src   : (H*W, Cin) f32 value, rows in (h, w) row-major order.
    w_ref : (k*k, Cin, Cout) bf16 ref (one slab per kernel tap).
    b     : (1, Cout) f32.
    g_s   : (Ho*Wo, Cin) f32 VMEM scratch (gather buffer).
    Returns relu(conv) as (Ho*Wo, Cout) f32, rows in (ho, wo) order.
    """
    cout = w_ref.shape[-1]
    acc = jnp.zeros((Ho * Wo, cout), jnp.float32)
    for ki in range(k):
        for kj in range(k):
            kidx = ki * k + kj
            if Ho * Wo == 1:
                sr = ki * W + kj
                g = src[sr:sr + 1, :]
            else:
                # Gather the (Ho*Wo, Cin) slice for this kernel tap into scratch
                # (single-row, full-minor-dim stores only).
                for ho in range(Ho):
                    for wo in range(Wo):
                        sr = (ho * s + ki) * W + (wo * s + kj)
                        dr = ho * Wo + wo
                        g_s[dr:dr + 1, :] = src[sr:sr + 1, :]
                g = g_s[...]
            acc = acc + jnp.dot(g.astype(jnp.bfloat16), w_ref[kidx],
                                preferred_element_type=jnp.float32)
    return jnp.maximum(acc + b, 0.0)


# ----------------------------------------------------------------------------
# fused whole-network kernel (one grid step = one sample)
# ----------------------------------------------------------------------------
def _dqn_kernel(p1_ref, w1_ref, b1_ref, w2_ref, b2_ref, w3_ref, b3_ref,
                wf1_ref, bf1_ref, wf2_ref, bf2_ref, out_ref, g2_s, g3_s, *,
                dims):
    H1, W1 = dims["H1"], dims["W1"]
    H2, W2 = dims["H2"], dims["W2"]
    H3, W3 = dims["H3"], dims["W3"]
    k2, s2 = dims["k2"], dims["s2"]
    k3, s3 = dims["k3"], dims["s3"]

    # conv1: the patch matrix was built outside -> one MXU matmul.
    a1 = _mm_bias_relu(p1_ref[0], w1_ref[...], b1_ref[...])           # (H1*W1, 32)

    # conv2 / conv3: in-kernel im2col gather + per-tap matmuls.
    a2 = _conv_accum(a1, H1, W1, w2_ref, b2_ref[...], k2, s2, H2, W2, g2_s)
    a3 = _conv_accum(a2, H2, W2, w3_ref, b3_ref[...], k3, s3, H3, W3, g3_s)

    # fc1: torch's NCHW .view(B,-1) permutation is folded into wf1's layout;
    # sum the contribution of each conv3 spatial position.
    h = bf1_ref[...]                                                  # (1, 512)
    for p in range(H3 * W3):
        h = h + jnp.dot(a3[p:p + 1, :].astype(jnp.bfloat16), wf1_ref[p],
                        preferred_element_type=jnp.float32)
    h = jnp.maximum(h, 0.0)

    # fc2 (zero-padded to a lane-dense 128-column output).
    out = jnp.dot(h.astype(jnp.bfloat16), wf2_ref[...],
                  preferred_element_type=jnp.float32) + bf2_ref[...]  # (1, n_pad)
    out_ref[0] = out


# ----------------------------------------------------------------------------
# conv1 im2col (plain JAX, channels-last, no per-layer transposes)
# ----------------------------------------------------------------------------
def _conv1_patches(x, k, s, Ho, Wo):
    """NCHW input -> (B, Ho*Wo, k*k*C) patch matrix, cols in (ki, kj, c) order."""
    B, C = x.shape[0], x.shape[1]
    xn = jnp.transpose(x, (0, 2, 3, 1))                    # NHWC
    cols = [xn[:, ki:ki + s * Ho:s, kj:kj + s * Wo:s, :]
            for ki in range(k) for kj in range(k)]         # each (B, Ho, Wo, C)
    p = jnp.stack(cols, axis=3)                            # (B, Ho, Wo, k*k, C)
    return p.reshape(B, Ho * Wo, k * k * C)


# ----------------------------------------------------------------------------
# parameter construction (kaiming_normal_, mode='fan_out', relu; zero bias)
# weights are pre-laid-out / pre-transposed / padded / cast to bf16 ONCE here.
# ----------------------------------------------------------------------------
def make_dqn_params(key, input_shape, out_features):
    C, H, W = input_shape
    k1, k2, k3, k4, k5 = jax.random.split(key, 5)

    def kaiming_conv(k, cout, cin, ksz):
        std = (2.0 / (cout * ksz * ksz)) ** 0.5             # fan_out, relu
        return jax.random.normal(k, (cout, cin, ksz, ksz), jnp.float32) * std

    def kaiming_fc(k, out_f, in_f):
        std = (2.0 / out_f) ** 0.5                          # fan_out, relu
        return jax.random.normal(k, (out_f, in_f), jnp.float32) * std

    w1 = kaiming_conv(k1, 32, C, 8)
    w2 = kaiming_conv(k2, 64, 32, 4)
    w3 = kaiming_conv(k3, 64, 64, 3)

    # replicate the torch __init__ shape probe analytically
    H1, W1 = _conv_out(H, 8, 4), _conv_out(W, 8, 4)
    H2, W2 = _conv_out(H1, 4, 2), _conv_out(W1, 4, 2)
    H3, W3 = _conv_out(H2, 3, 1), _conv_out(W2, 3, 1)
    n_flatten = 64 * H3 * W3

    wf1 = kaiming_fc(k4, 512, n_flatten)
    wf2 = kaiming_fc(k5, out_features, 512)

    n_pad = ((out_features + 127) // 128) * 128

    def bf16(a):
        return a.astype(jnp.bfloat16)

    wf2_pad = jnp.zeros((512, n_pad), jnp.float32).at[:, :out_features].set(wf2.T)

    params = dict(
        # conv weights as [k*k*Cin, Cout] / [k*k, Cin, Cout] matching the
        # channels-last (ki, kj, c) patch ordering used by the kernel.
        w1=bf16(w1.transpose(2, 3, 1, 0).reshape(8 * 8 * C, 32)),
        b1=jnp.zeros((1, 32), jnp.float32),
        w2=bf16(w2.transpose(2, 3, 1, 0).reshape(4 * 4, 32, 64)),
        b2=jnp.zeros((1, 64), jnp.float32),
        w3=bf16(w3.transpose(2, 3, 1, 0).reshape(3 * 3, 64, 64)),
        b3=jnp.zeros((1, 64), jnp.float32),
        # fc1 with torch's NCHW flatten permutation folded in: [HW3, 64, 512]
        wf1=bf16(wf1.reshape(512, 64, H3, W3).transpose(2, 3, 1, 0)
                 .reshape(H3 * W3, 64, 512)),
        bf1=jnp.zeros((1, 512), jnp.float32),
        # fc2 pre-transposed and zero-padded to 128 lane-dense output columns
        wf2=bf16(wf2_pad),
        bf2=jnp.zeros((1, n_pad), jnp.float32),
    )

    dims = dict(C=C, H=H, W=W, H1=H1, W1=W1, H2=H2, W2=W2, H3=H3, W3=W3,
                k1=8, s1=4, k2=4, s2=2, k3=3, s3=1,
                n_pad=n_pad, out_features=out_features)

    # bf16-rounded torch-layout copies for the plain-XLA reference check
    rnd = lambda a: a.astype(jnp.bfloat16).astype(jnp.float32)
    ref_weights = dict(w1=rnd(w1), w2=rnd(w2), w3=rnd(w3),
                       wf1=rnd(wf1), wf2=rnd(wf2))
    return params, dims, ref_weights


# ----------------------------------------------------------------------------
# forward builder: single fused pallas_call, batch-parallel grid
# ----------------------------------------------------------------------------
def build_dqn_forward(dims):
    H1, W1, H2, W2, H3, W3 = (dims["H1"], dims["W1"], dims["H2"], dims["W2"],
                              dims["H3"], dims["W3"])
    k1, s1, C = dims["k1"], dims["s1"], dims["C"]
    n_pad = dims["n_pad"]
    HW1, K1 = H1 * W1, k1 * k1 * C

    kernel = functools.partial(_dqn_kernel, dims=dims)

    def forward(params, x):
        B = x.shape[0]
        p1 = _conv1_patches(x, k1, s1, H1, W1).astype(jnp.bfloat16)

        out = pl.pallas_call(
            kernel,
            out_shape=jax.ShapeDtypeStruct((B, 1, n_pad), jnp.float32),
            grid=(B,),
            in_specs=[
                pl.BlockSpec((1, HW1, K1), lambda b: (b, 0, 0)),
                pl.BlockSpec(params["w1"].shape, lambda b: (0, 0)),
                pl.BlockSpec(params["b1"].shape, lambda b: (0, 0)),
                pl.BlockSpec(params["w2"].shape, lambda b: (0, 0, 0)),
                pl.BlockSpec(params["b2"].shape, lambda b: (0, 0)),
                pl.BlockSpec(params["w3"].shape, lambda b: (0, 0, 0)),
                pl.BlockSpec(params["b3"].shape, lambda b: (0, 0)),
                pl.BlockSpec(params["wf1"].shape, lambda b: (0, 0, 0)),
                pl.BlockSpec(params["bf1"].shape, lambda b: (0, 0)),
                pl.BlockSpec(params["wf2"].shape, lambda b: (0, 0)),
                pl.BlockSpec(params["bf2"].shape, lambda b: (0, 0)),
            ],
            out_specs=pl.BlockSpec((1, 1, n_pad), lambda b: (b, 0, 0)),
            scratch_shapes=[
                pltpu.VMEM((H2 * W2, 32), jnp.float32),   # conv2 gather buffer
                pltpu.VMEM((H3 * W3, 64), jnp.float32),   # conv3 gather buffer
            ],
            compiler_params=pltpu.CompilerParams(
                dimension_semantics=("parallel",)),
        )(p1, params["w1"], params["b1"], params["w2"], params["b2"],
          params["w3"], params["b3"], params["wf1"], params["bf1"],
          params["wf2"], params["bf2"])

        return out[:, 0, :dims["out_features"]]

    return jax.jit(forward)


# ----------------------------------------------------------------------------
# plain-XLA reference (torch-layout math) for the self-check
# ----------------------------------------------------------------------------
def reference_forward(ref_w, x):
    def conv(y, w, s):
        y = lax.conv_general_dilated(
            y, w, (s, s), "VALID",
            dimension_numbers=("NCHW", "OIHW", "NCHW"))
        return jnp.maximum(y, 0.0)

    y = conv(x, ref_w["w1"], 4)
    y = conv(y, ref_w["w2"], 2)
    y = conv(y, ref_w["w3"], 1)
    y = y.reshape(y.shape[0], -1)                 # torch .view(B, -1) on NCHW
    y = jnp.maximum(y @ ref_w["wf1"].T, 0.0)      # biases are zero at init
    return y @ ref_w["wf2"].T


if __name__ == "__main__":
    key = jax.random.PRNGKey(0)
    kp, kx = jax.random.split(key)

    # small Atari-like shapes: batch=2, channels=4, spatial=36x36, actions=6
    input_shape = (4, 36, 36)
    out_features = 6
    batch = 2

    params, dims, ref_w = make_dqn_params(kp, input_shape, out_features)
    x = jax.random.normal(kx, (batch,) + input_shape, jnp.float32)

    forward = build_dqn_forward(dims)
    q = jax.block_until_ready(forward(params, x))

    assert q.shape == (batch, out_features), q.shape
    assert q.dtype == jnp.float32

    # sanity check against plain-XLA reference (bf16 activation rounding only)
    q_ref = jax.block_until_ready(reference_forward(ref_w, x))
    err = float(jnp.max(jnp.abs(q - q_ref)))
    assert err < 0.1, f"max abs error vs reference: {err}"
    print("KERNEL_OK")
</pallas_src>

<mosaic_0001>
module attributes {stable_mosaic.version = 11 : i64} {
  func.func @_dqn_kernel(%arg0: i32, %arg1: memref<1x64x256xbf16, #tpu.memory_space<vmem>>, %arg2: memref<256x32xbf16, #tpu.memory_space<vmem>>, %arg3: memref<1x32xf32, #tpu.memory_space<vmem>>, %arg4: memref<16x32x64xbf16, #tpu.memory_space<vmem>>, %arg5: memref<1x64xf32, #tpu.memory_space<vmem>>, %arg6: memref<9x64x64xbf16, #tpu.memory_space<vmem>>, %arg7: memref<1x64xf32, #tpu.memory_space<vmem>>, %arg8: memref<1x64x512xbf16, #tpu.memory_space<vmem>>, %arg9: memref<1x512xf32, #tpu.memory_space<vmem>>, %arg10: memref<512x128xbf16, #tpu.memory_space<vmem>>, %arg11: memref<1x128xf32, #tpu.memory_space<vmem>>, %arg12: memref<1x1x128xf32, #tpu.memory_space<vmem>>, %arg13: memref<9x32xf32, #tpu.memory_space<vmem>>, %arg14: memref<1x64xf32, #tpu.memory_space<vmem>>) attributes {dimension_semantics = [#tpu.dimension_semantics<parallel>], iteration_bounds = array<i64: 2>, scalar_prefetch = 0 : i64, scratch_operands = 2 : i64, tpu.core_type = #tpu.core_type<tc>, window_params = [{transform_indices = @transform_0, window_bounds = array<i64: 1, 64, 256>}, {pipeline_mode = #tpu.pipeline_mode<synchronous>, transform_indices = @transform_1, window_bounds = array<i64: 256, 32>}, {pipeline_mode = #tpu.pipeline_mode<synchronous>, transform_indices = @transform_2, window_bounds = array<i64: 1, 32>}, {pipeline_mode = #tpu.pipeline_mode<synchronous>, transform_indices = @transform_3, window_bounds = array<i64: 16, 32, 64>}, {pipeline_mode = #tpu.pipeline_mode<synchronous>, transform_indices = @transform_4, window_bounds = array<i64: 1, 64>}, {pipeline_mode = #tpu.pipeline_mode<synchronous>, transform_indices = @transform_5, window_bounds = array<i64: 9, 64, 64>}, {pipeline_mode = #tpu.pipeline_mode<synchronous>, transform_indices = @transform_6, window_bounds = array<i64: 1, 64>}, {pipeline_mode = #tpu.pipeline_mode<synchronous>, transform_indices = @transform_7, window_bounds = array<i64: 1, 64, 512>}, {pipeline_mode = #tpu.pipeline_mode<synchronous>, transform_indices = @transform_8, window_bounds = array<i64: 1, 512>}, {pipeline_mode = #tpu.pipeline_mode<synchronous>, transform_indices = @transform_9, window_bounds = array<i64: 512, 128>}, {pipeline_mode = #tpu.pipeline_mode<synchronous>, transform_indices = @transform_10, window_bounds = array<i64: 1, 128>}, {transform_indices = @transform_11, window_bounds = array<i64: 1, 1, 128>}]} {
    %c0 = arith.constant 0 : index
    %c0_0 = arith.constant 0 : index
    %c0_1 = arith.constant 0 : index
    %0 = vector.load %arg1[%c0, %c0_0, %c0_1] : memref<1x64x256xbf16, #tpu.memory_space<vmem>>, vector<1x64x256xbf16>
    %1 = vector.shape_cast %0 : vector<1x64x256xbf16> to vector<64x256xbf16>
    %c0_2 = arith.constant 0 : index
    %c0_3 = arith.constant 0 : index
    %2 = vector.load %arg2[%c0_2, %c0_3] : memref<256x32xbf16, #tpu.memory_space<vmem>>, vector<256x32xbf16>
    %c0_4 = arith.constant 0 : index
    %c0_5 = arith.constant 0 : index
    %3 = vector.load %arg3[%c0_4, %c0_5] : memref<1x32xf32, #tpu.memory_space<vmem>>, vector<1x32xf32>
    %cst = arith.constant dense<0.000000e+00> : vector<64x32xf32>
    %4 = tpu.matmul %1, %2, %cst {dimension_numbers = #tpu.dot_dimension_numbers<[1], [0], [0], [1], [0, 0, 1, 1], [], []>} : vector<64x256xbf16>, vector<256x32xbf16>, vector<64x32xf32> -> vector<64x32xf32>
    %5 = vector.broadcast %3 : vector<1x32xf32> to vector<64x32xf32>
    %6 = arith.addf %4, %5 : vector<64x32xf32>
    %cst_6 = arith.constant 0.000000e+00 : f32
    %7 = vector.broadcast %cst_6 : f32 to vector<64x32xf32>
    %8 = arith.maximumf %6, %7 : vector<64x32xf32>
    %c0_7 = arith.constant 0 : index
    %c0_8 = arith.constant 0 : index
    %9 = vector.load %arg5[%c0_7, %c0_8] : memref<1x64xf32, #tpu.memory_space<vmem>>, vector<1x64xf32>
    %cst_9 = arith.constant 0.000000e+00 : f32
    %10 = vector.broadcast %cst_9 : f32 to vector<9x64xf32>
    %11 = vector.extract_strided_slice %8 {offsets = [0, 0], sizes = [1, 32], strides = [1, 1]} : vector<64x32xf32> to vector<1x32xf32>
    %c0_10 = arith.constant 0 : index
    %c0_11 = arith.constant 0 : index
    %12 = vector.load %arg13[%c0_10, %c0_11] : memref<9x32xf32, #tpu.memory_space<vmem>>, vector<1x32xf32>
    tpu.vector_store %arg13[%c0_10, %c0_11], %11 {strides = array<i32>} : memref<9x32xf32, #tpu.memory_space<vmem>>, vector<1x32xf32>,
    %13 = vector.extract_strided_slice %8 {offsets = [2, 0], sizes = [1, 32], strides = [1, 1]} : vector<64x32xf32> to vector<1x32xf32>
    %c1 = arith.constant 1 : index
    %c0_12 = arith.constant 0 : index
    %14 = vector.load %arg13[%c1, %c0_12] : memref<9x32xf32, #tpu.memory_space<vmem>>, vector<1x32xf32>
    tpu.vector_store %arg13[%c1, %c0_12], %13 {strides = array<i32>} : memref<9x32xf32, #tpu.memory_space<vmem>>, vector<1x32xf32>,
    %15 = vector.extract_strided_slice %8 {offsets = [4, 0], sizes = [1, 32], strides = [1, 1]} : vector<64x32xf32> to vector<1x32xf32>
    %c2 = arith.constant 2 : index
    %c0_13 = arith.constant 0 : index
    %16 = vector.load %arg13[%c2, %c0_13] : memref<9x32xf32, #tpu.memory_space<vmem>>, vector<1x32xf32>
    tpu.vector_store %arg13[%c2, %c0_13], %15 {strides = array<i32>} : memref<9x32xf32, #tpu.memory_space<vmem>>, vector<1x32xf32>,
    %17 = vector.extract_strided_slice %8 {offsets = [16, 0], sizes = [1, 32], strides = [1, 1]} : vector<64x32xf32> to vector<1x32xf32>
    %c3 = arith.constant 3 : index
    %c0_14 = arith.constant 0 : index
    %18 = vector.load %arg13[%c3, %c0_14] : memref<9x32xf32, #tpu.memory_space<vmem>>, vector<1x32xf32>
    tpu.vector_store %arg13[%c3, %c0_14], %17 {strides = array<i32>} : memref<9x32xf32, #tpu.memory_space<vmem>>, vector<1x32xf32>,
    %19 = vector.extract_strided_slice %8 {offsets = [18, 0], sizes = [1, 32], strides = [1, 1]} : vector<64x32xf32> to vector<1x32xf32>
    %c4 = arith.constant 4 : index
    %c0_15 = arith.constant 0 : index
    %20 = vector.load %arg13[%c4, %c0_15] : memref<9x32xf32, #tpu.memory_space<vmem>>, vector<1x32xf32>
    tpu.vector_store %arg13[%c4, %c0_15], %19 {strides = array<i32>} : memref<9x32xf32, #tpu.memory_space<vmem>>, vector<1x32xf32>,
    %21 = vector.extract_strided_slice %8 {offsets = [20, 0], sizes = [1, 32], strides = [1, 1]} : vector<64x32xf32> to vector<1x32xf32>
    %c5 = arith.constant 5 : index
    %c0_16 = arith.constant 0 : index
    %22 = vector.load %arg13[%c5, %c0_16] : memref<9x32xf32, #tpu.memory_space<vmem>>, vector<1x32xf32>
    tpu.vector_store %arg13[%c5, %c0_16], %21 {strides = array<i32>} : memref<9x32xf32, #tpu.memory_space<vmem>>, vector<1x32xf32>,
    %23 = vector.extract_strided_slice %8 {offsets = [32, 0], sizes = [1, 32], strides = [1, 1]} : vector<64x32xf32> to vector<1x32xf32>
    %c6 = arith.constant 6 : index
    %c0_17 = arith.constant 0 : index
    %24 = vector.load %arg13[%c6, %c0_17] : memref<9x32xf32, #tpu.memory_space<vmem>>, vector<1x32xf32>
    tpu.vector_store %arg13[%c6, %c0_17], %23 {strides = array<i32>} : memref<9x32xf32, #tpu.memory_space<vmem>>, vector<1x32xf32>,
    %25 = vector.extract_strided_slice %8 {offsets = [34, 0], sizes = [1, 32], strides = [1, 1]} : vector<64x32xf32> to vector<1x32xf32>
    %c7 = arith.constant 7 : index
    %c0_18 = arith.constant 0 : index
    %26 = vector.load %arg13[%c7, %c0_18] : memref<9x32xf32, #tpu.memory_space<vmem>>, vector<1x32xf32>
    tpu.vector_store %arg13[%c7, %c0_18], %25 {strides = array<i32>} : memref<9x32xf32, #tpu.memory_space<vmem>>, vector<1x32xf32>,
    %27 = vector.extract_strided_slice %8 {offsets = [36, 0], sizes = [1, 32], strides = [1, 1]} : vector<64x32xf32> to vector<1x32xf32>
    %c8 = arith.constant 8 : index
    %c0_19 = arith.constant 0 : index
    %28 = vector.load %arg13[%c8, %c0_19] : memref<9x32xf32, #tpu.memory_space<vmem>>, vector<1x32xf32>
    tpu.vector_store %arg13[%c8, %c0_19], %27 {strides = array<i32>} : memref<9x32xf32, #tpu.memory_space<vmem>>, vector<1x32xf32>,
    %c0_20 = arith.constant 0 : index
    %c0_21 = arith.constant 0 : index
    %29 = vector.load %arg13[%c0_20, %c0_21] : memref<9x32xf32, #tpu.memory_space<vmem>>, vector<9x32xf32>
    %30 = arith.truncf %29 : vector<9x32xf32> to vector<9x32xbf16>
    %c0_22 = arith.constant 0 : index
    %c0_23 = arith.constant 0 : index
    %c0_24 = arith.constant 0 : index
    %31 = vector.load %arg4[%c0_22, %c0_23, %c0_24] : memref<16x32x64xbf16, #tpu.memory_space<vmem>>, vector<1x32x64xbf16>
    %32 = vector.shape_cast %31 : vector<1x32x64xbf16> to vector<32x64xbf16>
    %cst_25 = arith.constant dense<0.000000e+00> : vector<9x64xf32>
    %33 = tpu.matmul %30, %32, %cst_25 {dimension_numbers = #tpu.dot_dimension_numbers<[1], [0], [0], [1], [0, 0, 1, 1], [], []>} : vector<9x32xbf16>, vector<32x64xbf16>, vector<9x64xf32> -> vector<9x64xf32>
    %34 = arith.addf %10, %33 : vector<9x64xf32>
    %35 = vector.extract_strided_slice %8 {offsets = [1, 0], sizes = [1, 32], strides = [1, 1]} : vector<64x32xf32> to vector<1x32xf32>
    %c0_26 = arith.constant 0 : index
    %c0_27 = arith.constant 0 : index
    %36 = vector.load %arg13[%c0_26, %c0_27] : memref<9x32xf32, #tpu.memory_space<vmem>>, vector<1x32xf32>
    tpu.vector_store %arg13[%c0_26, %c0_27], %35 {strides = array<i32>} : memref<9x32xf32, #tpu.memory_space<vmem>>, vector<1x32xf32>,
    %37 = vector.extract_strided_slice %8 {offsets = [3, 0], sizes = [1, 32], strides = [1, 1]} : vector<64x32xf32> to vector<1x32xf32>
    %c1_28 = arith.constant 1 : index
    %c0_29 = arith.constant 0 : index
    %38 = vector.load %arg13[%c1_28, %c0_29] : memref<9x32xf32, #tpu.memory_space<vmem>>, vector<1x32xf32>
    tpu.vector_store %arg13[%c1_28, %c0_29], %37 {strides = array<i32>} : memref<9x32xf32, #tpu.memory_space<vmem>>, vector<1x32xf32>,
    %39 = vector.extract_strided_slice %8 {offsets = [5, 0], sizes = [1, 32], strides = [1, 1]} : vector<64x32xf32> to vector<1x32xf32>
    %c2_30 = arith.constant 2 : index
    %c0_31 = arith.constant 0 : index
    %40 = vector.load %arg13[%c2_30, %c0_31] : memref<9x32xf32, #tpu.memory_space<vmem>>, vector<1x32xf32>
    tpu.vector_store %arg13[%c2_30, %c0_31], %39 {strides = array<i32>} : memref<9x32xf32, #tpu.memory_space<vmem>>, vector<1x32xf32>,
    %41 = vector.extract_strided_slice %8 {offsets = [17, 0], sizes = [1, 32], strides = [1, 1]} : vector<64x32xf32> to vector<1x32xf32>
    %c3_32 = arith.constant 3 : index
    %c0_33 = arith.constant 0 : index
    %42 = vector.load %arg13[%c3_32, %c0_33] : memref<9x32xf32, #tpu.memory_space<vmem>>, vector<1x32xf32>
    tpu.vector_store %arg13[%c3_32, %c0_33], %41 {strides = array<i32>} : memref<9x32xf32, #tpu.memory_space<vmem>>, vector<1x32xf32>,
    %43 = vector.extract_strided_slice %8 {offsets = [19, 0], sizes = [1, 32], strides = [1, 1]} : vector<64x32xf32> to vector<1x32xf32>
    %c4_34 = arith.constant 4 : index
    %c0_35 = arith.constant 0 : index
    %44 = vector.load %arg13[%c4_34, %c0_35] : memref<9x32xf32, #tpu.memory_space<vmem>>, vector<1x32xf32>
    tpu.vector_store %arg13[%c4_34, %c0_35], %43 {strides = array<i32>} : memref<9x32xf32, #tpu.memory_space<vmem>>, vector<1x32xf32>,
    %45 = vector.extract_strided_slice %8 {offsets = [21, 0], sizes = [1, 32], strides = [1, 1]} : vector<64x32xf32> to vector<1x32xf32>
    %c5_36 = arith.constant 5 : index
    %c0_37 = arith.constant 0 : index
    %46 = vector.load %arg13[%c5_36, %c0_37] : memref<9x32xf32, #tpu.memory_space<vmem>>, vector<1x32xf32>
    tpu.vector_store %arg13[%c5_36, %c0_37], %45 {strides = array<i32>} : memref<9x32xf32, #tpu.memory_space<vmem>>, vector<1x32xf32>,
    %47 = vector.extract_strided_slice %8 {offsets = [33, 0], sizes = [1, 32], strides = [1, 1]} : vector<64x32xf32> to vector<1x32xf32>
    %c6_38 = arith.constant 6 : index
    %c0_39 = arith.constant 0 : index
    %48 = vector.load %arg13[%c6_38, %c0_39] : memref<9x32xf32, #tpu.memory_space<vmem>>, vector<1x32xf32>
    tpu.vector_store %arg13[%c6_38, %c0_39], %47 {strides = array<i32>} : memref<9x32xf32, #tpu.memory_space<vmem>>, vector<1x32xf32>,
    %49 = vector.extract_strided_slice %8 {offsets = [35, 0], sizes = [1, 32], strides = [1, 1]} : vector<64x32xf32> to vector<1x32xf32>
    %c7_40 = arith.constant 7 : index
    %c0_41 = arith.constant 0 : index
    %50 = vector.load %arg13[%c7_40, %c0_41] : memref<9x32xf32, #tpu.memory_space<vmem>>, vector<1x32xf32>
    tpu.vector_store %arg13[%c7_40, %c0_41], %49 {strides = array<i32>} : memref<9x32xf32, #tpu.memory_space<vmem>>, vector<1x32xf32>,
    %51 = vector.extract_strided_slice %8 {offsets = [37, 0], sizes = [1, 32], strides = [1, 1]} : vector<64x32xf32> to vector<1x32xf32>
    %c8_42 = arith.constant 8 : index
    %c0_43 = arith.constant 0 : index
    %52 = vector.load %arg13[%c8_42, %c0_43] : memref<9x32xf32, #tpu.memory_space<vmem>>, vector<1x32xf32>
    tpu.vector_store %arg13[%c8_42, %c0_43], %51 {strides = array<i32>} : memref<9x32xf32, #tpu.memory_space<vmem>>, vector<1x32xf32>,
    %c0_44 = arith.constant 0 : index
    %c0_45 = arith.constant 0 : index
    %53 = vector.load %arg13[%c0_44, %c0_45] : memref<9x32xf32, #tpu.memory_space<vmem>>, vector<9x32xf32>
    %54 = arith.truncf %53 : vector<9x32xf32> to vector<9x32xbf16>
    %c1_46 = arith.constant 1 : index
    %c0_47 = arith.constant 0 : index
    %c0_48 = arith.constant 0 : index
    %55 = vector.load %arg4[%c1_46, %c0_47, %c0_48] : memref<16x32x64xbf16, #tpu.memory_space<vmem>>, vector<1x32x64xbf16>
    %56 = vector.shape_cast %55 : vector<1x32x64xbf16> to vector<32x64xbf16>
    %cst_49 = arith.constant dense<0.000000e+00> : vector<9x64xf32>
    %57 = tpu.matmul %54, %56, %cst_49 {dimension_numbers = #tpu.dot_dimension_numbers<[1], [0], [0], [1], [0, 0, 1, 1], [], []>} : vector<9x32xbf16>, vector<32x64xbf16>, vector<9x64xf32> -> vector<9x64xf32>
    %58 = arith.addf %34, %57 : vector<9x64xf32>
    %59 = vector.extract_strided_slice %8 {offsets = [2, 0], sizes = [1, 32], strides = [1, 1]} : vector<64x32xf32> to vector<1x32xf32>
    %c0_50 = arith.constant 0 : index
    %c0_51 = arith.constant 0 : index
    %60 = vector.load %arg13[%c0_50, %c0_51] : memref<9x32xf32, #tpu.memory_space<vmem>>, vector<1x32xf32>
    tpu.vector_store %arg13[%c0_50, %c0_51], %59 {strides = array<i32>} : memref<9x32xf32, #tpu.memory_space<vmem>>, vector<1x32xf32>,
    %61 = vector.extract_strided_slice %8 {offsets = [4, 0], sizes = [1, 32], strides = [1, 1]} : vector<64x32xf32> to vector<1x32xf32>
    %c1_52 = arith.constant 1 : index
    %c0_53 = arith.constant 0 : index
    %62 = vector.load %arg13[%c1_52, %c0_53] : memref<9x32xf32, #tpu.memory_space<vmem>>, vector<1x32xf32>
    tpu.vector_store %arg13[%c1_52, %c0_53], %61 {strides = array<i32>} : memref<9x32xf32, #tpu.memory_space<vmem>>, vector<1x32xf32>,
    %63 = vector.extract_strided_slice %8 {offsets = [6, 0], sizes = [1, 32], strides = [1, 1]} : vector<64x32xf32> to vector<1x32xf32>
    %c2_54 = arith.constant 2 : index
    %c0_55 = arith.constant 0 : index
    %64 = vector.load %arg13[%c2_54, %c0_55] : memref<9x32xf32, #tpu.memory_space<vmem>>, vector<1x32xf32>
    tpu.vector_store %arg13[%c2_54, %c0_55], %63 {strides = array<i32>} : memref<9x32xf32, #tpu.memory_space<vmem>>, vector<1x32xf32>,
    %65 = vector.extract_strided_slice %8 {offsets = [18, 0], sizes = [1, 32], strides = [1, 1]} : vector<64x32xf32> to vector<1x32xf32>
    %c3_56 = arith.constant 3 : index
    %c0_57 = arith.constant 0 : index
    %66 = vector.load %arg13[%c3_56, %c0_57] : memref<9x32xf32, #tpu.memory_space<vmem>>, vector<1x32xf32>
    tpu.vector_store %arg13[%c3_56, %c0_57], %65 {strides = array<i32>} : memref<9x32xf32, #tpu.memory_space<vmem>>, vector<1x32xf32>,
    %67 = vector.extract_strided_slice %8 {offsets = [20, 0], sizes = [1, 32], strides = [1, 1]} : vector<64x32xf32> to vector<1x32xf32>
    %c4_58 = arith.constant 4 : index
    %c0_59 = arith.constant 0 : index
    %68 = vector.load %arg13[%c4_58, %c0_59] : memref<9x32xf32, #tpu.memory_space<vmem>>, vector<1x32xf32>
    tpu.vector_store %arg13[%c4_58, %c0_59], %67 {strides = array<i32>} : memref<9x32xf32, #tpu.memory_space<vmem>>, vector<1x32xf32>,
    %69 = vector.extract_strided_slice %8 {offsets = [22, 0], sizes = [1, 32], strides = [1, 1]} : vector<64x32xf32> to vector<1x32xf32>
    %c5_60 = arith.constant 5 : index
    %c0_61 = arith.constant 0 : index
    %70 = vector.load %arg13[%c5_60, %c0_61] : memref<9x32xf32, #tpu.memory_space<vmem>>, vector<1x32xf32>
    tpu.vector_store %arg13[%c5_60, %c0_61], %69 {strides = array<i32>} : memref<9x32xf32, #tpu.memory_space<vmem>>, vector<1x32xf32>,
    %71 = vector.extract_strided_slice %8 {offsets = [34, 0], sizes = [1, 32], strides = [1, 1]} : vector<64x32xf32> to vector<1x32xf32>
    %c6_62 = arith.constant 6 : index
    %c0_63 = arith.constant 0 : index
    %72 = vector.load %arg13[%c6_62, %c0_63] : memref<9x32xf32, #tpu.memory_space<vmem>>, vector<1x32xf32>
    tpu.vector_store %arg13[%c6_62, %c0_63], %71 {strides = array<i32>} : memref<9x32xf32, #tpu.memory_space<vmem>>, vector<1x32xf32>,
    %73 = vector.extract_strided_slice %8 {offsets = [36, 0], sizes = [1, 32], strides = [1, 1]} : vector<64x32xf32> to vector<1x32xf32>
    %c7_64 = arith.constant 7 : index
    %c0_65 = arith.constant 0 : index
    %74 = vector.load %arg13[%c7_64, %c0_65] : memref<9x32xf32, #tpu.memory_space<vmem>>, vector<1x32xf32>
    tpu.vector_store %arg13[%c7_64, %c0_65], %73 {strides = array<i32>} : memref<9x32xf32, #tpu.memory_space<vmem>>, vector<1x32xf32>,
    %75 = vector.extract_strided_slice %8 {offsets = [38, 0], sizes = [1, 32], strides = [1, 1]} : vector<64x32xf32> to vector<1x32xf32>
    %c8_66 = arith.constant 8 : index
    %c0_67 = arith.constant 0 : index
    %76 = vector.load %arg13[%c8_66, %c0_67] : memref<9x32xf32, #tpu.memory_space<vmem>>, vector<1x32xf32>
    tpu.vector_store %arg13[%c8_66, %c0_67], %75 {strides = array<i32>} : memref<9x32xf32, #tpu.memory_space<vmem>>, vector<1x32xf32>,
    %c0_68 = arith.constant 0 : index
    %c0_69 = arith.constant 0 : index
    %77 = vector.load %arg13[%c0_68, %c0_69] : memref<9x32xf32, #tpu.memory_space<vmem>>, vector<9x32xf32>
    %78 = arith.truncf %77 : vector<9x32xf32> to vector<9x32xbf16>
    %c2_70 = arith.constant 2 : index
    %c0_71 = arith.constant 0 : index
    %c0_72 = arith.constant 0 : index
    %79 = vector.load %arg4[%c2_70, %c0_71, %c0_72] : memref<16x32x64xbf16, #tpu.memory_space<vmem>>, vector<1x32x64xbf16>
    %80 = vector.shape_cast %79 : vector<1x32x64xbf16> to vector<32x64xbf16>
    %cst_73 = arith.constant dense<0.000000e+00> : vector<9x64xf32>
    %81 = tpu.matmul %78, %80, %cst_73 {dimension_numbers = #tpu.dot_dimension_numbers<[1], [0], [0], [1], [0, 0, 1, 1], [], []>} : vector<9x32xbf16>, vector<32x64xbf16>, vector<9x64xf32> -> vector<9x64xf32>
    %82 = arith.addf %58, %81 : vector<9x64xf32>
    %83 = vector.extract_strided_slice %8 {offsets = [3, 0], sizes = [1, 32], strides = [1, 1]} : vector<64x32xf32> to vector<1x32xf32>
    %c0_74 = arith.constant 0 : index
    %c0_75 = arith.constant 0 : index
    %84 = vector.load %arg13[%c0_74, %c0_75] : memref<9x32xf32, #tpu.memory_space<vmem>>, vector<1x32xf32>
    tpu.vector_store %arg13[%c0_74, %c0_75], %83 {strides = array<i32>} : memref<9x32xf32, #tpu.memory_space<vmem>>, vector<1x32xf32>,
    %85 = vector.extract_strided_slice %8 {offsets = [5, 0], sizes = [1, 32], strides = [1, 1]} : vector<64x32xf32> to vector<1x32xf32>
    %c1_76 = arith.constant 1 : index
    %c0_77 = arith.constant 0 : index
    %86 = vector.load %arg13[%c1_76, %c0_77] : memref<9x32xf32, #tpu.memory_space<vmem>>, vector<1x32xf32>
    tpu.vector_store %arg13[%c1_76, %c0_77], %85 {strides = array<i32>} : memref<9x32xf32, #tpu.memory_space<vmem>>, vector<1x32xf32>,
    %87 = vector.extract_strided_slice %8 {offsets = [7, 0], sizes = [1, 32], strides = [1, 1]} : vector<64x32xf32> to vector<1x32xf32>
    %c2_78 = arith.constant 2 : index
    %c0_79 = arith.constant 0 : index
    %88 = vector.load %arg13[%c2_78, %c0_79] : memref<9x32xf32, #tpu.memory_space<vmem>>, vector<1x32xf32>
    tpu.vector_store %arg13[%c2_78, %c0_79], %87 {strides = array<i32>} : memref<9x32xf32, #tpu.memory_space<vmem>>, vector<1x32xf32>,
    %89 = vector.extract_strided_slice %8 {offsets = [19, 0], sizes = [1, 32], strides = [1, 1]} : vector<64x32xf32> to vector<1x32xf32>
    %c3_80 = arith.constant 3 : index
    %c0_81 = arith.constant 0 : index
    %90 = vector.load %arg13[%c3_80, %c0_81] : memref<9x32xf32, #tpu.memory_space<vmem>>, vector<1x32xf32>
    tpu.vector_store %arg13[%c3_80, %c0_81], %89 {strides = array<i32>} : memref<9x32xf32, #tpu.memory_space<vmem>>, vector<1x32xf32>,
    %91 = vector.extract_strided_slice %8 {offsets = [21, 0], sizes = [1, 32], strides = [1, 1]} : vector<64x32xf32> to vector<1x32xf32>
    %c4_82 = arith.constant 4 : index
    %c0_83 = arith.constant 0 : index
    %92 = vector.load %arg13[%c4_82, %c0_83] : memref<9x32xf32, #tpu.memory_space<vmem>>, vector<1x32xf32>
    tpu.vector_store %arg13[%c4_82, %c0_83], %91 {strides = array<i32>} : memref<9x32xf32, #tpu.memory_space<vmem>>, vector<1x32xf32>,
    %93 = vector.extract_strided_slice %8 {offsets = [23, 0], sizes = [1, 32], strides = [1, 1]} : vector<64x32xf32> to vector<1x32xf32>
    %c5_84 = arith.constant 5 : index
    %c0_85 = arith.constant 0 : index
    %94 = vector.load %arg13[%c5_84, %c0_85] : memref<9x32xf32, #tpu.memory_space<vmem>>, vector<1x32xf32>
    tpu.vector_store %arg13[%c5_84, %c0_85], %93 {strides = array<i32>} : memref<9x32xf32, #tpu.memory_space<vmem>>, vector<1x32xf32>,
    %95 = vector.extract_strided_slice %8 {offsets = [35, 0], sizes = [1, 32], strides = [1, 1]} : vector<64x32xf32> to vector<1x32xf32>
    %c6_86 = arith.constant 6 : index
    %c0_87 = arith.constant 0 : index
    %96 = vector.load %arg13[%c6_86, %c0_87] : memref<9x32xf32, #tpu.memory_space<vmem>>, vector<1x32xf32>
    tpu.vector_store %arg13[%c6_86, %c0_87], %95 {strides = array<i32>} : memref<9x32xf32, #tpu.memory_space<vmem>>, vector<1x32xf32>,
    %97 = vector.extract_strided_slice %8 {offsets = [37, 0], sizes = [1, 32], strides = [1, 1]} : vector<64x32xf32> to vector<1x32xf32>
    %c7_88 = arith.constant 7 : index
    %c0_89 = arith.constant 0 : index
    %98 = vector.load %arg13[%c7_88, %c0_89] : memref<9x32xf32, #tpu.memory_space<vmem>>, vector<1x32xf32>
    tpu.vector_store %arg13[%c7_88, %c0_89], %97 {strides = array<i32>} : memref<9x32xf32, #tpu.memory_space<vmem>>, vector<1x32xf32>,
    %99 = vector.extract_strided_slice %8 {offsets = [39, 0], sizes = [1, 32], strides = [1, 1]} : vector<64x32xf32> to vector<1x32xf32>
    %c8_90 = arith.constant 8 : index
    %c0_91 = arith.constant 0 : index
    %100 = vector.load %arg13[%c8_90, %c0_91] : memref<9x32xf32, #tpu.memory_space<vmem>>, vector<1x32xf32>
    tpu.vector_store %arg13[%c8_90, %c0_91], %99 {strides = array<i32>} : memref<9x32xf32, #tpu.memory_space<vmem>>, vector<1x32xf32>,
    %c0_92 = arith.constant 0 : index
    %c0_93 = arith.constant 0 : index
    %101 = vector.load %arg13[%c0_92, %c0_93] : memref<9x32xf32, #tpu.memory_space<vmem>>, vector<9x32xf32>
    %102 = arith.truncf %101 : vector<9x32xf32> to vector<9x32xbf16>
    %c3_94 = arith.constant 3 : index
    %c0_95 = arith.constant 0 : index
    %c0_96 = arith.constant 0 : index
    %103 = vector.load %arg4[%c3_94, %c0_95, %c0_96] : memref<16x32x64xbf16, #tpu.memory_space<vmem>>, vector<1x32x64xbf16>
    %104 = vector.shape_cast %103 : vector<1x32x64xbf16> to vector<32x64xbf16>
    %cst_97 = arith.constant dense<0.000000e+00> : vector<9x64xf32>
    %105 = tpu.matmul %102, %104, %cst_97 {dimension_numbers = #tpu.dot_dimension_numbers<[1], [0], [0], [1], [0, 0, 1, 1], [], []>} : vector<9x32xbf16>, vector<32x64xbf16>, vector<9x64xf32> -> vector<9x64xf32>
    %106 = arith.addf %82, %105 : vector<9x64xf32>
    %107 = vector.extract_strided_slice %8 {offsets = [8, 0], sizes = [1, 32], strides = [1, 1]} : vector<64x32xf32> to vector<1x32xf32>
    %c0_98 = arith.constant 0 : index
    %c0_99 = arith.constant 0 : index
    %108 = vector.load %arg13[%c0_98, %c0_99] : memref<9x32xf32, #tpu.memory_space<vmem>>, vector<1x32xf32>
    tpu.vector_store %arg13[%c0_98, %c0_99], %107 {strides = array<i32>} : memref<9x32xf32, #tpu.memory_space<vmem>>, vector<1x32xf32>,
    %109 = vector.extract_strided_slice %8 {offsets = [10, 0], sizes = [1, 32], strides = [1, 1]} : vector<64x32xf32> to vector<1x32xf32>
    %c1_100 = arith.constant 1 : index
    %c0_101 = arith.constant 0 : index
    %110 = vector.load %arg13[%c1_100, %c0_101] : memref<9x32xf32, #tpu.memory_space<vmem>>, vector<1x32xf32>
    tpu.vector_store %arg13[%c1_100, %c0_101], %109 {strides = array<i32>} : memref<9x32xf32, #tpu.memory_space<vmem>>, vector<1x32xf32>,
    %111 = vector.extract_strided_slice %8 {offsets = [12, 0], sizes = [1, 32], strides = [1, 1]} : vector<64x32xf32> to vector<1x32xf32>
    %c2_102 = arith.constant 2 : index
    %c0_103 = arith.constant 0 : index
    %112 = vector.load %arg13[%c2_102, %c0_103] : memref<9x32xf32, #tpu.memory_space<vmem>>, vector<1x32xf32>
    tpu.vector_store %arg13[%c2_102, %c0_103], %111 {strides = array<i32>} : memref<9x32xf32, #tpu.memory_space<vmem>>, vector<1x32xf32>,
    %113 = vector.extract_strided_slice %8 {offsets = [24, 0], sizes = [1, 32], strides = [1, 1]} : vector<64x32xf32> to vector<1x32xf32>
    %c3_104 = arith.constant 3 : index
    %c0_105 = arith.constant 0 : index
    %114 = vector.load %arg13[%c3_104, %c0_105] : memref<9x32xf32, #tpu.memory_space<vmem>>, vector<1x32xf32>
    tpu.vector_store %arg13[%c3_104, %c0_105], %113 {strides = array<i32>} : memref<9x32xf32, #tpu.memory_space<vmem>>, vector<1x32xf32>,
    %115 = vector.extract_strided_slice %8 {offsets = [26, 0], sizes = [1, 32], strides = [1, 1]} : vector<64x32xf32> to vector<1x32xf32>
    %c4_106 = arith.constant 4 : index
    %c0_107 = arith.constant 0 : index
    %116 = vector.load %arg13[%c4_106, %c0_107] : memref<9x32xf32, #tpu.memory_space<vmem>>, vector<1x32xf32>
    tpu.vector_store %arg13[%c4_106, %c0_107], %115 {strides = array<i32>} : memref<9x32xf32, #tpu.memory_space<vmem>>, vector<1x32xf32>,
    %117 = vector.extract_strided_slice %8 {offsets = [28, 0], sizes = [1, 32], strides = [1, 1]} : vector<64x32xf32> to vector<1x32xf32>
    %c5_108 = arith.constant 5 : index
    %c0_109 = arith.constant 0 : index
    %118 = vector.load %arg13[%c5_108, %c0_109] : memref<9x32xf32, #tpu.memory_space<vmem>>, vector<1x32xf32>
    tpu.vector_store %arg13[%c5_108, %c0_109], %117 {strides = array<i32>} : memref<9x32xf32, #tpu.memory_space<vmem>>, vector<1x32xf32>,
    %119 = vector.extract_strided_slice %8 {offsets = [40, 0], sizes = [1, 32], strides = [1, 1]} : vector<64x32xf32> to vector<1x32xf32>
    %c6_110 = arith.constant 6 : index
    %c0_111 = arith.constant 0 : index
    %120 = vector.load %arg13[%c6_110, %c0_111] : memref<9x32xf32, #tpu.memory_space<vmem>>, vector<1x32xf32>
    tpu.vector_store %arg13[%c6_110, %c0_111], %119 {strides = array<i32>} : memref<9x32xf32, #tpu.memory_space<vmem>>, vector<1x32xf32>,
    %121 = vector.extract_strided_slice %8 {offsets = [42, 0], sizes = [1, 32], strides = [1, 1]} : vector<64x32xf32> to vector<1x32xf32>
    %c7_112 = arith.constant 7 : index
    %c0_113 = arith.constant 0 : index
    %122 = vector.load %arg13[%c7_112, %c0_113] : memref<9x32xf32, #tpu.memory_space<vmem>>, vector<1x32xf32>
    tpu.vector_store %arg13[%c7_112, %c0_113], %121 {strides = array<i32>} : memref<9x32xf32, #tpu.memory_space<vmem>>, vector<1x32xf32>,
    %123 = vector.extract_strided_slice %8 {offsets = [44, 0], sizes = [1, 32], strides = [1, 1]} : vector<64x32xf32> to vector<1x32xf32>
    %c8_114 = arith.constant 8 : index
    %c0_115 = arith.constant 0 : index
    %124 = vector.load %arg13[%c8_114, %c0_115] : memref<9x32xf32, #tpu.memory_space<vmem>>, vector<1x32xf32>
    tpu.vector_store %arg13[%c8_114, %c0_115], %123 {strides = array<i32>} : memref<9x32xf32, #tpu.memory_space<vmem>>, vector<1x32xf32>,
    %c0_116 = arith.constant 0 : index
    %c0_117 = arith.constant 0 : index
    %125 = vector.load %arg13[%c0_116, %c0_117] : memref<9x32xf32, #tpu.memory_space<vmem>>, vector<9x32xf32>
    %126 = arith.truncf %125 : vector<9x32xf32> to vector<9x32xbf16>
    %c4_118 = arith.constant 4 : index
    %c0_119 = arith.constant 0 : index
    %c0_120 = arith.constant 0 : index
    %127 = vector.load %arg4[%c4_118, %c0_119, %c0_120] : memref<16x32x64xbf16, #tpu.memory_space<vmem>>, vector<1x32x64xbf16>
    %128 = vector.shape_cast %127 : vector<1x32x64xbf16> to vector<32x64xbf16>
    %cst_121 = arith.constant dense<0.000000e+00> : vector<9x64xf32>
    %129 = tpu.matmul %126, %128, %cst_121 {dimension_numbers = #tpu.dot_dimension_numbers<[1], [0], [0], [1], [0, 0, 1, 1], [], []>} : vector<9x32xbf16>, vector<32x64xbf16>, vector<9x64xf32> -> vector<9x64xf32>
    %130 = arith.addf %106, %129 : vector<9x64xf32>
    %131 = vector.extract_strided_slice %8 {offsets = [9, 0], sizes = [1, 32], strides = [1, 1]} : vector<64x32xf32> to vector<1x32xf32>
    %c0_122 = arith.constant 0 : index
    %c0_123 = arith.constant 0 : index
    %132 = vector.load %arg13[%c0_122, %c0_123] : memref<9x32xf32, #tpu.memory_space<vmem>>, vector<1x32xf32>
    tpu.vector_store %arg13[%c0_122, %c0_123], %131 {strides = array<i32>} : memref<9x32xf32, #tpu.memory_space<vmem>>, vector<1x32xf32>,
    %133 = vector.extract_strided_slice %8 {offsets = [11, 0], sizes = [1, 32], strides = [1, 1]} : vector<64x32xf32> to vector<1x32xf32>
    %c1_124 = arith.constant 1 : index
    %c0_125 = arith.constant 0 : index
    %134 = vector.load %arg13[%c1_124, %c0_125] : memref<9x32xf32, #tpu.memory_space<vmem>>, vector<1x32xf32>
    tpu.vector_store %arg13[%c1_124, %c0_125], %133 {strides = array<i32>} : memref<9x32xf32, #tpu.memory_space<vmem>>, vector<1x32xf32>,
    %135 = vector.extract_strided_slice %8 {offsets = [13, 0], sizes = [1, 32], strides = [1, 1]} : vector<64x32xf32> to vector<1x32xf32>
    %c2_126 = arith.constant 2 : index
    %c0_127 = arith.constant 0 : index
    %136 = vector.load %arg13[%c2_126, %c0_127] : memref<9x32xf32, #tpu.memory_space<vmem>>, vector<1x32xf32>
    tpu.vector_store %arg13[%c2_126, %c0_127], %135 {strides = array<i32>} : memref<9x32xf32, #tpu.memory_space<vmem>>, vector<1x32xf32>,
    %137 = vector.extract_strided_slice %8 {offsets = [25, 0], sizes = [1, 32], strides = [1, 1]} : vector<64x32xf32> to vector<1x32xf32>
    %c3_128 = arith.constant 3 : index
    %c0_129 = arith.constant 0 : index
    %138 = vector.load %arg13[%c3_128, %c0_129] : memref<9x32xf32, #tpu.memory_space<vmem>>, vector<1x32xf32>
    tpu.vector_store %arg13[%c3_128, %c0_129], %137 {strides = array<i32>} : memref<9x32xf32, #tpu.memory_space<vmem>>, vector<1x32xf32>,
    %139 = vector.extract_strided_slice %8 {offsets = [27, 0], sizes = [1, 32], strides = [1, 1]} : vector<64x32xf32> to vector<1x32xf32>
    %c4_130 = arith.constant 4 : index
    %c0_131 = arith.constant 0 : index
    %140 = vector.load %arg13[%c4_130, %c0_131] : memref<9x32xf32, #tpu.memory_space<vmem>>, vector<1x32xf32>
    tpu.vector_store %arg13[%c4_130, %c0_131], %139 {strides = array<i32>} : memref<9x32xf32, #tpu.memory_space<vmem>>, vector<1x32xf32>,
    %141 = vector.extract_strided_slice %8 {offsets = [29, 0], sizes = [1, 32], strides = [1, 1]} : vector<64x32xf32> to vector<1x32xf32>
    %c5_132 = arith.constant 5 : index
    %c0_133 = arith.constant 0 : index
    %142 = vector.load %arg13[%c5_132, %c0_133] : memref<9x32xf32, #tpu.memory_space<vmem>>, vector<1x32xf32>
    tpu.vector_store %arg13[%c5_132, %c0_133], %141 {strides = array<i32>} : memref<9x32xf32, #tpu.memory_space<vmem>>, vector<1x32xf32>,
    %143 = vector.extract_strided_slice %8 {offsets = [41, 0], sizes = [1, 32], strides = [1, 1]} : vector<64x32xf32> to vector<1x32xf32>
    %c6_134 = arith.constant 6 : index
    %c0_135 = arith.constant 0 : index
    %144 = vector.load %arg13[%c6_134, %c0_135] : memref<9x32xf32, #tpu.memory_space<vmem>>, vector<1x32xf32>
    tpu.vector_store %arg13[%c6_134, %c0_135], %143 {strides = array<i32>} : memref<9x32xf32, #tpu.memory_space<vmem>>, vector<1x32xf32>,
    %145 = vector.extract_strided_slice %8 {offsets = [43, 0], sizes = [1, 32], strides = [1, 1]} : vector<64x32xf32> to vector<1x32xf32>
    %c7_136 = arith.constant 7 : index
    %c0_137 = arith.constant 0 : index
    %146 = vector.load %arg13[%c7_136, %c0_137] : memref<9x32xf32, #tpu.memory_space<vmem>>, vector<1x32xf32>
    tpu.vector_store %arg13[%c7_136, %c0_137], %145 {strides = array<i32>} : memref<9x32xf32, #tpu.memory_space<vmem>>, vector<1x32xf32>,
    %147 = vector.extract_strided_slice %8 {offsets = [45, 0], sizes = [1, 32], strides = [1, 1]} : vector<64x32xf32> to vector<1x32xf32>
    %c8_138 = arith.constant 8 : index
    %c0_139 = arith.constant 0 : index
    %148 = vector.load %arg13[%c8_138, %c0_139] : memref<9x32xf32, #tpu.memory_space<vmem>>, vector<1x32xf32>
    tpu.vector_store %arg13[%c8_138, %c0_139], %147 {strides = array<i32>} : memref<9x32xf32, #tpu.memory_space<vmem>>, vector<1x32xf32>,
    %c0_140 = arith.constant 0 : index
    %c0_141 = arith.constant 0 : index
    %149 = vector.load %arg13[%c0_140, %c0_141] : memref<9x32xf32, #tpu.memory_space<vmem>>, vector<9x32xf32>
    %150 = arith.truncf %149 : vector<9x32xf32> to vector<9x32xbf16>
    %c5_142 = arith.constant 5 : index
    %c0_143 = arith.constant 0 : index
    %c0_144 = arith.constant 0 : index
    %151 = vector.load %arg4[%c5_142, %c0_143, %c0_144] : memref<16x32x64xbf16, #tpu.memory_space<vmem>>, vector<1x32x64xbf16>
    %152 = vector.shape_cast %151 : vector<1x32x64xbf16> to vector<32x64xbf16>
    %cst_145 = arith.constant dense<0.000000e+00> : vector<9x64xf32>
    %153 = tpu.matmul %150, %152, %cst_145 {dimension_numbers = #tpu.dot_dimension_numbers<[1], [0], [0], [1], [0, 0, 1, 1], [], []>} : vector<9x32xbf16>, vector<32x64xbf16>, vector<9x64xf32> -> vector<9x64xf32>
    %154 = arith.addf %130, %153 : vector<9x64xf32>
    %155 = vector.extract_strided_slice %8 {offsets = [10, 0], sizes = [1, 32], strides = [1, 1]} : vector<64x32xf32> to vector<1x32xf32>
    %c0_146 = arith.constant 0 : index
    %c0_147 = arith.constant 0 : index
    %156 = vector.load %arg13[%c0_146, %c0_147] : memref<9x32xf32, #tpu.memory_space<vmem>>, vector<1x32xf32>
    tpu.vector_store %arg13[%c0_146, %c0_147], %155 {strides = array<i32>} : memref<9x32xf32, #tpu.memory_space<vmem>>, vector<1x32xf32>,
    %157 = vector.extract_strided_slice %8 {offsets = [12, 0], sizes = [1, 32], strides = [1, 1]} : vector<64x32xf32> to vector<1x32xf32>
    %c1_148 = arith.constant 1 : index
    %c0_149 = arith.constant 0 : index
    %158 = vector.load %arg13[%c1_148, %c0_149] : memref<9x32xf32, #tpu.memory_space<vmem>>, vector<1x32xf32>
    tpu.vector_store %arg13[%c1_148, %c0_149], %157 {strides = array<i32>} : memref<9x32xf32, #tpu.memory_space<vmem>>, vector<1x32xf32>,
    %159 = vector.extract_strided_slice %8 {offsets = [14, 0], sizes = [1, 32], strides = [1, 1]} : vector<64x32xf32> to vector<1x32xf32>
    %c2_150 = arith.constant 2 : index
    %c0_151 = arith.constant 0 : index
    %160 = vector.load %arg13[%c2_150, %c0_151] : memref<9x32xf32, #tpu.memory_space<vmem>>, vector<1x32xf32>
    tpu.vector_store %arg13[%c2_150, %c0_151], %159 {strides = array<i32>} : memref<9x32xf32, #tpu.memory_space<vmem>>, vector<1x32xf32>,
    %161 = vector.extract_strided_slice %8 {offsets = [26, 0], sizes = [1, 32], strides = [1, 1]} : vector<64x32xf32> to vector<1x32xf32>
    %c3_152 = arith.constant 3 : index
    %c0_153 = arith.constant 0 : index
    %162 = vector.load %arg13[%c3_152, %c0_153] : memref<9x32xf32, #tpu.memory_space<vmem>>, vector<1x32xf32>
    tpu.vector_store %arg13[%c3_152, %c0_153], %161 {strides = array<i32>} : memref<9x32xf32, #tpu.memory_space<vmem>>, vector<1x32xf32>,
    %163 = vector.extract_strided_slice %8 {offsets = [28, 0], sizes = [1, 32], strides = [1, 1]} : vector<64x32xf32> to vector<1x32xf32>
    %c4_154 = arith.constant 4 : index
    %c0_155 = arith.constant 0 : index
    %164 = vector.load %arg13[%c4_154, %c0_155] : memref<9x32xf32, #tpu.memory_space<vmem>>, vector<1x32xf32>
    tpu.vector_store %arg13[%c4_154, %c0_155], %163 {strides = array<i32>} : memref<9x32xf32, #tpu.memory_space<vmem>>, vector<1x32xf32>,
    %165 = vector.extract_strided_slice %8 {offsets = [30, 0], sizes = [1, 32], strides = [1, 1]} : vector<64x32xf32> to vector<1x32xf32>
    %c5_156 = arith.constant 5 : index
    %c0_157 = arith.constant 0 : index
    %166 = vector.load %arg13[%c5_156, %c0_157] : memref<9x32xf32, #tpu.memory_space<vmem>>, vector<1x32xf32>
    tpu.vector_store %arg13[%c5_156, %c0_157], %165 {strides = array<i32>} : memref<9x32xf32, #tpu.memory_space<vmem>>, vector<1x32xf32>,
    %167 = vector.extract_strided_slice %8 {offsets = [42, 0], sizes = [1, 32], strides = [1, 1]} : vector<64x32xf32> to vector<1x32xf32>
    %c6_158 = arith.constant 6 : index
    %c0_159 = arith.constant 0 : index
    %168 = vector.load %arg13[%c6_158, %c0_159] : memref<9x32xf32, #tpu.memory_space<vmem>>, vector<1x32xf32>
    tpu.vector_store %arg13[%c6_158, %c0_159], %167 {strides = array<i32>} : memref<9x32xf32, #tpu.memory_space<vmem>>, vector<1x32xf32>,
    %169 = vector.extract_strided_slice %8 {offsets = [44, 0], sizes = [1, 32], strides = [1, 1]} : vector<64x32xf32> to vector<1x32xf32>
    %c7_160 = arith.constant 7 : index
    %c0_161 = arith.constant 0 : index
    %170 = vector.load %arg13[%c7_160, %c0_161] : memref<9x32xf32, #tpu.memory_space<vmem>>, vector<1x32xf32>
    tpu.vector_store %arg13[%c7_160, %c0_161], %169 {strides = array<i32>} : memref<9x32xf32, #tpu.memory_space<vmem>>, vector<1x32xf32>,
    %171 = vector.extract_strided_slice %8 {offsets = [46, 0], sizes = [1, 32], strides = [1, 1]} : vector<64x32xf32> to vector<1x32xf32>
    %c8_162 = arith.constant 8 : index
    %c0_163 = arith.constant 0 : index
    %172 = vector.load %arg13[%c8_162, %c0_163] : memref<9x32xf32, #tpu.memory_space<vmem>>, vector<1x32xf32>
    tpu.vector_store %arg13[%c8_162, %c0_163], %171 {strides = array<i32>} : memref<9x32xf32, #tpu.memory_space<vmem>>, vector<1x32xf32>,
    %c0_164 = arith.constant 0 : index
    %c0_165 = arith.constant 0 : index
    %173 = vector.load %arg13[%c0_164, %c0_165] : memref<9x32xf32, #tpu.memory_space<vmem>>, vector<9x32xf32>
    %174 = arith.truncf %173 : vector<9x32xf32> to vector<9x32xbf16>
    %c6_166 = arith.constant 6 : index
    %c0_167 = arith.constant 0 : index
    %c0_168 = arith.constant 0 : index
    %175 = vector.load %arg4[%c6_166, %c0_167, %c0_168] : memref<16x32x64xbf16, #tpu.memory_space<vmem>>, vector<1x32x64xbf16>
    %176 = vector.shape_cast %175 : vector<1x32x64xbf16> to vector<32x64xbf16>
    %cst_169 = arith.constant dense<0.000000e+00> : vector<9x64xf32>
    %177 = tpu.matmul %174, %176, %cst_169 {dimension_numbers = #tpu.dot_dimension_numbers<[1], [0], [0], [1], [0, 0, 1, 1], [], []>} : vector<9x32xbf16>, vector<32x64xbf16>, vector<9x64xf32> -> vector<9x64xf32>
    %178 = arith.addf %154, %177 : vector<9x64xf32>
    %179 = vector.extract_strided_slice %8 {offsets = [11, 0], sizes = [1, 32], strides = [1, 1]} : vector<64x32xf32> to vector<1x32xf32>
    %c0_170 = arith.constant 0 : index
    %c0_171 = arith.constant 0 : index
    %180 = vector.load %arg13[%c0_170, %c0_171] : memref<9x32xf32, #tpu.memory_space<vmem>>, vector<1x32xf32>
    tpu.vector_store %arg13[%c0_170, %c0_171], %179 {strides = array<i32>} : memref<9x32xf32, #tpu.memory_space<vmem>>, vector<1x32xf32>,
    %181 = vector.extract_strided_slice %8 {offsets = [13, 0], sizes = [1, 32], strides = [1, 1]} : vector<64x32xf32> to vector<1x32xf32>
    %c1_172 = arith.constant 1 : index
    %c0_173 = arith.constant 0 : index
    %182 = vector.load %arg13[%c1_172, %c0_173] : memref<9x32xf32, #tpu.memory_space<vmem>>, vector<1x32xf32>
    tpu.vector_store %arg13[%c1_172, %c0_173], %181 {strides = array<i32>} : memref<9x32xf32, #tpu.memory_space<vmem>>, vector<1x32xf32>,
    %183 = vector.extract_strided_slice %8 {offsets = [15, 0], sizes = [1, 32], strides = [1, 1]} : vector<64x32xf32> to vector<1x32xf32>
    %c2_174 = arith.constant 2 : index
    %c0_175 = arith.constant 0 : index
    %184 = vector.load %arg13[%c2_174, %c0_175] : memref<9x32xf32, #tpu.memory_space<vmem>>, vector<1x32xf32>
    tpu.vector_store %arg13[%c2_174, %c0_175], %183 {strides = array<i32>} : memref<9x32xf32, #tpu.memory_space<vmem>>, vector<1x32xf32>,
    %185 = vector.extract_strided_slice %8 {offsets = [27, 0], sizes = [1, 32], strides = [1, 1]} : vector<64x32xf32> to vector<1x32xf32>
    %c3_176 = arith.constant 3 : index
    %c0_177 = arith.constant 0 : index
    %186 = vector.load %arg13[%c3_176, %c0_177] : memref<9x32xf32, #tpu.memory_space<vmem>>, vector<1x32xf32>
    tpu.vector_store %arg13[%c3_176, %c0_177], %185 {strides = array<i32>} : memref<9x32xf32, #tpu.memory_space<vmem>>, vector<1x32xf32>,
    %187 = vector.extract_strided_slice %8 {offsets = [29, 0], sizes = [1, 32], strides = [1, 1]} : vector<64x32xf32> to vector<1x32xf32>
    %c4_178 = arith.constant 4 : index
    %c0_179 = arith.constant 0 : index
    %188 = vector.load %arg13[%c4_178, %c0_179] : memref<9x32xf32, #tpu.memory_space<vmem>>, vector<1x32xf32>
    tpu.vector_store %arg13[%c4_178, %c0_179], %187 {strides = array<i32>} : memref<9x32xf32, #tpu.memory_space<vmem>>, vector<1x32xf32>,
    %189 = vector.extract_strided_slice %8 {offsets = [31, 0], sizes = [1, 32], strides = [1, 1]} : vector<64x32xf32> to vector<1x32xf32>
    %c5_180 = arith.constant 5 : index
    %c0_181 = arith.constant 0 : index
    %190 = vector.load %arg13[%c5_180, %c0_181] : memref<9x32xf32, #tpu.memory_space<vmem>>, vector<1x32xf32>
    tpu.vector_store %arg13[%c5_180, %c0_181], %189 {strides = array<i32>} : memref<9x32xf32, #tpu.memory_space<vmem>>, vector<1x32xf32>,
    %191 = vector.extract_strided_slice %8 {offsets = [43, 0], sizes = [1, 32], strides = [1, 1]} : vector<64x32xf32> to vector<1x32xf32>
    %c6_182 = arith.constant 6 : index
    %c0_183 = arith.constant 0 : index
    %192 = vector.load %arg13[%c6_182, %c0_183] : memref<9x32xf32, #tpu.memory_space<vmem>>, vector<1x32xf32>
    tpu.vector_store %arg13[%c6_182, %c0_183], %191 {strides = array<i32>} : memref<9x32xf32, #tpu.memory_space<vmem>>, vector<1x32xf32>,
    %193 = vector.extract_strided_slice %8 {offsets = [45, 0], sizes = [1, 32], strides = [1, 1]} : vector<64x32xf32> to vector<1x32xf32>
    %c7_184 = arith.constant 7 : index
    %c0_185 = arith.constant 0 : index
    %194 = vector.load %arg13[%c7_184, %c0_185] : memref<9x32xf32, #tpu.memory_space<vmem>>, vector<1x32xf32>
    tpu.vector_store %arg13[%c7_184, %c0_185], %193 {strides = array<i32>} : memref<9x32xf32, #tpu.memory_space<vmem>>, vector<1x32xf32>,
    %195 = vector.extract_strided_slice %8 {offsets = [47, 0], sizes = [1, 32], strides = [1, 1]} : vector<64x32xf32> to vector<1x32xf32>
    %c8_186 = arith.constant 8 : index
    %c0_187 = arith.constant 0 : index
    %196 = vector.load %arg13[%c8_186, %c0_187] : memref<9x32xf32, #tpu.memory_space<vmem>>, vector<1x32xf32>
    tpu.vector_store %arg13[%c8_186, %c0_187], %195 {strides = array<i32>} : memref<9x32xf32, #tpu.memory_space<vmem>>, vector<1x32xf32>,
    %c0_188 = arith.constant 0 : index
    %c0_189 = arith.constant 0 : index
    %197 = vector.load %arg13[%c0_188, %c0_189] : memref<9x32xf32, #tpu.memory_space<vmem>>, vector<9x32xf32>
    %198 = arith.truncf %197 : vector<9x32xf32> to vector<9x32xbf16>
    %c7_190 = arith.constant 7 : index
    %c0_191 = arith.constant 0 : index
    %c0_192 = arith.constant 0 : index
    %199 = vector.load %arg4[%c7_190, %c0_191, %c0_192] : memref<16x32x64xbf16, #tpu.memory_space<vmem>>, vector<1x32x64xbf16>
    %200 = vector.shape_cast %199 : vector<1x32x64xbf16> to vector<32x64xbf16>
    %cst_193 = arith.constant dense<0.000000e+00> : vector<9x64xf32>
    %201 = tpu.matmul %198, %200, %cst_193 {dimension_numbers = #tpu.dot_dimension_numbers<[1], [0], [0], [1], [0, 0, 1, 1], [], []>} : vector<9x32xbf16>, vector<32x64xbf16>, vector<9x64xf32> -> vector<9x64xf32>
    %202 = arith.addf %178, %201 : vector<9x64xf32>
    %203 = vector.extract_strided_slice %8 {offsets = [16, 0], sizes = [1, 32], strides = [1, 1]} : vector<64x32xf32> to vector<1x32xf32>
    %c0_194 = arith.constant 0 : index
    %c0_195 = arith.constant 0 : index
    %204 = vector.load %arg13[%c0_194, %c0_195] : memref<9x32xf32, #tpu.memory_space<vmem>>, vector<1x32xf32>
    tpu.vector_store %arg13[%c0_194, %c0_195], %203 {strides = array<i32>} : memref<9x32xf32, #tpu.memory_space<vmem>>, vector<1x32xf32>,
    %205 = vector.extract_strided_slice %8 {offsets = [18, 0], sizes = [1, 32], strides = [1, 1]} : vector<64x32xf32> to vector<1x32xf32>
    %c1_196 = arith.constant 1 : index
    %c0_197 = arith.constant 0 : index
    %206 = vector.load %arg13[%c1_196, %c0_197] : memref<9x32xf32, #tpu.memory_space<vmem>>, vector<1x32xf32>
    tpu.vector_store %arg13[%c1_196, %c0_197], %205 {strides = array<i32>} : memref<9x32xf32, #tpu.memory_space<vmem>>, vector<1x32xf32>,
    %207 = vector.extract_strided_slice %8 {offsets = [20, 0], sizes = [1, 32], strides = [1, 1]} : vector<64x32xf32> to vector<1x32xf32>
    %c2_198 = arith.constant 2 : index
    %c0_199 = arith.constant 0 : index
    %208 = vector.load %arg13[%c2_198, %c0_199] : memref<9x32xf32, #tpu.memory_space<vmem>>, vector<1x32xf32>
    tpu.vector_store %arg13[%c2_198, %c0_199], %207 {strides = array<i32>} : memref<9x32xf32, #tpu.memory_space<vmem>>, vector<1x32xf32>,
    %209 = vector.extract_strided_slice %8 {offsets = [32, 0], sizes = [1, 32], strides = [1, 1]} : vector<64x32xf32> to vector<1x32xf32>
    %c3_200 = arith.constant 3 : index
    %c0_201 = arith.constant 0 : index
    %210 = vector.load %arg13[%c3_200, %c0_201] : memref<9x32xf32, #tpu.memory_space<vmem>>, vector<1x32xf32>
    tpu.vector_store %arg13[%c3_200, %c0_201], %209 {strides = array<i32>} : memref<9x32xf32, #tpu.memory_space<vmem>>, vector<1x32xf32>,
    %211 = vector.extract_strided_slice %8 {offsets = [34, 0], sizes = [1, 32], strides = [1, 1]} : vector<64x32xf32> to vector<1x32xf32>
    %c4_202 = arith.constant 4 : index
    %c0_203 = arith.constant 0 : index
    %212 = vector.load %arg13[%c4_202, %c0_203] : memref<9x32xf32, #tpu.memory_space<vmem>>, vector<1x32xf32>
    tpu.vector_store %arg13[%c4_202, %c0_203], %211 {strides = array<i32>} : memref<9x32xf32, #tpu.memory_space<vmem>>, vector<1x32xf32>,
    %213 = vector.extract_strided_slice %8 {offsets = [36, 0], sizes = [1, 32], strides = [1, 1]} : vector<64x32xf32> to vector<1x32xf32>
    %c5_204 = arith.constant 5 : index
    %c0_205 = arith.constant 0 : index
    %214 = vector.load %arg13[%c5_204, %c0_205] : memref<9x32xf32, #tpu.memory_space<vmem>>, vector<1x32xf32>
    tpu.vector_store %arg13[%c5_204, %c0_205], %213 {strides = array<i32>} : memref<9x32xf32, #tpu.memory_space<vmem>>, vector<1x32xf32>,
    %215 = vector.extract_strided_slice %8 {offsets = [48, 0], sizes = [1, 32], strides = [1, 1]} : vector<64x32xf32> to vector<1x32xf32>
    %c6_206 = arith.constant 6 : index
    %c0_207 = arith.constant 0 : index
    %216 = vector.load %arg13[%c6_206, %c0_207] : memref<9x32xf32, #tpu.memory_space<vmem>>, vector<1x32xf32>
    tpu.vector_store %arg13[%c6_206, %c0_207], %215 {strides = array<i32>} : memref<9x32xf32, #tpu.memory_space<vmem>>, vector<1x32xf32>,
    %217 = vector.extract_strided_slice %8 {offsets = [50, 0], sizes = [1, 32], strides = [1, 1]} : vector<64x32xf32> to vector<1x32xf32>
    %c7_208 = arith.constant 7 : index
    %c0_209 = arith.constant 0 : index
    %218 = vector.load %arg13[%c7_208, %c0_209] : memref<9x32xf32, #tpu.memory_space<vmem>>, vector<1x32xf32>
    tpu.vector_store %arg13[%c7_208, %c0_209], %217 {strides = array<i32>} : memref<9x32xf32, #tpu.memory_space<vmem>>, vector<1x32xf32>,
    %219 = vector.extract_strided_slice %8 {offsets = [52, 0], sizes = [1, 32], strides = [1, 1]} : vector<64x32xf32> to vector<1x32xf32>
    %c8_210 = arith.constant 8 : index
    %c0_211 = arith.constant 0 : index
    %220 = vector.load %arg13[%c8_210, %c0_211] : memref<9x32xf32, #tpu.memory_space<vmem>>, vector<1x32xf32>
    tpu.vector_store %arg13[%c8_210, %c0_211], %219 {strides = array<i32>} : memref<9x32xf32, #tpu.memory_space<vmem>>, vector<1x32xf32>,
    %c0_212 = arith.constant 0 : index
    %c0_213 = arith.constant 0 : index
    %221 = vector.load %arg13[%c0_212, %c0_213] : memref<9x32xf32, #tpu.memory_space<vmem>>, vector<9x32xf32>
    %222 = arith.truncf %221 : vector<9x32xf32> to vector<9x32xbf16>
    %c8_214 = arith.constant 8 : index
    %c0_215 = arith.constant 0 : index
    %c0_216 = arith.constant 0 : index
    %223 = vector.load %arg4[%c8_214, %c0_215, %c0_216] : memref<16x32x64xbf16, #tpu.memory_space<vmem>>, vector<1x32x64xbf16>
    %224 = vector.shape_cast %223 : vector<1x32x64xbf16> to vector<32x64xbf16>
    %cst_217 = arith.constant dense<0.000000e+00> : vector<9x64xf32>
    %225 = tpu.matmul %222, %224, %cst_217 {dimension_numbers = #tpu.dot_dimension_numbers<[1], [0], [0], [1], [0, 0, 1, 1], [], []>} : vector<9x32xbf16>, vector<32x64xbf16>, vector<9x64xf32> -> vector<9x64xf32>
    %226 = arith.addf %202, %225 : vector<9x64xf32>
    %227 = vector.extract_strided_slice %8 {offsets = [17, 0], sizes = [1, 32], strides = [1, 1]} : vector<64x32xf32> to vector<1x32xf32>
    %c0_218 = arith.constant 0 : index
    %c0_219 = arith.constant 0 : index
    %228 = vector.load %arg13[%c0_218, %c0_219] : memref<9x32xf32, #tpu.memory_space<vmem>>, vector<1x32xf32>
    tpu.vector_store %arg13[%c0_218, %c0_219], %227 {strides = array<i32>} : memref<9x32xf32, #tpu.memory_space<vmem>>, vector<1x32xf32>,
    %229 = vector.extract_strided_slice %8 {offsets = [19, 0], sizes = [1, 32], strides = [1, 1]} : vector<64x32xf32> to vector<1x32xf32>
    %c1_220 = arith.constant 1 : index
    %c0_221 = arith.constant 0 : index
    %230 = vector.load %arg13[%c1_220, %c0_221] : memref<9x32xf32, #tpu.memory_space<vmem>>, vector<1x32xf32>
    tpu.vector_store %arg13[%c1_220, %c0_221], %229 {strides = array<i32>} : memref<9x32xf32, #tpu.memory_space<vmem>>, vector<1x32xf32>,
    %231 = vector.extract_strided_slice %8 {offsets = [21, 0], sizes = [1, 32], strides = [1, 1]} : vector<64x32xf32> to vector<1x32xf32>
    %c2_222 = arith.constant 2 : index
    %c0_223 = arith.constant 0 : index
    %232 = vector.load %arg13[%c2_222, %c0_223] : memref<9x32xf32, #tpu.memory_space<vmem>>, vector<1x32xf32>
    tpu.vector_store %arg13[%c2_222, %c0_223], %231 {strides = array<i32>} : memref<9x32xf32, #tpu.memory_space<vmem>>, vector<1x32xf32>,
    %233 = vector.extract_strided_slice %8 {offsets = [33, 0], sizes = [1, 32], strides = [1, 1]} : vector<64x32xf32> to vector<1x32xf32>
    %c3_224 = arith.constant 3 : index
    %c0_225 = arith.constant 0 : index
    %234 = vector.load %arg13[%c3_224, %c0_225] : memref<9x32xf32, #tpu.memory_space<vmem>>, vector<1x32xf32>
    tpu.vector_store %arg13[%c3_224, %c0_225], %233 {strides = array<i32>} : memref<9x32xf32, #tpu.memory_space<vmem>>, vector<1x32xf32>,
    %235 = vector.extract_strided_slice %8 {offsets = [35, 0], sizes = [1, 32], strides = [1, 1]} : vector<64x32xf32> to vector<1x32xf32>
    %c4_226 = arith.constant 4 : index
    %c0_227 = arith.constant 0 : index
    %236 = vector.load %arg13[%c4_226, %c0_227] : memref<9x32xf32, #tpu.memory_space<vmem>>, vector<1x32xf32>
    tpu.vector_store %arg13[%c4_226, %c0_227], %235 {strides = array<i32>} : memref<9x32xf32, #tpu.memory_space<vmem>>, vector<1x32xf32>,
    %237 = vector.extract_strided_slice %8 {offsets = [37, 0], sizes = [1, 32], strides = [1, 1]} : vector<64x32xf32> to vector<1x32xf32>
    %c5_228 = arith.constant 5 : index
    %c0_229 = arith.constant 0 : index
    %238 = vector.load %arg13[%c5_228, %c0_229] : memref<9x32xf32, #tpu.memory_space<vmem>>, vector<1x32xf32>
    tpu.vector_store %arg13[%c5_228, %c0_229], %237 {strides = array<i32>} : memref<9x32xf32, #tpu.memory_space<vmem>>, vector<1x32xf32>,
    %239 = vector.extract_strided_slice %8 {offsets = [49, 0], sizes = [1, 32], strides = [1, 1]} : vector<64x32xf32> to vector<1x32xf32>
    %c6_230 = arith.constant 6 : index
    %c0_231 = arith.constant 0 : index
    %240 = vector.load %arg13[%c6_230, %c0_231] : memref<9x32xf32, #tpu.memory_space<vmem>>, vector<1x32xf32>
    tpu.vector_store %arg13[%c6_230, %c0_231], %239 {strides = array<i32>} : memref<9x32xf32, #tpu.memory_space<vmem>>, vector<1x32xf32>,
    %241 = vector.extract_strided_slice %8 {offsets = [51, 0], sizes = [1, 32], strides = [1, 1]} : vector<64x32xf32> to vector<1x32xf32>
    %c7_232 = arith.constant 7 : index
    %c0_233 = arith.constant 0 : index
    %242 = vector.load %arg13[%c7_232, %c0_233] : memref<9x32xf32, #tpu.memory_space<vmem>>, vector<1x32xf32>
    tpu.vector_store %arg13[%c7_232, %c0_233], %241 {strides = array<i32>} : memref<9x32xf32, #tpu.memory_space<vmem>>, vector<1x32xf32>,
    %243 = vector.extract_strided_slice %8 {offsets = [53, 0], sizes = [1, 32], strides = [1, 1]} : vector<64x32xf32> to vector<1x32xf32>
    %c8_234 = arith.constant 8 : index
    %c0_235 = arith.constant 0 : index
    %244 = vector.load %arg13[%c8_234, %c0_235] : memref<9x32xf32, #tpu.memory_space<vmem>>, vector<1x32xf32>
    tpu.vector_store %arg13[%c8_234, %c0_235], %243 {strides = array<i32>} : memref<9x32xf32, #tpu.memory_space<vmem>>, vector<1x32xf32>,
    %c0_236 = arith.constant 0 : index
    %c0_237 = arith.constant 0 : index
    %245 = vector.load %arg13[%c0_236, %c0_237] : memref<9x32xf32, #tpu.memory_space<vmem>>, vector<9x32xf32>
    %246 = arith.truncf %245 : vector<9x32xf32> to vector<9x32xbf16>
    %c9 = arith.constant 9 : index
    %c0_238 = arith.constant 0 : index
    %c0_239 = arith.constant 0 : index
    %247 = vector.load %arg4[%c9, %c0_238, %c0_239] : memref<16x32x64xbf16, #tpu.memory_space<vmem>>, vector<1x32x64xbf16>
    %248 = vector.shape_cast %247 : vector<1x32x64xbf16> to vector<32x64xbf16>
    %cst_240 = arith.constant dense<0.000000e+00> : vector<9x64xf32>
    %249 = tpu.matmul %246, %248, %cst_240 {dimension_numbers = #tpu.dot_dimension_numbers<[1], [0], [0], [1], [0, 0, 1, 1], [], []>} : vector<9x32xbf16>, vector<32x64xbf16>, vector<9x64xf32> -> vector<9x64xf32>
    %250 = arith.addf %226, %249 : vector<9x64xf32>
    %251 = vector.extract_strided_slice %8 {offsets = [18, 0], sizes = [1, 32], strides = [1, 1]} : vector<64x32xf32> to vector<1x32xf32>
    %c0_241 = arith.constant 0 : index
    %c0_242 = arith.constant 0 : index
    %252 = vector.load %arg13[%c0_241, %c0_242] : memref<9x32xf32, #tpu.memory_space<vmem>>, vector<1x32xf32>
    tpu.vector_store %arg13[%c0_241, %c0_242], %251 {strides = array<i32>} : memref<9x32xf32, #tpu.memory_space<vmem>>, vector<1x32xf32>,
    %253 = vector.extract_strided_slice %8 {offsets = [20, 0], sizes = [1, 32], strides = [1, 1]} : vector<64x32xf32> to vector<1x32xf32>
    %c1_243 = arith.constant 1 : index
    %c0_244 = arith.constant 0 : index
    %254 = vector.load %arg13[%c1_243, %c0_244] : memref<9x32xf32, #tpu.memory_space<vmem>>, vector<1x32xf32>
    tpu.vector_store %arg13[%c1_243, %c0_244], %253 {strides = array<i32>} : memref<9x32xf32, #tpu.memory_space<vmem>>, vector<1x32xf32>,
    %255 = vector.extract_strided_slice %8 {offsets = [22, 0], sizes = [1, 32], strides = [1, 1]} : vector<64x32xf32> to vector<1x32xf32>
    %c2_245 = arith.constant 2 : index
    %c0_246 = arith.constant 0 : index
    %256 = vector.load %arg13[%c2_245, %c0_246] : memref<9x32xf32, #tpu.memory_space<vmem>>, vector<1x32xf32>
    tpu.vector_store %arg13[%c2_245, %c0_246], %255 {strides = array<i32>} : memref<9x32xf32, #tpu.memory_space<vmem>>, vector<1x32xf32>,
    %257 = vector.extract_strided_slice %8 {offsets = [34, 0], sizes = [1, 32], strides = [1, 1]} : vector<64x32xf32> to vector<1x32xf32>
    %c3_247 = arith.constant 3 : index
    %c0_248 = arith.constant 0 : index
    %258 = vector.load %arg13[%c3_247, %c0_248] : memref<9x32xf32, #tpu.memory_space<vmem>>, vector<1x32xf32>
    tpu.vector_store %arg13[%c3_247, %c0_248], %257 {strides = array<i32>} : memref<9x32xf32, #tpu.memory_space<vmem>>, vector<1x32xf32>,
    %259 = vector.extract_strided_slice %8 {offsets = [36, 0], sizes = [1, 32], strides = [1, 1]} : vector<64x32xf32> to vector<1x32xf32>
    %c4_249 = arith.constant 4 : index
    %c0_250 = arith.constant 0 : index
    %260 = vector.load %arg13[%c4_249, %c0_250] : memref<9x32xf32, #tpu.memory_space<vmem>>, vector<1x32xf32>
    tpu.vector_store %arg13[%c4_249, %c0_250], %259 {strides = array<i32>} : memref<9x32xf32, #tpu.memory_space<vmem>>, vector<1x32xf32>,
    %261 = vector.extract_strided_slice %8 {offsets = [38, 0], sizes = [1, 32], strides = [1, 1]} : vector<64x32xf32> to vector<1x32xf32>
    %c5_251 = arith.constant 5 : index
    %c0_252 = arith.constant 0 : index
    %262 = vector.load %arg13[%c5_251, %c0_252] : memref<9x32xf32, #tpu.memory_space<vmem>>, vector<1x32xf32>
    tpu.vector_store %arg13[%c5_251, %c0_252], %261 {strides = array<i32>} : memref<9x32xf32, #tpu.memory_space<vmem>>, vector<1x32xf32>,
    %263 = vector.extract_strided_slice %8 {offsets = [50, 0], sizes = [1, 32], strides = [1, 1]} : vector<64x32xf32> to vector<1x32xf32>
    %c6_253 = arith.constant 6 : index
    %c0_254 = arith.constant 0 : index
    %264 = vector.load %arg13[%c6_253, %c0_254] : memref<9x32xf32, #tpu.memory_space<vmem>>, vector<1x32xf32>
    tpu.vector_store %arg13[%c6_253, %c0_254], %263 {strides = array<i32>} : memref<9x32xf32, #tpu.memory_space<vmem>>, vector<1x32xf32>,
    %265 = vector.extract_strided_slice %8 {offsets = [52, 0], sizes = [1, 32], strides = [1, 1]} : vector<64x32xf32> to vector<1x32xf32>
    %c7_255 = arith.constant 7 : index
    %c0_256 = arith.constant 0 : index
    %266 = vector.load %arg13[%c7_255, %c0_256] : memref<9x32xf32, #tpu.memory_space<vmem>>, vector<1x32xf32>
    tpu.vector_store %arg13[%c7_255, %c0_256], %265 {strides = array<i32>} : memref<9x32xf32, #tpu.memory_space<vmem>>, vector<1x32xf32>,
    %267 = vector.extract_strided_slice %8 {offsets = [54, 0], sizes = [1, 32], strides = [1, 1]} : vector<64x32xf32> to vector<1x32xf32>
    %c8_257 = arith.constant 8 : index
    %c0_258 = arith.constant 0 : index
    %268 = vector.load %arg13[%c8_257, %c0_258] : memref<9x32xf32, #tpu.memory_space<vmem>>, vector<1x32xf32>
    tpu.vector_store %arg13[%c8_257, %c0_258], %267 {strides = array<i32>} : memref<9x32xf32, #tpu.memory_space<vmem>>, vector<1x32xf32>,
    %c0_259 = arith.constant 0 : index
    %c0_260 = arith.constant 0 : index
    %269 = vector.load %arg13[%c0_259, %c0_260] : memref<9x32xf32, #tpu.memory_space<vmem>>, vector<9x32xf32>
    %270 = arith.truncf %269 : vector<9x32xf32> to vector<9x32xbf16>
    %c10 = arith.constant 10 : index
    %c0_261 = arith.constant 0 : index
    %c0_262 = arith.constant 0 : index
    %271 = vector.load %arg4[%c10, %c0_261, %c0_262] : memref<16x32x64xbf16, #tpu.memory_space<vmem>>, vector<1x32x64xbf16>
    %272 = vector.shape_cast %271 : vector<1x32x64xbf16> to vector<32x64xbf16>
    %cst_263 = arith.constant dense<0.000000e+00> : vector<9x64xf32>
    %273 = tpu.matmul %270, %272, %cst_263 {dimension_numbers = #tpu.dot_dimension_numbers<[1], [0], [0], [1], [0, 0, 1, 1], [], []>} : vector<9x32xbf16>, vector<32x64xbf16>, vector<9x64xf32> -> vector<9x64xf32>
    %274 = arith.addf %250, %273 : vector<9x64xf32>
    %275 = vector.extract_strided_slice %8 {offsets = [19, 0], sizes = [1, 32], strides = [1, 1]} : vector<64x32xf32> to vector<1x32xf32>
    %c0_264 = arith.constant 0 : index
    %c0_265 = arith.constant 0 : index
    %276 = vector.load %arg13[%c0_264, %c0_265] : memref<9x32xf32, #tpu.memory_space<vmem>>, vector<1x32xf32>
    tpu.vector_store %arg13[%c0_264, %c0_265], %275 {strides = array<i32>} : memref<9x32xf32, #tpu.memory_space<vmem>>, vector<1x32xf32>,
    %277 = vector.extract_strided_slice %8 {offsets = [21, 0], sizes = [1, 32], strides = [1, 1]} : vector<64x32xf32> to vector<1x32xf32>
    %c1_266 = arith.constant 1 : index
    %c0_267 = arith.constant 0 : index
    %278 = vector.load %arg13[%c1_266, %c0_267] : memref<9x32xf32, #tpu.memory_space<vmem>>, vector<1x32xf32>
    tpu.vector_store %arg13[%c1_266, %c0_267], %277 {strides = array<i32>} : memref<9x32xf32, #tpu.memory_space<vmem>>, vector<1x32xf32>,
    %279 = vector.extract_strided_slice %8 {offsets = [23, 0], sizes = [1, 32], strides = [1, 1]} : vector<64x32xf32> to vector<1x32xf32>
    %c2_268 = arith.constant 2 : index
    %c0_269 = arith.constant 0 : index
    %280 = vector.load %arg13[%c2_268, %c0_269] : memref<9x32xf32, #tpu.memory_space<vmem>>, vector<1x32xf32>
    tpu.vector_store %arg13[%c2_268, %c0_269], %279 {strides = array<i32>} : memref<9x32xf32, #tpu.memory_space<vmem>>, vector<1x32xf32>,
    %281 = vector.extract_strided_slice %8 {offsets = [35, 0], sizes = [1, 32], strides = [1, 1]} : vector<64x32xf32> to vector<1x32xf32>
    %c3_270 = arith.constant 3 : index
    %c0_271 = arith.constant 0 : index
    %282 = vector.load %arg13[%c3_270, %c0_271] : memref<9x32xf32, #tpu.memory_space<vmem>>, vector<1x32xf32>
    tpu.vector_store %arg13[%c3_270, %c0_271], %281 {strides = array<i32>} : memref<9x32xf32, #tpu.memory_space<vmem>>, vector<1x32xf32>,
    %283 = vector.extract_strided_slice %8 {offsets = [37, 0], sizes = [1, 32], strides = [1, 1]} : vector<64x32xf32> to vector<1x32xf32>
    %c4_272 = arith.constant 4 : index
    %c0_273 = arith.constant 0 : index
    %284 = vector.load %arg13[%c4_272, %c0_273] : memref<9x32xf32, #tpu.memory_space<vmem>>, vector<1x32xf32>
    tpu.vector_store %arg13[%c4_272, %c0_273], %283 {strides = array<i32>} : memref<9x32xf32, #tpu.memory_space<vmem>>, vector<1x32xf32>,
    %285 = vector.extract_strided_slice %8 {offsets = [39, 0], sizes = [1, 32], strides = [1, 1]} : vector<64x32xf32> to vector<1x32xf32>
    %c5_274 = arith.constant 5 : index
    %c0_275 = arith.constant 0 : index
    %286 = vector.load %arg13[%c5_274, %c0_275] : memref<9x32xf32, #tpu.memory_space<vmem>>, vector<1x32xf32>
    tpu.vector_store %arg13[%c5_274, %c0_275], %285 {strides = array<i32>} : memref<9x32xf32, #tpu.memory_space<vmem>>, vector<1x32xf32>,
    %287 = vector.extract_strided_slice %8 {offsets = [51, 0], sizes = [1, 32], strides = [1, 1]} : vector<64x32xf32> to vector<1x32xf32>
    %c6_276 = arith.constant 6 : index
    %c0_277 = arith.constant 0 : index
    %288 = vector.load %arg13[%c6_276, %c0_277] : memref<9x32xf32, #tpu.memory_space<vmem>>, vector<1x32xf32>
    tpu.vector_store %arg13[%c6_276, %c0_277], %287 {strides = array<i32>} : memref<9x32xf32, #tpu.memory_space<vmem>>, vector<1x32xf32>,
    %289 = vector.extract_strided_slice %8 {offsets = [53, 0], sizes = [1, 32], strides = [1, 1]} : vector<64x32xf32> to vector<1x32xf32>
    %c7_278 = arith.constant 7 : index
    %c0_279 = arith.constant 0 : index
    %290 = vector.load %arg13[%c7_278, %c0_279] : memref<9x32xf32, #tpu.memory_space<vmem>>, vector<1x32xf32>
    tpu.vector_store %arg13[%c7_278, %c0_279], %289 {strides = array<i32>} : memref<9x32xf32, #tpu.memory_space<vmem>>, vector<1x32xf32>,
    %291 = vector.extract_strided_slice %8 {offsets = [55, 0], sizes = [1, 32], strides = [1, 1]} : vector<64x32xf32> to vector<1x32xf32>
    %c8_280 = arith.constant 8 : index
    %c0_281 = arith.constant 0 : index
    %292 = vector.load %arg13[%c8_280, %c0_281] : memref<9x32xf32, #tpu.memory_space<vmem>>, vector<1x32xf32>
    tpu.vector_store %arg13[%c8_280, %c0_281], %291 {strides = array<i32>} : memref<9x32xf32, #tpu.memory_space<vmem>>, vector<1x32xf32>,
    %c0_282 = arith.constant 0 : index
    %c0_283 = arith.constant 0 : index
    %293 = vector.load %arg13[%c0_282, %c0_283] : memref<9x32xf32, #tpu.memory_space<vmem>>, vector<9x32xf32>
    %294 = arith.truncf %293 : vector<9x32xf32> to vector<9x32xbf16>
    %c11 = arith.constant 11 : index
    %c0_284 = arith.constant 0 : index
    %c0_285 = arith.constant 0 : index
    %295 = vector.load %arg4[%c11, %c0_284, %c0_285] : memref<16x32x64xbf16, #tpu.memory_space<vmem>>, vector<1x32x64xbf16>
    %296 = vector.shape_cast %295 : vector<1x32x64xbf16> to vector<32x64xbf16>
    %cst_286 = arith.constant dense<0.000000e+00> : vector<9x64xf32>
    %297 = tpu.matmul %294, %296, %cst_286 {dimension_numbers = #tpu.dot_dimension_numbers<[1], [0], [0], [1], [0, 0, 1, 1], [], []>} : vector<9x32xbf16>, vector<32x64xbf16>, vector<9x64xf32> -> vector<9x64xf32>
    %298 = arith.addf %274, %297 : vector<9x64xf32>
    %299 = vector.extract_strided_slice %8 {offsets = [24, 0], sizes = [1, 32], strides = [1, 1]} : vector<64x32xf32> to vector<1x32xf32>
    %c0_287 = arith.constant 0 : index
    %c0_288 = arith.constant 0 : index
    %300 = vector.load %arg13[%c0_287, %c0_288] : memref<9x32xf32, #tpu.memory_space<vmem>>, vector<1x32xf32>
    tpu.vector_store %arg13[%c0_287, %c0_288], %299 {strides = array<i32>} : memref<9x32xf32, #tpu.memory_space<vmem>>, vector<1x32xf32>,
    %301 = vector.extract_strided_slice %8 {offsets = [26, 0], sizes = [1, 32], strides = [1, 1]} : vector<64x32xf32> to vector<1x32xf32>
    %c1_289 = arith.constant 1 : index
    %c0_290 = arith.constant 0 : index
    %302 = vector.load %arg13[%c1_289, %c0_290] : memref<9x32xf32, #tpu.memory_space<vmem>>, vector<1x32xf32>
    tpu.vector_store %arg13[%c1_289, %c0_290], %301 {strides = array<i32>} : memref<9x32xf32, #tpu.memory_space<vmem>>, vector<1x32xf32>,
    %303 = vector.extract_strided_slice %8 {offsets = [28, 0], sizes = [1, 32], strides = [1, 1]} : vector<64x32xf32> to vector<1x32xf32>
    %c2_291 = arith.constant 2 : index
    %c0_292 = arith.constant 0 : index
    %304 = vector.load %arg13[%c2_291, %c0_292] : memref<9x32xf32, #tpu.memory_space<vmem>>, vector<1x32xf32>
    tpu.vector_store %arg13[%c2_291, %c0_292], %303 {strides = array<i32>} : memref<9x32xf32, #tpu.memory_space<vmem>>, vector<1x32xf32>,
    %305 = vector.extract_strided_slice %8 {offsets = [40, 0], sizes = [1, 32], strides = [1, 1]} : vector<64x32xf32> to vector<1x32xf32>
    %c3_293 = arith.constant 3 : index
    %c0_294 = arith.constant 0 : index
    %306 = vector.load %arg13[%c3_293, %c0_294] : memref<9x32xf32, #tpu.memory_space<vmem>>, vector<1x32xf32>
    tpu.vector_store %arg13[%c3_293, %c0_294], %305 {strides = array<i32>} : memref<9x32xf32, #tpu.memory_space<vmem>>, vector<1x32xf32>,
    %307 = vector.extract_strided_slice %8 {offsets = [42, 0], sizes = [1, 32], strides = [1, 1]} : vector<64x32xf32> to vector<1x32xf32>
    %c4_295 = arith.constant 4 : index
    %c0_296 = arith.constant 0 : index
    %308 = vector.load %arg13[%c4_295, %c0_296] : memref<9x32xf32, #tpu.memory_space<vmem>>, vector<1x32xf32>
    tpu.vector_store %arg13[%c4_295, %c0_296], %307 {strides = array<i32>} : memref<9x32xf32, #tpu.memory_space<vmem>>, vector<1x32xf32>,
    %309 = vector.extract_strided_slice %8 {offsets = [44, 0], sizes = [1, 32], strides = [1, 1]} : vector<64x32xf32> to vector<1x32xf32>
    %c5_297 = arith.constant 5 : index
    %c0_298 = arith.constant 0 : index
    %310 = vector.load %arg13[%c5_297, %c0_298] : memref<9x32xf32, #tpu.memory_space<vmem>>, vector<1x32xf32>
    tpu.vector_store %arg13[%c5_297, %c0_298], %309 {strides = array<i32>} : memref<9x32xf32, #tpu.memory_space<vmem>>, vector<1x32xf32>,
    %311 = vector.extract_strided_slice %8 {offsets = [56, 0], sizes = [1, 32], strides = [1, 1]} : vector<64x32xf32> to vector<1x32xf32>
    %c6_299 = arith.constant 6 : index
    %c0_300 = arith.constant 0 : index
    %312 = vector.load %arg13[%c6_299, %c0_300] : memref<9x32xf32, #tpu.memory_space<vmem>>, vector<1x32xf32>
    tpu.vector_store %arg13[%c6_299, %c0_300], %311 {strides = array<i32>} : memref<9x32xf32, #tpu.memory_space<vmem>>, vector<1x32xf32>,
    %313 = vector.extract_strided_slice %8 {offsets = [58, 0], sizes = [1, 32], strides = [1, 1]} : vector<64x32xf32> to vector<1x32xf32>
    %c7_301 = arith.constant 7 : index
    %c0_302 = arith.constant 0 : index
    %314 = vector.load %arg13[%c7_301, %c0_302] : memref<9x32xf32, #tpu.memory_space<vmem>>, vector<1x32xf32>
    tpu.vector_store %arg13[%c7_301, %c0_302], %313 {strides = array<i32>} : memref<9x32xf32, #tpu.memory_space<vmem>>, vector<1x32xf32>,
    %315 = vector.extract_strided_slice %8 {offsets = [60, 0], sizes = [1, 32], strides = [1, 1]} : vector<64x32xf32> to vector<1x32xf32>
    %c8_303 = arith.constant 8 : index
    %c0_304 = arith.constant 0 : index
    %316 = vector.load %arg13[%c8_303, %c0_304] : memref<9x32xf32, #tpu.memory_space<vmem>>, vector<1x32xf32>
    tpu.vector_store %arg13[%c8_303, %c0_304], %315 {strides = array<i32>} : memref<9x32xf32, #tpu.memory_space<vmem>>, vector<1x32xf32>,
    %c0_305 = arith.constant 0 : index
    %c0_306 = arith.constant 0 : index
    %317 = vector.load %arg13[%c0_305, %c0_306] : memref<9x32xf32, #tpu.memory_space<vmem>>, vector<9x32xf32>
    %318 = arith.truncf %317 : vector<9x32xf32> to vector<9x32xbf16>
    %c12 = arith.constant 12 : index
    %c0_307 = arith.constant 0 : index
    %c0_308 = arith.constant 0 : index
    %319 = vector.load %arg4[%c12, %c0_307, %c0_308] : memref<16x32x64xbf16, #tpu.memory_space<vmem>>, vector<1x32x64xbf16>
    %320 = vector.shape_cast %319 : vector<1x32x64xbf16> to vector<32x64xbf16>
    %cst_309 = arith.constant dense<0.000000e+00> : vector<9x64xf32>
    %321 = tpu.matmul %318, %320, %cst_309 {dimension_numbers = #tpu.dot_dimension_numbers<[1], [0], [0], [1], [0, 0, 1, 1], [], []>} : vector<9x32xbf16>, vector<32x64xbf16>, vector<9x64xf32> -> vector<9x64xf32>
    %322 = arith.addf %298, %321 : vector<9x64xf32>
    %323 = vector.extract_strided_slice %8 {offsets = [25, 0], sizes = [1, 32], strides = [1, 1]} : vector<64x32xf32> to vector<1x32xf32>
    %c0_310 = arith.constant 0 : index
    %c0_311 = arith.constant 0 : index
    %324 = vector.load %arg13[%c0_310, %c0_311] : memref<9x32xf32, #tpu.memory_space<vmem>>, vector<1x32xf32>
    tpu.vector_store %arg13[%c0_310, %c0_311], %323 {strides = array<i32>} : memref<9x32xf32, #tpu.memory_space<vmem>>, vector<1x32xf32>,
    %325 = vector.extract_strided_slice %8 {offsets = [27, 0], sizes = [1, 32], strides = [1, 1]} : vector<64x32xf32> to vector<1x32xf32>
    %c1_312 = arith.constant 1 : index
    %c0_313 = arith.constant 0 : index
    %326 = vector.load %arg13[%c1_312, %c0_313] : memref<9x32xf32, #tpu.memory_space<vmem>>, vector<1x32xf32>
    tpu.vector_store %arg13[%c1_312, %c0_313], %325 {strides = array<i32>} : memref<9x32xf32, #tpu.memory_space<vmem>>, vector<1x32xf32>,
    %327 = vector.extract_strided_slice %8 {offsets = [29, 0], sizes = [1, 32], strides = [1, 1]} : vector<64x32xf32> to vector<1x32xf32>
    %c2_314 = arith.constant 2 : index
    %c0_315 = arith.constant 0 : index
    %328 = vector.load %arg13[%c2_314, %c0_315] : memref<9x32xf32, #tpu.memory_space<vmem>>, vector<1x32xf32>
    tpu.vector_store %arg13[%c2_314, %c0_315], %327 {strides = array<i32>} : memref<9x32xf32, #tpu.memory_space<vmem>>, vector<1x32xf32>,
    %329 = vector.extract_strided_slice %8 {offsets = [41, 0], sizes = [1, 32], strides = [1, 1]} : vector<64x32xf32> to vector<1x32xf32>
    %c3_316 = arith.constant 3 : index
    %c0_317 = arith.constant 0 : index
    %330 = vector.load %arg13[%c3_316, %c0_317] : memref<9x32xf32, #tpu.memory_space<vmem>>, vector<1x32xf32>
    tpu.vector_store %arg13[%c3_316, %c0_317], %329 {strides = array<i32>} : memref<9x32xf32, #tpu.memory_space<vmem>>, vector<1x32xf32>,
    %331 = vector.extract_strided_slice %8 {offsets = [43, 0], sizes = [1, 32], strides = [1, 1]} : vector<64x32xf32> to vector<1x32xf32>
    %c4_318 = arith.constant 4 : index
    %c0_319 = arith.constant 0 : index
    %332 = vector.load %arg13[%c4_318, %c0_319] : memref<9x32xf32, #tpu.memory_space<vmem>>, vector<1x32xf32>
    tpu.vector_store %arg13[%c4_318, %c0_319], %331 {strides = array<i32>} : memref<9x32xf32, #tpu.memory_space<vmem>>, vector<1x32xf32>,
    %333 = vector.extract_strided_slice %8 {offsets = [45, 0], sizes = [1, 32], strides = [1, 1]} : vector<64x32xf32> to vector<1x32xf32>
    %c5_320 = arith.constant 5 : index
    %c0_321 = arith.constant 0 : index
    %334 = vector.load %arg13[%c5_320, %c0_321] : memref<9x32xf32, #tpu.memory_space<vmem>>, vector<1x32xf32>
    tpu.vector_store %arg13[%c5_320, %c0_321], %333 {strides = array<i32>} : memref<9x32xf32, #tpu.memory_space<vmem>>, vector<1x32xf32>,
    %335 = vector.extract_strided_slice %8 {offsets = [57, 0], sizes = [1, 32], strides = [1, 1]} : vector<64x32xf32> to vector<1x32xf32>
    %c6_322 = arith.constant 6 : index
    %c0_323 = arith.constant 0 : index
    %336 = vector.load %arg13[%c6_322, %c0_323] : memref<9x32xf32, #tpu.memory_space<vmem>>, vector<1x32xf32>
    tpu.vector_store %arg13[%c6_322, %c0_323], %335 {strides = array<i32>} : memref<9x32xf32, #tpu.memory_space<vmem>>, vector<1x32xf32>,
    %337 = vector.extract_strided_slice %8 {offsets = [59, 0], sizes = [1, 32], strides = [1, 1]} : vector<64x32xf32> to vector<1x32xf32>
    %c7_324 = arith.constant 7 : index
    %c0_325 = arith.constant 0 : index
    %338 = vector.load %arg13[%c7_324, %c0_325] : memref<9x32xf32, #tpu.memory_space<vmem>>, vector<1x32xf32>
    tpu.vector_store %arg13[%c7_324, %c0_325], %337 {strides = array<i32>} : memref<9x32xf32, #tpu.memory_space<vmem>>, vector<1x32xf32>,
    %339 = vector.extract_strided_slice %8 {offsets = [61, 0], sizes = [1, 32], strides = [1, 1]} : vector<64x32xf32> to vector<1x32xf32>
    %c8_326 = arith.constant 8 : index
    %c0_327 = arith.constant 0 : index
    %340 = vector.load %arg13[%c8_326, %c0_327] : memref<9x32xf32, #tpu.memory_space<vmem>>, vector<1x32xf32>
    tpu.vector_store %arg13[%c8_326, %c0_327], %339 {strides = array<i32>} : memref<9x32xf32, #tpu.memory_space<vmem>>, vector<1x32xf32>,
    %c0_328 = arith.constant 0 : index
    %c0_329 = arith.constant 0 : index
    %341 = vector.load %arg13[%c0_328, %c0_329] : memref<9x32xf32, #tpu.memory_space<vmem>>, vector<9x32xf32>
    %342 = arith.truncf %341 : vector<9x32xf32> to vector<9x32xbf16>
    %c13 = arith.constant 13 : index
    %c0_330 = arith.constant 0 : index
    %c0_331 = arith.constant 0 : index
    %343 = vector.load %arg4[%c13, %c0_330, %c0_331] : memref<16x32x64xbf16, #tpu.memory_space<vmem>>, vector<1x32x64xbf16>
    %344 = vector.shape_cast %343 : vector<1x32x64xbf16> to vector<32x64xbf16>
    %cst_332 = arith.constant dense<0.000000e+00> : vector<9x64xf32>
    %345 = tpu.matmul %342, %344, %cst_332 {dimension_numbers = #tpu.dot_dimension_numbers<[1], [0], [0], [1], [0, 0, 1, 1], [], []>} : vector<9x32xbf16>, vector<32x64xbf16>, vector<9x64xf32> -> vector<9x64xf32>
    %346 = arith.addf %322, %345 : vector<9x64xf32>
    %347 = vector.extract_strided_slice %8 {offsets = [26, 0], sizes = [1, 32], strides = [1, 1]} : vector<64x32xf32> to vector<1x32xf32>
    %c0_333 = arith.constant 0 : index
    %c0_334 = arith.constant 0 : index
    %348 = vector.load %arg13[%c0_333, %c0_334] : memref<9x32xf32, #tpu.memory_space<vmem>>, vector<1x32xf32>
    tpu.vector_store %arg13[%c0_333, %c0_334], %347 {strides = array<i32>} : memref<9x32xf32, #tpu.memory_space<vmem>>, vector<1x32xf32>,
    %349 = vector.extract_strided_slice %8 {offsets = [28, 0], sizes = [1, 32], strides = [1, 1]} : vector<64x32xf32> to vector<1x32xf32>
    %c1_335 = arith.constant 1 : index
    %c0_336 = arith.constant 0 : index
    %350 = vector.load %arg13[%c1_335, %c0_336] : memref<9x32xf32, #tpu.memory_space<vmem>>, vector<1x32xf32>
    tpu.vector_store %arg13[%c1_335, %c0_336], %349 {strides = array<i32>} : memref<9x32xf32, #tpu.memory_space<vmem>>, vector<1x32xf32>,
    %351 = vector.extract_strided_slice %8 {offsets = [30, 0], sizes = [1, 32], strides = [1, 1]} : vector<64x32xf32> to vector<1x32xf32>
    %c2_337 = arith.constant 2 : index
    %c0_338 = arith.constant 0 : index
    %352 = vector.load %arg13[%c2_337, %c0_338] : memref<9x32xf32, #tpu.memory_space<vmem>>, vector<1x32xf32>
    tpu.vector_store %arg13[%c2_337, %c0_338], %351 {strides = array<i32>} : memref<9x32xf32, #tpu.memory_space<vmem>>, vector<1x32xf32>,
    %353 = vector.extract_strided_slice %8 {offsets = [42, 0], sizes = [1, 32], strides = [1, 1]} : vector<64x32xf32> to vector<1x32xf32>
    %c3_339 = arith.constant 3 : index
    %c0_340 = arith.constant 0 : index
    %354 = vector.load %arg13[%c3_339, %c0_340] : memref<9x32xf32, #tpu.memory_space<vmem>>, vector<1x32xf32>
    tpu.vector_store %arg13[%c3_339, %c0_340], %353 {strides = array<i32>} : memref<9x32xf32, #tpu.memory_space<vmem>>, vector<1x32xf32>,
    %355 = vector.extract_strided_slice %8 {offsets = [44, 0], sizes = [1, 32], strides = [1, 1]} : vector<64x32xf32> to vector<1x32xf32>
    %c4_341 = arith.constant 4 : index
    %c0_342 = arith.constant 0 : index
    %356 = vector.load %arg13[%c4_341, %c0_342] : memref<9x32xf32, #tpu.memory_space<vmem>>, vector<1x32xf32>
    tpu.vector_store %arg13[%c4_341, %c0_342], %355 {strides = array<i32>} : memref<9x32xf32, #tpu.memory_space<vmem>>, vector<1x32xf32>,
    %357 = vector.extract_strided_slice %8 {offsets = [46, 0], sizes = [1, 32], strides = [1, 1]} : vector<64x32xf32> to vector<1x32xf32>
    %c5_343 = arith.constant 5 : index
    %c0_344 = arith.constant 0 : index
    %358 = vector.load %arg13[%c5_343, %c0_344] : memref<9x32xf32, #tpu.memory_space<vmem>>, vector<1x32xf32>
    tpu.vector_store %arg13[%c5_343, %c0_344], %357 {strides = array<i32>} : memref<9x32xf32, #tpu.memory_space<vmem>>, vector<1x32xf32>,
    %359 = vector.extract_strided_slice %8 {offsets = [58, 0], sizes = [1, 32], strides = [1, 1]} : vector<64x32xf32> to vector<1x32xf32>
    %c6_345 = arith.constant 6 : index
    %c0_346 = arith.constant 0 : index
    %360 = vector.load %arg13[%c6_345, %c0_346] : memref<9x32xf32, #tpu.memory_space<vmem>>, vector<1x32xf32>
    tpu.vector_store %arg13[%c6_345, %c0_346], %359 {strides = array<i32>} : memref<9x32xf32, #tpu.memory_space<vmem>>, vector<1x32xf32>,
    %361 = vector.extract_strided_slice %8 {offsets = [60, 0], sizes = [1, 32], strides = [1, 1]} : vector<64x32xf32> to vector<1x32xf32>
    %c7_347 = arith.constant 7 : index
    %c0_348 = arith.constant 0 : index
    %362 = vector.load %arg13[%c7_347, %c0_348] : memref<9x32xf32, #tpu.memory_space<vmem>>, vector<1x32xf32>
    tpu.vector_store %arg13[%c7_347, %c0_348], %361 {strides = array<i32>} : memref<9x32xf32, #tpu.memory_space<vmem>>, vector<1x32xf32>,
    %363 = vector.extract_strided_slice %8 {offsets = [62, 0], sizes = [1, 32], strides = [1, 1]} : vector<64x32xf32> to vector<1x32xf32>
    %c8_349 = arith.constant 8 : index
    %c0_350 = arith.constant 0 : index
    %364 = vector.load %arg13[%c8_349, %c0_350] : memref<9x32xf32, #tpu.memory_space<vmem>>, vector<1x32xf32>
    tpu.vector_store %arg13[%c8_349, %c0_350], %363 {strides = array<i32>} : memref<9x32xf32, #tpu.memory_space<vmem>>, vector<1x32xf32>,
    %c0_351 = arith.constant 0 : index
    %c0_352 = arith.constant 0 : index
    %365 = vector.load %arg13[%c0_351, %c0_352] : memref<9x32xf32, #tpu.memory_space<vmem>>, vector<9x32xf32>
    %366 = arith.truncf %365 : vector<9x32xf32> to vector<9x32xbf16>
    %c14 = arith.constant 14 : index
    %c0_353 = arith.constant 0 : index
    %c0_354 = arith.constant 0 : index
    %367 = vector.load %arg4[%c14, %c0_353, %c0_354] : memref<16x32x64xbf16, #tpu.memory_space<vmem>>, vector<1x32x64xbf16>
    %368 = vector.shape_cast %367 : vector<1x32x64xbf16> to vector<32x64xbf16>
    %cst_355 = arith.constant dense<0.000000e+00> : vector<9x64xf32>
    %369 = tpu.matmul %366, %368, %cst_355 {dimension_numbers = #tpu.dot_dimension_numbers<[1], [0], [0], [1], [0, 0, 1, 1], [], []>} : vector<9x32xbf16>, vector<32x64xbf16>, vector<9x64xf32> -> vector<9x64xf32>
    %370 = arith.addf %346, %369 : vector<9x64xf32>
    %371 = vector.extract_strided_slice %8 {offsets = [27, 0], sizes = [1, 32], strides = [1, 1]} : vector<64x32xf32> to vector<1x32xf32>
    %c0_356 = arith.constant 0 : index
    %c0_357 = arith.constant 0 : index
    %372 = vector.load %arg13[%c0_356, %c0_357] : memref<9x32xf32, #tpu.memory_space<vmem>>, vector<1x32xf32>
    tpu.vector_store %arg13[%c0_356, %c0_357], %371 {strides = array<i32>} : memref<9x32xf32, #tpu.memory_space<vmem>>, vector<1x32xf32>,
    %373 = vector.extract_strided_slice %8 {offsets = [29, 0], sizes = [1, 32], strides = [1, 1]} : vector<64x32xf32> to vector<1x32xf32>
    %c1_358 = arith.constant 1 : index
    %c0_359 = arith.constant 0 : index
    %374 = vector.load %arg13[%c1_358, %c0_359] : memref<9x32xf32, #tpu.memory_space<vmem>>, vector<1x32xf32>
    tpu.vector_store %arg13[%c1_358, %c0_359], %373 {strides = array<i32>} : memref<9x32xf32, #tpu.memory_space<vmem>>, vector<1x32xf32>,
    %375 = vector.extract_strided_slice %8 {offsets = [31, 0], sizes = [1, 32], strides = [1, 1]} : vector<64x32xf32> to vector<1x32xf32>
    %c2_360 = arith.constant 2 : index
    %c0_361 = arith.constant 0 : index
    %376 = vector.load %arg13[%c2_360, %c0_361] : memref<9x32xf32, #tpu.memory_space<vmem>>, vector<1x32xf32>
    tpu.vector_store %arg13[%c2_360, %c0_361], %375 {strides = array<i32>} : memref<9x32xf32, #tpu.memory_space<vmem>>, vector<1x32xf32>,
    %377 = vector.extract_strided_slice %8 {offsets = [43, 0], sizes = [1, 32], strides = [1, 1]} : vector<64x32xf32> to vector<1x32xf32>
    %c3_362 = arith.constant 3 : index
    %c0_363 = arith.constant 0 : index
    %378 = vector.load %arg13[%c3_362, %c0_363] : memref<9x32xf32, #tpu.memory_space<vmem>>, vector<1x32xf32>
    tpu.vector_store %arg13[%c3_362, %c0_363], %377 {strides = array<i32>} : memref<9x32xf32, #tpu.memory_space<vmem>>, vector<1x32xf32>,
    %379 = vector.extract_strided_slice %8 {offsets = [45, 0], sizes = [1, 32], strides = [1, 1]} : vector<64x32xf32> to vector<1x32xf32>
    %c4_364 = arith.constant 4 : index
    %c0_365 = arith.constant 0 : index
    %380 = vector.load %arg13[%c4_364, %c0_365] : memref<9x32xf32, #tpu.memory_space<vmem>>, vector<1x32xf32>
    tpu.vector_store %arg13[%c4_364, %c0_365], %379 {strides = array<i32>} : memref<9x32xf32, #tpu.memory_space<vmem>>, vector<1x32xf32>,
    %381 = vector.extract_strided_slice %8 {offsets = [47, 0], sizes = [1, 32], strides = [1, 1]} : vector<64x32xf32> to vector<1x32xf32>
    %c5_366 = arith.constant 5 : index
    %c0_367 = arith.constant 0 : index
    %382 = vector.load %arg13[%c5_366, %c0_367] : memref<9x32xf32, #tpu.memory_space<vmem>>, vector<1x32xf32>
    tpu.vector_store %arg13[%c5_366, %c0_367], %381 {strides = array<i32>} : memref<9x32xf32, #tpu.memory_space<vmem>>, vector<1x32xf32>,
    %383 = vector.extract_strided_slice %8 {offsets = [59, 0], sizes = [1, 32], strides = [1, 1]} : vector<64x32xf32> to vector<1x32xf32>
    %c6_368 = arith.constant 6 : index
    %c0_369 = arith.constant 0 : index
    %384 = vector.load %arg13[%c6_368, %c0_369] : memref<9x32xf32, #tpu.memory_space<vmem>>, vector<1x32xf32>
    tpu.vector_store %arg13[%c6_368, %c0_369], %383 {strides = array<i32>} : memref<9x32xf32, #tpu.memory_space<vmem>>, vector<1x32xf32>,
    %385 = vector.extract_strided_slice %8 {offsets = [61, 0], sizes = [1, 32], strides = [1, 1]} : vector<64x32xf32> to vector<1x32xf32>
    %c7_370 = arith.constant 7 : index
    %c0_371 = arith.constant 0 : index
    %386 = vector.load %arg13[%c7_370, %c0_371] : memref<9x32xf32, #tpu.memory_space<vmem>>, vector<1x32xf32>
    tpu.vector_store %arg13[%c7_370, %c0_371], %385 {strides = array<i32>} : memref<9x32xf32, #tpu.memory_space<vmem>>, vector<1x32xf32>,
    %387 = vector.extract_strided_slice %8 {offsets = [63, 0], sizes = [1, 32], strides = [1, 1]} : vector<64x32xf32> to vector<1x32xf32>
    %c8_372 = arith.constant 8 : index
    %c0_373 = arith.constant 0 : index
    %388 = vector.load %arg13[%c8_372, %c0_373] : memref<9x32xf32, #tpu.memory_space<vmem>>, vector<1x32xf32>
    tpu.vector_store %arg13[%c8_372, %c0_373], %387 {strides = array<i32>} : memref<9x32xf32, #tpu.memory_space<vmem>>, vector<1x32xf32>,
    %c0_374 = arith.constant 0 : index
    %c0_375 = arith.constant 0 : index
    %389 = vector.load %arg13[%c0_374, %c0_375] : memref<9x32xf32, #tpu.memory_space<vmem>>, vector<9x32xf32>
    %390 = arith.truncf %389 : vector<9x32xf32> to vector<9x32xbf16>
    %c15 = arith.constant 15 : index
    %c0_376 = arith.constant 0 : index
    %c0_377 = arith.constant 0 : index
    %391 = vector.load %arg4[%c15, %c0_376, %c0_377] : memref<16x32x64xbf16, #tpu.memory_space<vmem>>, vector<1x32x64xbf16>
    %392 = vector.shape_cast %391 : vector<1x32x64xbf16> to vector<32x64xbf16>
    %cst_378 = arith.constant dense<0.000000e+00> : vector<9x64xf32>
    %393 = tpu.matmul %390, %392, %cst_378 {dimension_numbers = #tpu.dot_dimension_numbers<[1], [0], [0], [1], [0, 0, 1, 1], [], []>} : vector<9x32xbf16>, vector<32x64xbf16>, vector<9x64xf32> -> vector<9x64xf32>
    %394 = arith.addf %370, %393 : vector<9x64xf32>
    %395 = vector.broadcast %9 : vector<1x64xf32> to vector<9x64xf32>
    %396 = arith.addf %394, %395 : vector<9x64xf32>
    %cst_379 = arith.constant 0.000000e+00 : f32
    %397 = vector.broadcast %cst_379 : f32 to vector<9x64xf32>
    %398 = arith.maximumf %396, %397 : vector<9x64xf32>
    %c0_380 = arith.constant 0 : index
    %c0_381 = arith.constant 0 : index
    %399 = vector.load %arg7[%c0_380, %c0_381] : memref<1x64xf32, #tpu.memory_space<vmem>>, vector<1x64xf32>
    %cst_382 = arith.constant 0.000000e+00 : f32
    %400 = vector.broadcast %cst_382 : f32 to vector<1x64xf32>
    %401 = vector.extract_strided_slice %398 {offsets = [0, 0], sizes = [1, 64], strides = [1, 1]} : vector<9x64xf32> to vector<1x64xf32>
    %402 = arith.truncf %401 : vector<1x64xf32> to vector<1x64xbf16>
    %c0_383 = arith.constant 0 : index
    %c0_384 = arith.constant 0 : index
    %c0_385 = arith.constant 0 : index
    %403 = vector.load %arg6[%c0_383, %c0_384, %c0_385] : memref<9x64x64xbf16, #tpu.memory_space<vmem>>, vector<1x64x64xbf16>
    %404 = vector.shape_cast %403 : vector<1x64x64xbf16> to vector<64x64xbf16>
    %cst_386 = arith.constant dense<0.000000e+00> : vector<1x64xf32>
    %405 = tpu.matmul %402, %404, %cst_386 {dimension_numbers = #tpu.dot_dimension_numbers<[1], [0], [0], [1], [0, 0, 1, 1], [], []>} : vector<1x64xbf16>, vector<64x64xbf16>, vector<1x64xf32> -> vector<1x64xf32>
    %406 = arith.addf %400, %405 : vector<1x64xf32>
    %407 = vector.extract_strided_slice %398 {offsets = [1, 0], sizes = [1, 64], strides = [1, 1]} : vector<9x64xf32> to vector<1x64xf32>
    %408 = arith.truncf %407 : vector<1x64xf32> to vector<1x64xbf16>
    %c1_387 = arith.constant 1 : index
    %c0_388 = arith.constant 0 : index
    %c0_389 = arith.constant 0 : index
    %409 = vector.load %arg6[%c1_387, %c0_388, %c0_389] : memref<9x64x64xbf16, #tpu.memory_space<vmem>>, vector<1x64x64xbf16>
    %410 = vector.shape_cast %409 : vector<1x64x64xbf16> to vector<64x64xbf16>
    %cst_390 = arith.constant dense<0.000000e+00> : vector<1x64xf32>
    %411 = tpu.matmul %408, %410, %cst_390 {dimension_numbers = #tpu.dot_dimension_numbers<[1], [0], [0], [1], [0, 0, 1, 1], [], []>} : vector<1x64xbf16>, vector<64x64xbf16>, vector<1x64xf32> -> vector<1x64xf32>
    %412 = arith.addf %406, %411 : vector<1x64xf32>
    %413 = vector.extract_strided_slice %398 {offsets = [2, 0], sizes = [1, 64], strides = [1, 1]} : vector<9x64xf32> to vector<1x64xf32>
    %414 = arith.truncf %413 : vector<1x64xf32> to vector<1x64xbf16>
    %c2_391 = arith.constant 2 : index
    %c0_392 = arith.constant 0 : index
    %c0_393 = arith.constant 0 : index
    %415 = vector.load %arg6[%c2_391, %c0_392, %c0_393] : memref<9x64x64xbf16, #tpu.memory_space<vmem>>, vector<1x64x64xbf16>
    %416 = vector.shape_cast %415 : vector<1x64x64xbf16> to vector<64x64xbf16>
    %cst_394 = arith.constant dense<0.000000e+00> : vector<1x64xf32>
    %417 = tpu.matmul %414, %416, %cst_394 {dimension_numbers = #tpu.dot_dimension_numbers<[1], [0], [0], [1], [0, 0, 1, 1], [], []>} : vector<1x64xbf16>, vector<64x64xbf16>, vector<1x64xf32> -> vector<1x64xf32>
    %418 = arith.addf %412, %417 : vector<1x64xf32>
    %419 = vector.extract_strided_slice %398 {offsets = [3, 0], sizes = [1, 64], strides = [1, 1]} : vector<9x64xf32> to vector<1x64xf32>
    %420 = arith.truncf %419 : vector<1x64xf32> to vector<1x64xbf16>
    %c3_395 = arith.constant 3 : index
    %c0_396 = arith.constant 0 : index
    %c0_397 = arith.constant 0 : index
    %421 = vector.load %arg6[%c3_395, %c0_396, %c0_397] : memref<9x64x64xbf16, #tpu.memory_space<vmem>>, vector<1x64x64xbf16>
    %422 = vector.shape_cast %421 : vector<1x64x64xbf16> to vector<64x64xbf16>
    %cst_398 = arith.constant dense<0.000000e+00> : vector<1x64xf32>
    %423 = tpu.matmul %420, %422, %cst_398 {dimension_numbers = #tpu.dot_dimension_numbers<[1], [0], [0], [1], [0, 0, 1, 1], [], []>} : vector<1x64xbf16>, vector<64x64xbf16>, vector<1x64xf32> -> vector<1x64xf32>
    %424 = arith.addf %418, %423 : vector<1x64xf32>
    %425 = vector.extract_strided_slice %398 {offsets = [4, 0], sizes = [1, 64], strides = [1, 1]} : vector<9x64xf32> to vector<1x64xf32>
    %426 = arith.truncf %425 : vector<1x64xf32> to vector<1x64xbf16>
    %c4_399 = arith.constant 4 : index
    %c0_400 = arith.constant 0 : index
    %c0_401 = arith.constant 0 : index
    %427 = vector.load %arg6[%c4_399, %c0_400, %c0_401] : memref<9x64x64xbf16, #tpu.memory_space<vmem>>, vector<1x64x64xbf16>
    %428 = vector.shape_cast %427 : vector<1x64x64xbf16> to vector<64x64xbf16>
    %cst_402 = arith.constant dense<0.000000e+00> : vector<1x64xf32>
    %429 = tpu.matmul %426, %428, %cst_402 {dimension_numbers = #tpu.dot_dimension_numbers<[1], [0], [0], [1], [0, 0, 1, 1], [], []>} : vector<1x64xbf16>, vector<64x64xbf16>, vector<1x64xf32> -> vector<1x64xf32>
    %430 = arith.addf %424, %429 : vector<1x64xf32>
    %431 = vector.extract_strided_slice %398 {offsets = [5, 0], sizes = [1, 64], strides = [1, 1]} : vector<9x64xf32> to vector<1x64xf32>
    %432 = arith.truncf %431 : vector<1x64xf32> to vector<1x64xbf16>
    %c5_403 = arith.constant 5 : index
    %c0_404 = arith.constant 0 : index
    %c0_405 = arith.constant 0 : index
    %433 = vector.load %arg6[%c5_403, %c0_404, %c0_405] : memref<9x64x64xbf16, #tpu.memory_space<vmem>>, vector<1x64x64xbf16>
    %434 = vector.shape_cast %433 : vector<1x64x64xbf16> to vector<64x64xbf16>
    %cst_406 = arith.constant dense<0.000000e+00> : vector<1x64xf32>
    %435 = tpu.matmul %432, %434, %cst_406 {dimension_numbers = #tpu.dot_dimension_numbers<[1], [0], [0], [1], [0, 0, 1, 1], [], []>} : vector<1x64xbf16>, vector<64x64xbf16>, vector<1x64xf32> -> vector<1x64xf32>
    %436 = arith.addf %430, %435 : vector<1x64xf32>
    %437 = vector.extract_strided_slice %398 {offsets = [6, 0], sizes = [1, 64], strides = [1, 1]} : vector<9x64xf32> to vector<1x64xf32>
    %438 = arith.truncf %437 : vector<1x64xf32> to vector<1x64xbf16>
    %c6_407 = arith.constant 6 : index
    %c0_408 = arith.constant 0 : index
    %c0_409 = arith.constant 0 : index
    %439 = vector.load %arg6[%c6_407, %c0_408, %c0_409] : memref<9x64x64xbf16, #tpu.memory_space<vmem>>, vector<1x64x64xbf16>
    %440 = vector.shape_cast %439 : vector<1x64x64xbf16> to vector<64x64xbf16>
    %cst_410 = arith.constant dense<0.000000e+00> : vector<1x64xf32>
    %441 = tpu.matmul %438, %440, %cst_410 {dimension_numbers = #tpu.dot_dimension_numbers<[1], [0], [0], [1], [0, 0, 1, 1], [], []>} : vector<1x64xbf16>, vector<64x64xbf16>, vector<1x64xf32> -> vector<1x64xf32>
    %442 = arith.addf %436, %441 : vector<1x64xf32>
    %443 = vector.extract_strided_slice %398 {offsets = [7, 0], sizes = [1, 64], strides = [1, 1]} : vector<9x64xf32> to vector<1x64xf32>
    %444 = arith.truncf %443 : vector<1x64xf32> to vector<1x64xbf16>
    %c7_411 = arith.constant 7 : index
    %c0_412 = arith.constant 0 : index
    %c0_413 = arith.constant 0 : index
    %445 = vector.load %arg6[%c7_411, %c0_412, %c0_413] : memref<9x64x64xbf16, #tpu.memory_space<vmem>>, vector<1x64x64xbf16>
    %446 = vector.shape_cast %445 : vector<1x64x64xbf16> to vector<64x64xbf16>
    %cst_414 = arith.constant dense<0.000000e+00> : vector<1x64xf32>
    %447 = tpu.matmul %444, %446, %cst_414 {dimension_numbers = #tpu.dot_dimension_numbers<[1], [0], [0], [1], [0, 0, 1, 1], [], []>} : vector<1x64xbf16>, vector<64x64xbf16>, vector<1x64xf32> -> vector<1x64xf32>
    %448 = arith.addf %442, %447 : vector<1x64xf32>
    %449 = vector.extract_strided_slice %398 {offsets = [8, 0], sizes = [1, 64], strides = [1, 1]} : vector<9x64xf32> to vector<1x64xf32>
    %450 = arith.truncf %449 : vector<1x64xf32> to vector<1x64xbf16>
    %c8_415 = arith.constant 8 : index
    %c0_416 = arith.constant 0 : index
    %c0_417 = arith.constant 0 : index
    %451 = vector.load %arg6[%c8_415, %c0_416, %c0_417] : memref<9x64x64xbf16, #tpu.memory_space<vmem>>, vector<1x64x64xbf16>
    %452 = vector.shape_cast %451 : vector<1x64x64xbf16> to vector<64x64xbf16>
    %cst_418 = arith.constant dense<0.000000e+00> : vector<1x64xf32>
    %453 = tpu.matmul %450, %452, %cst_418 {dimension_numbers = #tpu.dot_dimension_numbers<[1], [0], [0], [1], [0, 0, 1, 1], [], []>} : vector<1x64xbf16>, vector<64x64xbf16>, vector<1x64xf32> -> vector<1x64xf32>
    %454 = arith.addf %448, %453 : vector<1x64xf32>
    %455 = arith.addf %454, %399 : vector<1x64xf32>
    %cst_419 = arith.constant 0.000000e+00 : f32
    %456 = vector.broadcast %cst_419 : f32 to vector<1x64xf32>
    %457 = arith.maximumf %455, %456 : vector<1x64xf32>
    %c0_420 = arith.constant 0 : index
    %c0_421 = arith.constant 0 : index
    %458 = vector.load %arg9[%c0_420, %c0_421] : memref<1x512xf32, #tpu.memory_space<vmem>>, vector<1x512xf32>
    %459 = arith.truncf %457 : vector<1x64xf32> to vector<1x64xbf16>
    %c0_422 = arith.constant 0 : index
    %c0_423 = arith.constant 0 : index
    %c0_424 = arith.constant 0 : index
    %460 = vector.load %arg8[%c0_422, %c0_423, %c0_424] : memref<1x64x512xbf16, #tpu.memory_space<vmem>>, vector<1x64x512xbf16>
    %461 = vector.shape_cast %460 : vector<1x64x512xbf16> to vector<64x512xbf16>
    %cst_425 = arith.constant dense<0.000000e+00> : vector<1x512xf32>
    %462 = tpu.matmul %459, %461, %cst_425 {dimension_numbers = #tpu.dot_dimension_numbers<[1], [0], [0], [1], [0, 0, 1, 1], [], []>} : vector<1x64xbf16>, vector<64x512xbf16>, vector<1x512xf32> -> vector<1x512xf32>
    %463 = arith.addf %458, %462 : vector<1x512xf32>
    %cst_426 = arith.constant 0.000000e+00 : f32
    %464 = vector.broadcast %cst_426 : f32 to vector<1x512xf32>
    %465 = arith.maximumf %463, %464 : vector<1x512xf32>
    %466 = arith.truncf %465 : vector<1x512xf32> to vector<1x512xbf16>
    %c0_427 = arith.constant 0 : index
    %c0_428 = arith.constant 0 : index
    %467 = vector.load %arg10[%c0_427, %c0_428] : memref<512x128xbf16, #tpu.memory_space<vmem>>, vector<512x128xbf16>
    %cst_429 = arith.constant dense<0.000000e+00> : vector<1x128xf32>
    %468 = tpu.matmul %466, %467, %cst_429 {dimension_numbers = #tpu.dot_dimension_numbers<[1], [0], [0], [1], [0, 0, 1, 1], [], []>} : vector<1x512xbf16>, vector<512x128xbf16>, vector<1x128xf32> -> vector<1x128xf32>
    %c0_430 = arith.constant 0 : index
    %c0_431 = arith.constant 0 : index
    %469 = vector.load %arg11[%c0_430, %c0_431] : memref<1x128xf32, #tpu.memory_space<vmem>>, vector<1x128xf32>
    %470 = arith.addf %468, %469 : vector<1x128xf32>
    %c0_432 = arith.constant 0 : index
    %c0_433 = arith.constant 0 : index
    %c0_434 = arith.constant 0 : index
    %471 = vector.load %arg12[%c0_432, %c0_433, %c0_434] : memref<1x1x128xf32, #tpu.memory_space<vmem>>, vector<1x1x128xf32>
    %472 = vector.shape_cast %471 : vector<1x1x128xf32> to vector<1x128xf32>
    %473 = vector.shape_cast %470 : vector<1x128xf32> to vector<1x1x128xf32>
    tpu.vector_store %arg12[%c0_432, %c0_433, %c0_434], %473 {strides = array<i32>} : memref<1x1x128xf32, #tpu.memory_space<vmem>>, vector<1x1x128xf32>,
    return
  }
  func.func @transform_0(%arg0: i32) -> (i32, i32, i32) {
    %c0_i32 = arith.constant 0 : i32
    %c0_i32_0 = arith.constant 0 : i32
    %c0_i32_1 = arith.constant 0 : i32
    return %arg0, %c0_i32, %c0_i32_0 : i32, i32, i32
  }
  func.func @transform_1(%arg0: i32) -> (i32, i32) {
    %c0_i32 = arith.constant 0 : i32
    %c0_i32_0 = arith.constant 0 : i32
    %c0_i32_1 = arith.constant 0 : i32
    return %c0_i32, %c0_i32_0 : i32, i32
  }
  func.func @transform_2(%arg0: i32) -> (i32, i32) {
    %c0_i32 = arith.constant 0 : i32
    %c0_i32_0 = arith.constant 0 : i32
    %c0_i32_1 = arith.constant 0 : i32
    return %c0_i32, %c0_i32_0 : i32, i32
  }
  func.func @transform_3(%arg0: i32) -> (i32, i32, i32) {
    %c0_i32 = arith.constant 0 : i32
    %c0_i32_0 = arith.constant 0 : i32
    %c0_i32_1 = arith.constant 0 : i32
    %c0_i32_2 = arith.constant 0 : i32
    return %c0_i32, %c0_i32_0, %c0_i32_1 : i32, i32, i32
  }
  func.func @transform_4(%arg0: i32) -> (i32, i32) {
    %c0_i32 = arith.constant 0 : i32
    %c0_i32_0 = arith.constant 0 : i32
    %c0_i32_1 = arith.constant 0 : i32
    return %c0_i32, %c0_i32_0 : i32, i32
  }
  func.func @transform_5(%arg0: i32) -> (i32, i32, i32) {
    %c0_i32 = arith.constant 0 : i32
    %c0_i32_0 = arith.constant 0 : i32
    %c0_i32_1 = arith.constant 0 : i32
    %c0_i32_2 = arith.constant 0 : i32
    return %c0_i32, %c0_i32_0, %c0_i32_1 : i32, i32, i32
  }
  func.func @transform_6(%arg0: i32) -> (i32, i32) {
    %c0_i32 = arith.constant 0 : i32
    %c0_i32_0 = arith.constant 0 : i32
    %c0_i32_1 = arith.constant 0 : i32
    return %c0_i32, %c0_i32_0 : i32, i32
  }
  func.func @transform_7(%arg0: i32) -> (i32, i32, i32) {
    %c0_i32 = arith.constant 0 : i32
    %c0_i32_0 = arith.constant 0 : i32
    %c0_i32_1 = arith.constant 0 : i32
    %c0_i32_2 = arith.constant 0 : i32
    return %c0_i32, %c0_i32_0, %c0_i32_1 : i32, i32, i32
  }
  func.func @transform_8(%arg0: i32) -> (i32, i32) {
    %c0_i32 = arith.constant 0 : i32
    %c0_i32_0 = arith.constant 0 : i32
    %c0_i32_1 = arith.constant 0 : i32
    return %c0_i32, %c0_i32_0 : i32, i32
  }
  func.func @transform_9(%arg0: i32) -> (i32, i32) {
    %c0_i32 = arith.constant 0 : i32
    %c0_i32_0 = arith.constant 0 : i32
    %c0_i32_1 = arith.constant 0 : i32
    return %c0_i32, %c0_i32_0 : i32, i32
  }
  func.func @transform_10(%arg0: i32) -> (i32, i32) {
    %c0_i32 = arith.constant 0 : i32
    %c0_i32_0 = arith.constant 0 : i32
    %c0_i32_1 = arith.constant 0 : i32
    return %c0_i32, %c0_i32_0 : i32, i32
  }
  func.func @transform_11(%arg0: i32) -> (i32, i32, i32) {
    %c0_i32 = arith.constant 0 : i32
    %c0_i32_0 = arith.constant 0 : i32
    %c0_i32_1 = arith.constant 0 : i32
    return %arg0, %c0_i32, %c0_i32_0 : i32, i32, i32
  }
}

</mosaic_0001>

<bundles_post_ra>
// kernel: forward.1
= control target key start
LH: loop header
LB: loop body
LE: loop exit
PB: predicated region body
PF: predicated region fallthrough
CT: control target
= control target key end

     0   :  { %16 = vsyncpa [#allocation5], 0  ;;  %s5257_s0 = inlined_call_operand.vmem [shape: bf16[2,64,256], index: 0, kind: input, shape index: {}]   ;;  %s5258_s1 = inlined_call_operand.vmem [shape: bf16[256,32], index: 1, kind: input, shape index: {}]   ;;  %s5259_s2 = inlined_call_operand.vmem [shape: f32[1,32], index: 2, kind: input, shape index: {}]   ;;  %s5260_s3 = inlined_call_operand.vmem [shape: bf16[16,32,64], index: 3, kind: input, shape index: {}]   ;;  %s5261_s4 = inlined_call_operand.vmem [shape: f32[1,64], index: 4, kind: input, shape index: {}]   ;;  %s5262_s5 = inlined_call_operand.vmem [shape: bf16[9,64,64], index: 5, kind: input, shape index: {}]   ;;  %s5263_s6 = inlined_call_operand.vmem [shape: f32[1,64], index: 6, kind: input, shape index: {}]   ;;  %s5264_s7 = inlined_call_operand.vmem [shape: bf16[1,64,512], index: 7, kind: input, shape index: {}]   ;;  %s5265_s8 = inlined_call_operand.vmem [shape: f32[1,512], index: 8, kind: input, shape index: {}]   ;;  %s5266_s9 = inlined_call_operand.vmem [shape: bf16[512,128], index: 9, kind: input, shape index: {}]   ;;  %s5267_s10 = inlined_call_operand.vmem [shape: f32[1,128], index: 10, kind: input, shape index: {}]   ;;  %s5268_s11 = inlined_call_operand.hbm [shape: f32[2,1,128], index: 11, kind: output, shape index: {}]  }
   0x1   :  { %18 = vsyncpa [#allocation5 + $0x1], 0  ;;  %s4246_s17 = smov 0   ;;  %s4248_s18 = smov 0  }
   0x2   :  { %s4250_s19 = smov 0   ;;  %s4252_s20 = smov 0  }
   0x3 LB: > { %s4267_s21 = sadd.s32 4294967295, %s4179_s20   ;;  %s3206_s22 = sadd.s32 4294967294, %s4179_s20   ;;  %s4179_s20 = sphi %s4252_s20, %s5276_s20   ;;  %s4175_s19 = sphi %s4250_s19, %s5275_s19   ;;  %s4171_s18 = sphi %s4248_s18, %s5274_s18   ;;  %s4167_s17 = sphi %s4246_s17, %s5273_s17  }
   0x4   : > { %s4271_s23 = sadd.s32 1, %s4179_s20   ;;  %s267_s24 = sadd.s32 1, %s4175_s19 }
   0x5   : > { %s264_s25 = ssub.s32 %s4179_s20, %s4271_s23  ;;  %p277_p0 = scmp.ne.s32.totalorder %s4175_s19, %s4171_s18 }
   0x6   : > { %p265_p1 = scmp.eq.s32.totalorder %s264_s25, 0  ;;  %p278_p2 = scmp.eq.s32.totalorder %s4267_s21, 1 }
   0x7   : > { %p283_p3 = scmp.ne.s32.totalorder %s4171_s18, %s4167_s17  ;;  %p284_p4 = scmp.eq.s32.totalorder %s3206_s22, 1 }
   0x8   : > { %s4282_s26 = scalar_select %p265_p1, %s4175_s19, %s267_s24  }
   0x9   : > { %p4284_p5 = por %p278_p2, %p277_p0  ;;  %p4288_p6 = por %p284_p4, %p283_p3 }
   0xa   : > { %5269 = sst [smem:[#allocation7_spill]] %s4282_s26  ;;  %p3209_p7 = scmp.ge.s32.totalorder %s4179_s20, 1 }
   0xb   : > { %p340_p8 = scmp.lt.s32.totalorder %s4179_s20, 3 }
   0xd   : > { %p341_p9 = pnand %p3209_p7, %p340_p8 }
   0xe   : > { %v3965_v0 = vld [vmem:[%s5258_s1 + $0x40] sm:$0xff] (!%p341_p9)   ;;  %v3967_v2 = vld [vmem:[%s5258_s1 + $0x48] sm:$0xff] (!%p341_p9)   ;;  %p379_p10 = scmp.lt.s32.totalorder (!%p341_p9), %s4267_s21, 1  ;;  %v3969_v4 = vld [vmem:[%s5258_s1 + $0x50] sm:$0xff] (!%p341_p9)   ;;  %v4181_v25 = vmov (!%p341_p9), 0.0   ;;  %vm4182_vm0 = vmmov (!%p341_p9), 0  }
   0xf   : > { %344 = sbr.rel (%p341_p9) target bundleno = 1443 (0x5a3), region = 64  ;;  %v3966_v1 = vld [vmem:[%s5258_s1] sm:$0xff] (!%p341_p9)   ;;  %3509 = vmatprep.subr.bf16.mxu0 (!%p341_p9), %v3965_v0  ;;  %v3968_v3 = vld [vmem:[%s5258_s1 + $0x8] sm:$0xff] (!%p341_p9)   ;;  %v3970_v5 = vld [vmem:[%s5258_s1 + $0x10] sm:$0xff] (!%p341_p9)   ;;  %3686 = vmatprep.subr.bf16.mxu1 (!%p341_p9), %v4181_v25  ;;  %vm642_vm1 = vcmask (!%p341_p9), 253952   ;;  %vm644_vm2 = vcmask (!%p341_p9), 256002  }
  0x10   : > { %3510 = vmatpush3.bf16.msra.mxu0 (!%p341_p9), %v3966_v1  ;;  %v3971_v6 = vld [vmem:[%s5258_s1 + $0x58] sm:$0xff] (!%p341_p9)   ;;  %v3973_v8 = vld [vmem:[%s5258_s1 + $0x60] sm:$0xff] (!%p341_p9)   ;;  %v3975_v10 = vld [vmem:[%s5258_s1 + $0x68] sm:$0xff] (!%p341_p9)   ;;  %3690 = vmatprep.mubr.msk.bf16.mxu1 (!%p341_p9), %vm4182_vm0, %v4181_v25  ;;  %vm646_vm3 = vcmask (!%p341_p9), 258052   ;;  %vm661_vm4 = vcmask (!%p341_p9), 254977   ;;  %vm663_vm5 = vcmask (!%p341_p9), 257027  }
  0x11   : > { %3511 = vmatprep.subr.bf16.mxu0 (!%p341_p9), %v3967_v2  ;;  %v3972_v7 = vld [vmem:[%s5258_s1 + $0x18] sm:$0xff] (!%p341_p9)   ;;  %v3974_v9 = vld [vmem:[%s5258_s1 + $0x20] sm:$0xff] (!%p341_p9)   ;;  %v3976_v12 = vld [vmem:[%s5258_s1 + $0x28] sm:$0xff] (!%p341_p9)   ;;  %vm665_vm6 = vcmask (!%p341_p9), 259077   ;;  %vm796_vm7 = vcmask (!%p341_p9), 260102   ;;  %vm693_vm8 = vcmask (!%p341_p9), 261120  }
  0x12   : > { %v3977_v13 = vld [vmem:[%s5258_s1 + $0x70] sm:$0xff] (!%p341_p9)   ;;  %v3979_v15 = vld [vmem:[%s5258_s1 + $0x78] sm:$0xff] (!%p341_p9)   ;;  %v4382_v30 = vld [vmem:[%s5259_s2] ss:$0 sm:$0xff] (!%p341_p9)  ;;  %vm872_vm9 = vcmask (!%p341_p9), 261127   ;;  %vm1902_vm10 = vcmask (!%p341_p9), 523264  }
  0x13   : > { %v3978_v14 = vld [vmem:[%s5258_s1 + $0x30] sm:$0xff] (!%p341_p9)   ;;  %v3980_v16 = vld [vmem:[%s5258_s1 + $0x38] sm:$0xff] (!%p341_p9)   ;;  %v3995_v2 = vld [vmem:[%s5260_s3] sm:$0xff] (!%p341_p9)   ;;  %s377_s15 = sand.u32 (!%p341_p9), 1, %s4171_s18   ;;  %s3505_s24 = sshll.u32 (!%p341_p9), %s4267_s21, 4 }
  0x14   : > { %3512 = vmatpush3.bf16.msra.mxu0 (!%p341_p9), %v3968_v3  ;;  %v3993_v24 = vld [vmem:[%s5260_s3 + $0x10] sm:$0xff] (!%p341_p9)   ;;  %v3994_v26 = vld [vmem:[%s5260_s3 + $0x18] sm:$0xff] (!%p341_p9)   ;;  %s378_s26 = scalar_lea.vmem (!%p341_p9), [#allocation4], %s377_s15  ;;  %s5215_s29 = scalar_lea.hbm (!%p341_p9), %s5268_s11, %s3505_s24 }
  0x15   : > { %3513 = vmatprep.subr.bf16.mxu0 (!%p341_p9), %v3969_v4  ;;  %3687 = vmatpush3.bf16.msra.mxu1 (!%p341_p9), %v3993_v24  ;;  %v4006_v27 = vld [vmem:[%s5260_s3 + $0x70] sm:$0xff] (!%p341_p9)   ;;  %v4008_v28 = vld [vmem:[%s5260_s3 + $0x78] sm:$0xff] (!%p341_p9)   ;;  %v3996_v4 = vld [vmem:[%s5260_s3 + $0x8] sm:$0xff] (!%p341_p9)   ;;  %s3139_s13 = scalar_lea.sflag (!%p341_p9), [#allocation5], %s377_s15 }
  0x16   : > { %s380_s12 = scalar_select %p379_p10, %s4267_s21, 1  ;;  %3688 = vmatprep.subr.bf16.mxu1 %v4181_v25 }
  0x17   : > { %s4185_s21 = smov [#allocation4]  }
  0x18   : > { %3514 = vmatpush3.bf16.msra.mxu0 %v3970_v5  ;;  %s3508_s22 = sshll.u32 %s380_s12, 6  ;;  %s4121_s12 = sshll.u32 %s4185_s21, 4  ;;  %s4122_s12 = int_to_ptr.vmem [resolvable:$false] %s4121_s12 }
  0x19   : > { %3515 = vmatprep.subr.bf16.mxu0 %v3971_v6  ;;  %s4326_s30 = scalar_lea.vmem %s5257_s0, %s3508_s22  ;;  %3689 = vmatpush3.bf16.msra.mxu1 %v3994_v26  ;;  %v3997_v6 = vld [vmem:[%s5260_s3 + $0x20] sm:$0xff]   ;;  %v4002_v26 = vld [vmem:[%s5260_s3 + $0x48] sm:$0xff]   ;;  %s3151_s22 = sshll.u32 %s378_s26, 4  ;;  %s5217_s22 = int_to_ptr.vmem [resolvable:$true] %s3151_s22 }
  0x1a   : > { %v3983_v11 = vld [vmem:[%s4326_s30 + $0x4] ss:$8 sps:$4 sm:$0xff]   ;;  %v3981_v17 = vld [vmem:[%s4326_s30] ss:$8 sps:$4 sm:$0xff]   ;;  %v3984_v18 = vld [vmem:[%s4326_s30 + $0x14] ss:$8 sps:$4 sm:$0xff]   ;;  %3694 = vmatprep.subr.bf16.mxu1 %v4181_v25  ;;  %p4124_p0 = scmp.lt.s32.totalorder %s5217_s22, %s4122_s12 }
  0x1b   : > { %600 = vmatprep.mubr.bf16.mxu0 %v3983_v11  ;;  %v3986_v19 = vld [vmem:[%s4326_s30 + $0x10] ss:$8 sps:$4 sm:$0xff]   ;;  %v3987_v20 = vld [vmem:[%s4326_s30 + $0x24] ss:$8 sps:$4 sm:$0xff]   ;;  %v3989_v21 = vld [vmem:[%s4326_s30 + $0x20] ss:$8 sps:$4 sm:$0xff]  }
  0x1c   : > { %3516 = vmatpush3.bf16.msra.mxu0 %v3972_v7  ;;  %v3990_v22 = vld [vmem:[%s4326_s30 + $0x34] ss:$8 sps:$4 sm:$0xff]   ;;  %v3992_v23 = vld [vmem:[%s4326_s30 + $0x30] ss:$8 sps:$4 sm:$0xff]   ;;  %s4117_s14 = scalar_lea.vmem %s5217_s22, 16  ;;  %s4123_s16 = scalar_lea.vmem %s4122_s12, 32 }
  0x1d   : > { %3517 = vmatprep.subr.bf16.mxu0 %v3973_v8  ;;  %p4118_p11 = scmp.ne.s32.totalorder %s5217_s22, %s4117_s14  ;;  %p4125_p1 = scmp.lt.s32.totalorder %s4123_s16, %s4117_s14 }
  0x1f   : > { %p4119_p12 = pnand %p4118_p11, %p4284_p5  ;;  %p4126_p2 = por %p4125_p1, %p4124_p0 }
  0x20   : > { %3518 = vmatpush3.bf16.msra.mxu0 %v3974_v9 }
  0x21   : > { %3519 = vmatprep.subr.bf16.mxu0 %v3975_v10  ;;  %p4120_p13 = pneg %p4119_p12 }
  0x23   : > { %p4127_p3 = pnand %p4126_p2, %p4120_p13 }
  0x24   : > { %3520 = vmatpush3.bf16.msra.mxu0 %v3976_v12  ;;  %v3998_v12 = vld [vmem:[%s5260_s3 + $0x28] sm:$0xff]  }
  0x25   : > { %3521 = vmatprep.subr.bf16.mxu0 %v3977_v13 }
  0x28   : > { %3522 = vmatpush3.bf16.msra.mxu0 %v3978_v14 }
  0x29   : > { %3523 = vmatprep.subr.bf16.mxu0 %v3979_v15 }
  0x2c   : > { %3524 = vmatpush3.bf16.msra.mxu0 %v3980_v16 }
  0x2d   : > { %3742 = vmatprep.subr.bf16.mxu0 %v4181_v25 }
  0x2f   : > { %601 = vmatmul.mubr.bf16.vlgmr.msra.gmra.mrb[0].mxu0 %v3981_v17  ;;  %v3999_v17 = vld [vmem:[%s5260_s3 + $0x30] sm:$0xff]  }
  0x30   : > { %608 = vmatprep.mubr.bf16.mxu0 %v3984_v18  ;;  %3743 = vmatpush3.bf16.msra.mxu0 %v4006_v27  ;;  %v4003_v27 = vld [vmem:[%s5260_s3 + $0x50] sm:$0xff]  }
  0x31   : > { %3744 = vmatprep.subr.bf16.mxu0 %v4181_v25 }
  0x34   : > { %3745 = vmatpush3.bf16.msra.mxu0 %v4008_v28 }
  0x35   : > { %3758 = vmatprep.subr.bf16.mxu0 %v4181_v25 }
  0x37   : > { %609 = vmatmul.mubr.bf16.gmra.mrb[4].mxu0 %v3986_v19 }
  0x38   : > { %616 = vmatprep.mubr.bf16.mxu0 %v3987_v20  ;;  %v4000_v20 = vld [vmem:[%s5260_s3 + $0x38] sm:$0xff]  }
  0x3f   : > { %617 = vmatmul.mubr.bf16.gmra.mrb[8].mxu0 %v3989_v21 }
  0x40   : > { %624 = vmatprep.mubr.bf16.mxu0 %v3990_v22  ;;  %v4001_v22 = vld [vmem:[%s5260_s3 + $0x40] sm:$0xff]  }
  0x47   : > { %625 = vmatmul.mubr.bf16.gmra.mrb[12].mxu0 %v3992_v23 }
  0x48   : > { %3746 = vmatprep.mubr.msk.bf16.mxu0 %vm4182_vm0, %v4181_v25 }
 0x102   : > { %v3525_v29 = vpop.f32.mrb[0].mxu0 }
 0x103   : > { %v3526_v31 = vpop.f32.mrb[1].mxu0 }
 0x104   : > { %v3527_v32 = vadd.f32 %v3526_v31, %v3525_v29  ;;  %v3528_v33 = vpop.f32.mrb[2].mxu0  ;;  %v4004_v31 = vld [vmem:[%s5260_s3 + $0x58] sm:$0xff]  }
 0x105   : > { %v3529_v34 = vpop.f32.mrb[3].mxu0 }
 0x106   : > { %v603_v35 = vadd.f32 %v3527_v32, %v4382_v30  ;;  %v4385_v36 = vadd.f32 %v3529_v34, %v3528_v33  ;;  %v4005_v33 = vld [vmem:[%s5260_s3 + $0x60] sm:$0xff]  }
 0x108   : > { %v4387_v37 = vmax.f32 %v603_v35, 0.0  ;;  %v606_v9 = vadd.f32 %v4385_v36, %v4382_v30  ;;  %v4007_v36 = vld [vmem:[%s5260_s3 + $0x68] sm:$0xff]  }
 0x10a   : > { %643 = vst.msk [vmem:[#allocation2] sm:$0x1] %vm642_vm1, %v4387_v37  ;;  %v3531_v38 = vpop.f32.mrb[4].mxu0  ;;  %v4504_v13 = vmax.f32 %v606_v9, 0.0 }
 0x10b   : > { %645 = vst.msk [vmem:[#allocation2 - $0x1] sm:$0x4] %vm644_vm2, %v4387_v37  ;;  %v3532_v39 = vpop.f32.mrb[5].mxu0 }
 0x10c   : > { %647 = vst.msk [vmem:[#allocation2 - $0x2] sm:$0x10] %vm646_vm3, %v4387_v37  ;;  %v3533_v40 = vadd.f32 %v3532_v39, %v3531_v38  ;;  %v3534_v41 = vpop.f32.mrb[6].mxu0 }
 0x10d   : > { %v3535_v42 = vpop.f32.mrb[7].mxu0 }
 0x10e   : > { %v611_v43 = vadd.f32 %v3533_v40, %v4382_v30  ;;  %v4396_v44 = vadd.f32 %v3535_v42, %v3534_v41  ;;  %v4009_v40 = vld [vmem:[%s5260_s3 + $0x80] sm:$0xff]  }
 0x110   : > { %v4398_v45 = vmax.f32 %v611_v43, 0.0  ;;  %v614_v10 = vadd.f32 %v4396_v44, %v4382_v30  ;;  %v4011_v43 = vld [vmem:[%s5260_s3 + $0x90] sm:$0xff]   ;;  %v4010_v44 = vld [vmem:[%s5260_s3 + $0x88] sm:$0xff]  }
 0x112   : > { %648 = vst.msk [vmem:[#allocation2 + $0x3] sm:$0x1] %vm642_vm1, %v4398_v45  ;;  %v3537_v46 = vpop.f32.mrb[8].mxu0  ;;  %v4506_v14 = vmax.f32 %v614_v10, 0.0  ;;  %v4023_v10 = vld [vmem:[%s5260_s3 + $0xf0] sm:$0xff]  }
 0x113   : > { %649 = vst.msk [vmem:[#allocation2 + $0x2] sm:$0x4] %vm644_vm2, %v4398_v45  ;;  %v3538_v47 = vpop.f32.mrb[9].mxu0 }
 0x114   : > { %650 = vst.msk [vmem:[#allocation2 + $0x1] sm:$0x10] %vm646_vm3, %v4398_v45  ;;  %v3539_v48 = vadd.f32 %v3538_v47, %v3537_v46  ;;  %v3540_v49 = vpop.f32.mrb[10].mxu0  ;;  %v4012_v46 = vld [vmem:[%s5260_s3 + $0x98] sm:$0xff]  }
 0x115   : > { %v3541_v50 = vpop.f32.mrb[11].mxu0 }
 0x116   : > { %v619_v51 = vadd.f32 %v3539_v48, %v4382_v30  ;;  %v4407_v52 = vadd.f32 %v3541_v50, %v3540_v49  ;;  %v4013_v49 = vld [vmem:[%s5260_s3 + $0xa0] sm:$0xff]  }
 0x118   : > { %v4409_v53 = vmax.f32 %v619_v51, 0.0  ;;  %v622_v11 = vadd.f32 %v4407_v52, %v4382_v30  ;;  %v4014_v51 = vld [vmem:[%s5260_s3 + $0xa8] sm:$0xff]  }
 0x11a   : > { %651 = vst.msk [vmem:[#allocation2 + $0x6] sm:$0x1] %vm642_vm1, %v4409_v53  ;;  %v3543_v54 = vpop.f32.mrb[12].mxu0  ;;  %v4508_v15 = vmax.f32 %v622_v11, 0.0 }
 0x11b   : > { %652 = vst.msk [vmem:[#allocation2 + $0x5] sm:$0x4] %vm644_vm2, %v4409_v53  ;;  %v3544_v55 = vpop.f32.mrb[13].mxu0 }
 0x11c   : > { %653 = vst.msk [vmem:[#allocation2 + $0x4] sm:$0x10] %vm646_vm3, %v4409_v53  ;;  %v3545_v56 = vadd.f32 %v3544_v55, %v3543_v54  ;;  %v3546_v57 = vpop.f32.mrb[14].mxu0  ;;  %v4015_v55 = vld [vmem:[%s5260_s3 + $0xb0] sm:$0xff]  }
 0x11d   : > { %v3547_v58 = vpop.f32.mrb[15].mxu0 }
 0x11e   : > { %v4418_v59 = vadd.f32 %v3545_v56, %v4382_v30  ;;  %v3548_v60 = vadd.f32 %v3547_v58, %v3546_v57  ;;  %v4016_v57 = vld [vmem:[%s5260_s3 + $0xb8] sm:$0xff]  }
 0x120   : > { %v4421_v61 = vadd.f32 %v3548_v60, %v4382_v30  ;;  %v4017_v60 = vld [vmem:[%s5260_s3 + $0xc0] sm:$0xff]  }
 0x122   : > { %v654_v62 = vld [vmem:[#allocation2] sm:$0xff] }
 0x123   : > { %v655_v63 = vld [vmem:[#allocation2 + $0x8] sm:$0x1]  ;;  %662 = vst.msk [vmem:[#allocation2 - $0x1] sm:$0x2] %vm661_vm4, %v4387_v37  ;;  %667 = vst.msk [vmem:[#allocation2 + $0x2] sm:$0x2] %vm661_vm4, %v4398_v45 }
 0x124   : > { %664 = vst.msk [vmem:[#allocation2 - $0x2] sm:$0x8] %vm663_vm5, %v4387_v37  ;;  %668 = vst.msk [vmem:[#allocation2 + $0x1] sm:$0x8] %vm663_vm5, %v4398_v45  ;;  %v656_v8 = vpack.c.bf16 %v655_v63, %v654_v62 }
 0x125   : > { %666 = vst.msk [vmem:[#allocation2 - $0x3] sm:$0x20] %vm665_vm6, %v4387_v37  ;;  %669 = vst.msk [vmem:[#allocation2] sm:$0x20] %vm665_vm6, %v4398_v45 }
 0x126   : > { %670 = vst.msk [vmem:[#allocation2 + $0x5] sm:$0x2] %vm661_vm4, %v4409_v53 }
 0x127   : > { %671 = vst.msk [vmem:[#allocation2 + $0x4] sm:$0x8] %vm663_vm5, %v4409_v53 }
 0x128   : > { %672 = vst.msk [vmem:[#allocation2 + $0x3] sm:$0x20] %vm665_vm6, %v4409_v53 }
 0x12e   : > { %v673_v0 = vld [vmem:[#allocation2] sm:$0xff] }
 0x12f   : > { %v674_v1 = vld [vmem:[#allocation2 + $0x8] sm:$0x1]  ;;  %794 = vst.msk [vmem:[#allocation2 - $0x2] sm:$0x4] %vm644_vm2, %v4387_v37  ;;  %798 = vst.msk [vmem:[#allocation2 + $0x1] sm:$0x4] %vm644_vm2, %v4398_v45 }
 0x130   : > { %795 = vst.msk [vmem:[#allocation2 - $0x3] sm:$0x10] %vm646_vm3, %v4387_v37  ;;  %799 = vst.msk [vmem:[#allocation2] sm:$0x10] %vm646_vm3, %v4398_v45  ;;  %v675_v3 = vpack.c.bf16 %v674_v1, %v673_v0  ;;  %v4019_v1 = vld [vmem:[%s5260_s3 + $0xd0] sm:$0xff]  }
 0x131   : > { %797 = vst.msk [vmem:[#allocation2 - $0x4] sm:$0x40] %vm796_vm7, %v4387_v37  ;;  %800 = vst.msk [vmem:[#allocation2 - $0x1] sm:$0x40] %vm796_vm7, %v4398_v45 }
 0x132   : > { %801 = vst.msk [vmem:[#allocation2 + $0x4] sm:$0x4] %vm644_vm2, %v4409_v53  ;;  %3691 = vmatmul.mubr.msk.bf16.vlgmr.msra.gmra.mrb[0].mxu1 %vm693_vm8, %v675_v3 }
 0x133   : > { %802 = vst.msk [vmem:[#allocation2 + $0x3] sm:$0x10] %vm646_vm3, %v4409_v53  ;;  %3695 = vmatpush3.bf16.msra.mxu1 %v3995_v2  ;;  %3698 = vmatprep.mubr.msk.bf16.mxu1 %vm4182_vm0, %v4181_v25  ;;  %v4020_v2 = vld [vmem:[%s5260_s3 + $0xd8] sm:$0xff]  }
 0x134   : > { %803 = vst.msk [vmem:[#allocation2 + $0x2] sm:$0x40] %vm796_vm7, %v4409_v53  ;;  %3696 = vmatprep.subr.bf16.mxu1 %v4181_v25 }
 0x137   : > { %3697 = vmatpush3.bf16.msra.mxu1 %v3996_v4 }
 0x138   : > { %3702 = vmatprep.subr.bf16.mxu1 %v4181_v25 }
 0x13a   : > { %v804_v5 = vld [vmem:[#allocation2] sm:$0xff]  ;;  %3699 = vmatmul.mubr.msk.bf16.vlgmr.msra.gmra.mrb[4].mxu1 %vm693_vm8, %v656_v8 }
 0x13b   : > { %v805_v7 = vld [vmem:[#allocation2 + $0x8] sm:$0x1]  ;;  %870 = vst.msk [vmem:[#allocation2 - $0x3] sm:$0x8] %vm663_vm5, %v4387_v37  ;;  %874 = vst.msk [vmem:[#allocation2] sm:$0x8] %vm663_vm5, %v4398_v45  ;;  %3703 = vmatpush3.bf16.msra.mxu1 %v3997_v6  ;;  %3706 = vmatprep.mubr.msk.bf16.mxu1 %vm4182_vm0, %v4181_v25 }
 0x13c   : > { %871 = vst.msk [vmem:[#allocation2 - $0x4] sm:$0x20] %vm665_vm6, %v4387_v37  ;;  %875 = vst.msk [vmem:[#allocation2 - $0x1] sm:$0x20] %vm665_vm6, %v4398_v45  ;;  %3704 = vmatprep.subr.bf16.mxu1 %v4181_v25  ;;  %v806_v19 = vpack.c.bf16 %v805_v7, %v804_v5  ;;  %v4021_v5 = vld [vmem:[%s5260_s3 + $0xe0] sm:$0xff]   ;;  %v4022_v7 = vld [vmem:[%s5260_s3 + $0xe8] sm:$0xff]  }
 0x13d   : > { %873 = vst.msk [vmem:[#allocation2 - $0x5] sm:$0x80] %vm872_vm9, %v4387_v37  ;;  %876 = vst.msk [vmem:[#allocation2 - $0x2] sm:$0x80] %vm872_vm9, %v4398_v45  ;;  %v4626_v37 = vmax.f32 %v4418_v59, 0.0 }
 0x13e   : > { %877 = vst.msk [vmem:[#allocation2 + $0x3] sm:$0x8] %vm663_vm5, %v4409_v53 }
 0x13f   : > { %878 = vst.msk [vmem:[#allocation2 + $0x2] sm:$0x20] %vm665_vm6, %v4409_v53  ;;  %3705 = vmatpush3.bf16.msra.mxu1 %v3998_v12  ;;  %v4024_v12 = vld [vmem:[%s5260_s3 + $0xf8] sm:$0xff]  }
 0x140   : > { %879 = vst.msk [vmem:[#allocation2 + $0x1] sm:$0x80] %vm872_vm9, %v4409_v53  ;;  %3710 = vmatprep.subr.bf16.mxu1 %v4181_v25 }
 0x142   : > { %3707 = vmatmul.mubr.msk.bf16.vlgmr.msra.gmra.mrb[8].mxu1 %vm693_vm8, %v806_v19 }
 0x143   : > { %3711 = vmatpush3.bf16.msra.mxu1 %v3999_v17  ;;  %3714 = vmatprep.mubr.msk.bf16.mxu1 %vm4182_vm0, %v4181_v25 }
 0x144   : > { %3712 = vmatprep.subr.bf16.mxu1 %v4181_v25 }
 0x146   : > { %v880_v16 = vld [vmem:[#allocation2] sm:$0xff] }
 0x147   : > { %v881_v18 = vld [vmem:[#allocation2 + $0x8] sm:$0x1]  ;;  %946 = vst.msk [vmem:[#allocation2] sm:$0x1] %vm642_vm1, %v4504_v13  ;;  %949 = vst.msk [vmem:[#allocation2 + $0x3] sm:$0x1] %vm642_vm1, %v4506_v14  ;;  %3713 = vmatpush3.bf16.msra.mxu1 %v4000_v20 }
 0x148   : > { %947 = vst.msk [vmem:[#allocation2 - $0x1] sm:$0x4] %vm644_vm2, %v4504_v13  ;;  %950 = vst.msk [vmem:[#allocation2 + $0x2] sm:$0x4] %vm644_vm2, %v4506_v14  ;;  %v882_v24 = vpack.c.bf16 %v881_v18, %v880_v16  ;;  %3718 = vmatprep.subr.bf16.mxu1 %v4181_v25  ;;  %v4026_v20 = vld [vmem:[%s5262_s5 + $0x20] sm:$0xff]  }
 0x149   : > { %948 = vst.msk [vmem:[#allocation2 - $0x2] sm:$0x10] %vm646_vm3, %v4504_v13  ;;  %951 = vst.msk [vmem:[#allocation2 + $0x1] sm:$0x10] %vm646_vm3, %v4506_v14 }
 0x14a   : > { %952 = vst.msk [vmem:[#allocation2 + $0x6] sm:$0x1] %vm642_vm1, %v4508_v15  ;;  %3715 = vmatmul.mubr.msk.bf16.vlgmr.msra.gmra.mrb[12].mxu1 %vm693_vm8, %v882_v24  ;;  %v4030_v24 = vld [vmem:[%s5262_s5 + $0x30] sm:$0xff]  }
 0x14b   : > { %953 = vst.msk [vmem:[#allocation2 + $0x5] sm:$0x4] %vm644_vm2, %v4508_v15  ;;  %3719 = vmatpush3.bf16.msra.mxu1 %v4001_v22  ;;  %3722 = vmatprep.mubr.msk.bf16.mxu1 %vm4182_vm0, %v4181_v25  ;;  %v4028_v22 = vld [vmem:[%s5262_s5 + $0x28] sm:$0xff]  }
 0x14c   : > { %954 = vst.msk [vmem:[#allocation2 + $0x4] sm:$0x10] %vm646_vm3, %v4508_v15  ;;  %3720 = vmatprep.subr.bf16.mxu1 %v4181_v25 }
 0x14f   : > { %3721 = vmatpush3.bf16.msra.mxu1 %v4002_v26  ;;  %v4031_v26 = vld [vmem:[%s5262_s5 + $0x18] sm:$0xff]  }
 0x150   : > { %3726 = vmatprep.subr.bf16.mxu1 %v4181_v25 }
 0x152   : > { %v955_v21 = vld [vmem:[#allocation2] sm:$0xff] }
 0x153   : > { %v956_v23 = vld [vmem:[#allocation2 + $0x8] sm:$0x1]  ;;  %1021 = vst.msk [vmem:[#allocation2 - $0x1] sm:$0x2] %vm661_vm4, %v4504_v13  ;;  %1024 = vst.msk [vmem:[#allocation2 + $0x2] sm:$0x2] %vm661_vm4, %v4506_v14 }
 0x154   : > { %1022 = vst.msk [vmem:[#allocation2 - $0x2] sm:$0x8] %vm663_vm5, %v4504_v13  ;;  %1025 = vst.msk [vmem:[#allocation2 + $0x1] sm:$0x8] %vm663_vm5, %v4506_v14  ;;  %v957_v30 = vpack.c.bf16 %v956_v23, %v955_v21  ;;  %v4027_v21 = vld [vmem:[%s5262_s5 + $0x8] sm:$0xff]   ;;  %v4029_v23 = vld [vmem:[%s5262_s5 + $0x10] sm:$0xff]  }
 0x155   : > { %1023 = vst.msk [vmem:[#allocation2 - $0x3] sm:$0x20] %vm665_vm6, %v4504_v13  ;;  %1026 = vst.msk [vmem:[#allocation2] sm:$0x20] %vm665_vm6, %v4506_v14 }
 0x156   : > { %1027 = vst.msk [vmem:[#allocation2 + $0x5] sm:$0x2] %vm661_vm4, %v4508_v15  ;;  %3723 = vmatmul.mubr.msk.bf16.vlgmr.msra.gmra.mrb[16].mxu1 %vm693_vm8, %v957_v30 }
 0x157   : > { %1028 = vst.msk [vmem:[#allocation2 + $0x4] sm:$0x8] %vm663_vm5, %v4508_v15  ;;  %3727 = vmatpush3.bf16.msra.mxu1 %v4003_v27  ;;  %3730 = vmatprep.mubr.msk.bf16.mxu1 %vm4182_vm0, %v4181_v25  ;;  %v4032_v27 = vld [vmem:[%s5262_s5 + $0x38] sm:$0xff]  }
 0x158   : > { %1029 = vst.msk [vmem:[#allocation2 + $0x3] sm:$0x20] %vm665_vm6, %v4508_v15  ;;  %3728 = vmatprep.subr.bf16.mxu1 %v4181_v25 }
 0x15b   : > { %3729 = vmatpush3.bf16.msra.mxu1 %v4004_v31 }
 0x15c   : > { %3734 = vmatprep.subr.bf16.mxu1 %v4181_v25 }
 0x15e   : > { %v1030_v28 = vld [vmem:[#allocation2] sm:$0xff] }
 0x15f   : > { %v1031_v29 = vld [vmem:[#allocation2 + $0x8] sm:$0x1]  ;;  %1096 = vst.msk [vmem:[#allocation2 - $0x2] sm:$0x4] %vm644_vm2, %v4504_v13  ;;  %1099 = vst.msk [vmem:[#allocation2 + $0x1] sm:$0x4] %vm644_vm2, %v4506_v14 }
 0x160   : > { %1097 = vst.msk [vmem:[#allocation2 - $0x3] sm:$0x10] %vm646_vm3, %v4504_v13  ;;  %1100 = vst.msk [vmem:[#allocation2] sm:$0x10] %vm646_vm3, %v4506_v14  ;;  %v1032_v35 = vpack.c.bf16 %v1031_v29, %v1030_v28 }
 0x161   : > { %1098 = vst.msk [vmem:[#allocation2 - $0x4] sm:$0x40] %vm796_vm7, %v4504_v13  ;;  %1101 = vst.msk [vmem:[#allocation2 - $0x1] sm:$0x40] %vm796_vm7, %v4506_v14 }
 0x162   : > { %1102 = vst.msk [vmem:[#allocation2 + $0x4] sm:$0x4] %vm644_vm2, %v4508_v15  ;;  %3731 = vmatmul.mubr.msk.bf16.vlgmr.msra.gmra.mrb[20].mxu1 %vm693_vm8, %v1032_v35 }
 0x163   : > { %1103 = vst.msk [vmem:[#allocation2 + $0x3] sm:$0x10] %vm646_vm3, %v4508_v15  ;;  %3735 = vmatpush3.bf16.msra.mxu1 %v4005_v33  ;;  %3738 = vmatprep.mubr.msk.bf16.mxu1 %vm4182_vm0, %v4181_v25 }
 0x164   : > { %1104 = vst.msk [vmem:[#allocation2 + $0x2] sm:$0x40] %vm796_vm7, %v4508_v15  ;;  %3736 = vmatprep.subr.bf16.mxu1 %v4181_v25 }
 0x167   : > { %3737 = vmatpush3.bf16.msra.mxu1 %v4007_v36 }
 0x168   : > { %3750 = vmatprep.subr.bf16.mxu1 %v4181_v25 }
 0x16a   : > { %v1105_v32 = vld [vmem:[#allocation2] sm:$0xff] }
 0x16b   : > { %v1106_v34 = vld [vmem:[#allocation2 + $0x8] sm:$0x1]  ;;  %1171 = vst.msk [vmem:[#allocation2 - $0x3] sm:$0x8] %vm663_vm5, %v4504_v13  ;;  %1174 = vst.msk [vmem:[#allocation2] sm:$0x8] %vm663_vm5, %v4506_v14 }
 0x16c   : > { %1172 = vst.msk [vmem:[#allocation2 - $0x4] sm:$0x20] %vm665_vm6, %v4504_v13  ;;  %1175 = vst.msk [vmem:[#allocation2 - $0x1] sm:$0x20] %vm665_vm6, %v4506_v14  ;;  %v1107_v41 = vpack.c.bf16 %v1106_v34, %v1105_v32 }
 0x16d   : > { %1173 = vst.msk [vmem:[#allocation2 - $0x5] sm:$0x80] %vm872_vm9, %v4504_v13  ;;  %1176 = vst.msk [vmem:[#allocation2 - $0x2] sm:$0x80] %vm872_vm9, %v4506_v14 }
 0x16e   : > { %1177 = vst.msk [vmem:[#allocation2 + $0x3] sm:$0x8] %vm663_vm5, %v4508_v15  ;;  %3739 = vmatmul.mubr.msk.bf16.vlgmr.msra.gmra.mrb[24].mxu1 %vm693_vm8, %v1107_v41 }
 0x16f   : > { %1178 = vst.msk [vmem:[#allocation2 + $0x2] sm:$0x20] %vm665_vm6, %v4508_v15  ;;  %3751 = vmatpush3.bf16.msra.mxu1 %v4009_v40  ;;  %3754 = vmatprep.mubr.msk.bf16.mxu1 %vm4182_vm0, %v4181_v25 }
 0x170   : > { %1179 = vst.msk [vmem:[#allocation2 + $0x1] sm:$0x80] %vm872_vm9, %v4508_v15  ;;  %3752 = vmatprep.subr.bf16.mxu1 %v4181_v25 }
 0x173   : > { %3753 = vmatpush3.bf16.msra.mxu1 %v4010_v44 }
 0x174   : > { %3766 = vmatprep.subr.bf16.mxu1 %v4181_v25 }
 0x176   : > { %v1180_v38 = vld [vmem:[#allocation2] sm:$0xff] }
 0x177   : > { %v1181_v39 = vld [vmem:[#allocation2 + $0x8] sm:$0x1]  ;;  %1246 = vst.msk [vmem:[#allocation2] sm:$0x1] %vm642_vm1, %v4398_v45  ;;  %1249 = vst.msk [vmem:[#allocation2 + $0x3] sm:$0x1] %vm642_vm1, %v4409_v53 }
 0x178   : > { %1247 = vst.msk [vmem:[#allocation2 - $0x1] sm:$0x4] %vm644_vm2, %v4398_v45  ;;  %1250 = vst.msk [vmem:[#allocation2 + $0x2] sm:$0x4] %vm644_vm2, %v4409_v53  ;;  %v1182_v42 = vpack.c.bf16 %v1181_v39, %v1180_v38 }
 0x179   : > { %1248 = vst.msk [vmem:[#allocation2 - $0x2] sm:$0x10] %vm646_vm3, %v4398_v45  ;;  %1251 = vst.msk [vmem:[#allocation2 + $0x1] sm:$0x10] %vm646_vm3, %v4409_v53 }
 0x17a   : > { %1252 = vst.msk [vmem:[#allocation2 + $0x6] sm:$0x1] %vm642_vm1, %v4626_v37  ;;  %3747 = vmatmul.mubr.msk.bf16.vlgmr.msra.gmra.mrb[16].mxu0 %vm693_vm8, %v1182_v42 }
 0x17b   : > { %1253 = vst.msk [vmem:[#allocation2 + $0x5] sm:$0x4] %vm644_vm2, %v4626_v37  ;;  %3759 = vmatpush3.bf16.msra.mxu0 %v4011_v43  ;;  %3762 = vmatprep.mubr.msk.bf16.mxu0 %vm4182_vm0, %v4181_v25 }
 0x17c   : > { %1254 = vst.msk [vmem:[#allocation2 + $0x4] sm:$0x10] %vm646_vm3, %v4626_v37  ;;  %3760 = vmatprep.subr.bf16.mxu0 %v4181_v25 }
 0x17f   : > { %3761 = vmatpush3.bf16.msra.mxu0 %v4012_v46 }
 0x180   : > { %3774 = vmatprep.subr.bf16.mxu0 %v4181_v25 }
 0x182   : > { %v1255_v47 = vld [vmem:[#allocation2] sm:$0xff] }
 0x183   : > { %v1256_v48 = vld [vmem:[#allocation2 + $0x8] sm:$0x1]  ;;  %1321 = vst.msk [vmem:[#allocation2 - $0x1] sm:$0x2] %vm661_vm4, %v4398_v45  ;;  %1324 = vst.msk [vmem:[#allocation2 + $0x2] sm:$0x2] %vm661_vm4, %v4409_v53 }
 0x184   : > { %1322 = vst.msk [vmem:[#allocation2 - $0x2] sm:$0x8] %vm663_vm5, %v4398_v45  ;;  %1325 = vst.msk [vmem:[#allocation2 + $0x1] sm:$0x8] %vm663_vm5, %v4409_v53  ;;  %v1257_v50 = vpack.c.bf16 %v1256_v48, %v1255_v47 }
 0x185   : > { %1323 = vst.msk [vmem:[#allocation2 - $0x3] sm:$0x20] %vm665_vm6, %v4398_v45  ;;  %1326 = vst.msk [vmem:[#allocation2] sm:$0x20] %vm665_vm6, %v4409_v53 }
 0x186   : > { %1327 = vst.msk [vmem:[#allocation2 + $0x5] sm:$0x2] %vm661_vm4, %v4626_v37  ;;  %3755 = vmatmul.mubr.msk.bf16.vlgmr.msra.gmra.mrb[28].mxu1 %vm693_vm8, %v1257_v50 }
 0x187   : > { %1328 = vst.msk [vmem:[#allocation2 + $0x4] sm:$0x8] %vm663_vm5, %v4626_v37  ;;  %3767 = vmatpush3.bf16.msra.mxu1 %v4013_v49  ;;  %3770 = vmatprep.mubr.msk.bf16.mxu1 %vm4182_vm0, %v4181_v25 }
 0x188   : > { %1329 = vst.msk [vmem:[#allocation2 + $0x3] sm:$0x20] %vm665_vm6, %v4626_v37  ;;  %3768 = vmatprep.subr.bf16.mxu1 %v4181_v25 }
 0x18b   : > { %3769 = vmatpush3.bf16.msra.mxu1 %v4014_v51 }
 0x18c   : > { %3782 = vmatprep.subr.bf16.mxu1 %v4181_v25 }
 0x18e   : > { %v1330_v52 = vld [vmem:[#allocation2] sm:$0xff] }
 0x18f   : > { %v1331_v54 = vld [vmem:[#allocation2 + $0x8] sm:$0x1]  ;;  %1396 = vst.msk [vmem:[#allocation2 - $0x2] sm:$0x4] %vm644_vm2, %v4398_v45  ;;  %1399 = vst.msk [vmem:[#allocation2 + $0x1] sm:$0x4] %vm644_vm2, %v4409_v53 }
 0x190   : > { %1397 = vst.msk [vmem:[#allocation2 - $0x3] sm:$0x10] %vm646_vm3, %v4398_v45  ;;  %1400 = vst.msk [vmem:[#allocation2] sm:$0x10] %vm646_vm3, %v4409_v53  ;;  %v1332_v56 = vpack.c.bf16 %v1331_v54, %v1330_v52 }
 0x191   : > { %1398 = vst.msk [vmem:[#allocation2 - $0x4] sm:$0x40] %vm796_vm7, %v4398_v45  ;;  %1401 = vst.msk [vmem:[#allocation2 - $0x1] sm:$0x40] %vm796_vm7, %v4409_v53 }
 0x192   : > { %1402 = vst.msk [vmem:[#allocation2 + $0x4] sm:$0x4] %vm644_vm2, %v4626_v37  ;;  %3763 = vmatmul.mubr.msk.bf16.vlgmr.msra.gmra.mrb[20].mxu0 %vm693_vm8, %v1332_v56 }
 0x193   : > { %1403 = vst.msk [vmem:[#allocation2 + $0x3] sm:$0x10] %vm646_vm3, %v4626_v37  ;;  %3775 = vmatpush3.bf16.msra.mxu0 %v4015_v55  ;;  %3778 = vmatprep.mubr.msk.bf16.mxu0 %vm4182_vm0, %v4181_v25 }
 0x194   : > { %1404 = vst.msk [vmem:[#allocation2 + $0x2] sm:$0x40] %vm796_vm7, %v4626_v37  ;;  %3776 = vmatprep.subr.bf16.mxu0 %v4181_v25 }
 0x197   : > { %3777 = vmatpush3.bf16.msra.mxu0 %v4016_v57 }
 0x198   : > { %3790 = vmatprep.subr.bf16.mxu0 %v4181_v25 }
 0x19a   : > { %v1405_v58 = vld [vmem:[#allocation2] sm:$0xff] }
 0x19b   : > { %v1406_v59 = vld [vmem:[#allocation2 + $0x8] sm:$0x1]  ;;  %1471 = vst.msk [vmem:[#allocation2 - $0x3] sm:$0x8] %vm663_vm5, %v4398_v45  ;;  %1474 = vst.msk [vmem:[#allocation2] sm:$0x8] %vm663_vm5, %v4409_v53 }
 0x19c   : > { %1472 = vst.msk [vmem:[#allocation2 - $0x4] sm:$0x20] %vm665_vm6, %v4398_v45  ;;  %1475 = vst.msk [vmem:[#allocation2 - $0x1] sm:$0x20] %vm665_vm6, %v4409_v53  ;;  %v1407_v62 = vpack.c.bf16 %v1406_v59, %v1405_v58 }
 0x19d   : > { %1473 = vst.msk [vmem:[#allocation2 - $0x5] sm:$0x80] %vm872_vm9, %v4398_v45  ;;  %1476 = vst.msk [vmem:[#allocation2 - $0x2] sm:$0x80] %vm872_vm9, %v4409_v53  ;;  %v4018_v45 = vld [vmem:[%s5260_s3 + $0xc8] sm:$0xff]   ;;  %v4757_v53 = vmax.f32 %v4421_v61, 0.0 }
 0x19e   : > { %1477 = vst.msk [vmem:[#allocation2 + $0x3] sm:$0x8] %vm663_vm5, %v4626_v37  ;;  %3771 = vmatmul.mubr.msk.bf16.vlgmr.msra.gmra.mrb[32].mxu1 %vm693_vm8, %v1407_v62 }
 0x19f   : > { %1478 = vst.msk [vmem:[#allocation2 + $0x2] sm:$0x20] %vm665_vm6, %v4626_v37  ;;  %3783 = vmatpush3.bf16.msra.mxu1 %v4017_v60  ;;  %3786 = vmatprep.mubr.msk.bf16.mxu1 %vm4182_vm0, %v4181_v25 }
 0x1a0   : > { %1479 = vst.msk [vmem:[#allocation2 + $0x1] sm:$0x80] %vm872_vm9, %v4626_v37  ;;  %3784 = vmatprep.subr.bf16.mxu1 %v4181_v25 }
 0x1a3   : > { %3785 = vmatpush3.bf16.msra.mxu1 %v4018_v45 }
 0x1a4   : > { %3798 = vmatprep.subr.bf16.mxu1 %v4181_v25 }
 0x1a6   : > { %v1480_v63 = vld [vmem:[#allocation2] sm:$0xff] }
 0x1a7   : > { %v1481_v0 = vld [vmem:[#allocation2 + $0x8] sm:$0x1]  ;;  %1546 = vst.msk [vmem:[#allocation2] sm:$0x1] %vm642_vm1, %v4506_v14  ;;  %1549 = vst.msk [vmem:[#allocation2 + $0x3] sm:$0x1] %vm642_vm1, %v4508_v15 }
 0x1a8   : > { %1547 = vst.msk [vmem:[#allocation2 - $0x1] sm:$0x4] %vm644_vm2, %v4506_v14  ;;  %1550 = vst.msk [vmem:[#allocation2 + $0x2] sm:$0x4] %vm644_vm2, %v4508_v15  ;;  %v1482_v61 = vpack.c.bf16 %v1481_v0, %v1480_v63 }
 0x1a9   : > { %1548 = vst.msk [vmem:[#allocation2 - $0x2] sm:$0x10] %vm646_vm3, %v4506_v14  ;;  %1551 = vst.msk [vmem:[#allocation2 + $0x1] sm:$0x10] %vm646_vm3, %v4508_v15 }
 0x1aa   : > { %1552 = vst.msk [vmem:[#allocation2 + $0x6] sm:$0x1] %vm642_vm1, %v4757_v53  ;;  %3779 = vmatmul.mubr.msk.bf16.vlgmr.msra.gmra.mrb[24].mxu0 %vm693_vm8, %v1482_v61 }
 0x1ab   : > { %1553 = vst.msk [vmem:[#allocation2 + $0x5] sm:$0x4] %vm644_vm2, %v4757_v53  ;;  %3791 = vmatpush3.bf16.msra.mxu0 %v4019_v1  ;;  %3794 = vmatprep.mubr.msk.bf16.mxu0 %vm4182_vm0, %v4181_v25 }
 0x1ac   : > { %1554 = vst.msk [vmem:[#allocation2 + $0x4] sm:$0x10] %vm646_vm3, %v4757_v53  ;;  %3792 = vmatprep.subr.bf16.mxu0 %v4181_v25 }
 0x1af   : > { %3793 = vmatpush3.bf16.msra.mxu0 %v4020_v2 }
 0x1b0   : > { %3806 = vmatprep.subr.bf16.mxu0 %v4181_v25 }
 0x1b2   : > { %v1555_v3 = vld [vmem:[#allocation2] sm:$0xff] }
 0x1b3   : > { %v1556_v4 = vld [vmem:[#allocation2 + $0x8] sm:$0x1]  ;;  %1621 = vst.msk [vmem:[#allocation2 - $0x1] sm:$0x2] %vm661_vm4, %v4506_v14  ;;  %1624 = vst.msk [vmem:[#allocation2 + $0x2] sm:$0x2] %vm661_vm4, %v4508_v15 }
 0x1b4   : > { %1622 = vst.msk [vmem:[#allocation2 - $0x2] sm:$0x8] %vm663_vm5, %v4506_v14  ;;  %1625 = vst.msk [vmem:[#allocation2 + $0x1] sm:$0x8] %vm663_vm5, %v4508_v15  ;;  %v1557_v6 = vpack.c.bf16 %v1556_v4, %v1555_v3 }
 0x1b5   : > { %1623 = vst.msk [vmem:[#allocation2 - $0x3] sm:$0x20] %vm665_vm6, %v4506_v14  ;;  %1626 = vst.msk [vmem:[#allocation2] sm:$0x20] %vm665_vm6, %v4508_v15 }
 0x1b6   : > { %1627 = vst.msk [vmem:[#allocation2 + $0x5] sm:$0x2] %vm661_vm4, %v4757_v53  ;;  %3787 = vmatmul.mubr.msk.bf16.vlgmr.msra.gmra.mrb[36].mxu1 %vm693_vm8, %v1557_v6 }
 0x1b7   : > { %1628 = vst.msk [vmem:[#allocation2 + $0x4] sm:$0x8] %vm663_vm5, %v4757_v53  ;;  %3799 = vmatpush3.bf16.msra.mxu1 %v4021_v5  ;;  %3802 = vmatprep.mubr.msk.bf16.mxu1 %vm4182_vm0, %v4181_v25 }
 0x1b8   : > { %1629 = vst.msk [vmem:[#allocation2 + $0x3] sm:$0x20] %vm665_vm6, %v4757_v53  ;;  %3800 = vmatprep.subr.bf16.mxu1 %v4181_v25 }
 0x1bb   : > { %3801 = vmatpush3.bf16.msra.mxu1 %v4022_v7 }
 0x1bc   : > { %3814 = vmatprep.subr.bf16.mxu1 %v4181_v25 }
 0x1be   : > { %v1630_v8 = vld [vmem:[#allocation2] sm:$0xff] }
 0x1bf   : > { %v1631_v9 = vld [vmem:[#allocation2 + $0x8] sm:$0x1]  ;;  %1696 = vst.msk [vmem:[#allocation2 - $0x2] sm:$0x4] %vm644_vm2, %v4506_v14  ;;  %1699 = vst.msk [vmem:[#allocation2 + $0x1] sm:$0x4] %vm644_vm2, %v4508_v15 }
 0x1c0   : > { %v1632_v11 = vpack.c.bf16 %v1631_v9, %v1630_v8  ;;  %1697 = vst.msk [vmem:[#allocation2 - $0x3] sm:$0x10] %vm646_vm3, %v4506_v14  ;;  %1700 = vst.msk [vmem:[#allocation2] sm:$0x10] %vm646_vm3, %v4508_v15 }
 0x1c1   : > { %1698 = vst.msk [vmem:[#allocation2 - $0x4] sm:$0x40] %vm796_vm7, %v4506_v14  ;;  %1701 = vst.msk [vmem:[#allocation2 - $0x1] sm:$0x40] %vm796_vm7, %v4508_v15 }
 0x1c2   : > { %1702 = vst.msk [vmem:[#allocation2 + $0x4] sm:$0x4] %vm644_vm2, %v4757_v53  ;;  %3795 = vmatmul.mubr.msk.bf16.vlgmr.msra.gmra.mrb[28].mxu0 %vm693_vm8, %v1632_v11 }
 0x1c3   : > { %1703 = vst.msk [vmem:[#allocation2 + $0x3] sm:$0x10] %vm646_vm3, %v4757_v53  ;;  %3807 = vmatpush3.bf16.msra.mxu0 %v4023_v10  ;;  %3810 = vmatprep.mubr.msk.bf16.mxu0 %vm4182_vm0, %v4181_v25 }
 0x1c4   : > { %1704 = vst.msk [vmem:[#allocation2 + $0x2] sm:$0x40] %vm796_vm7, %v4757_v53  ;;  %3808 = vmatprep.subr.bf16.mxu0 %v4181_v25 }
 0x1c7   : > { %3809 = vmatpush3.bf16.msra.mxu0 %v4024_v12 }
 0x1c8   : > { %3826 = vmatprep.subr.bf16.mxu0 %v4181_v25 }
 0x1ca   : > { %v1705_v13 = vld [vmem:[#allocation2] sm:$0xff] }
 0x1cb   : > { %v1706_v16 = vld [vmem:[#allocation2 + $0x8] sm:$0x1]  ;;  %1771 = vst.msk [vmem:[#allocation2 - $0x3] sm:$0x8] %vm663_vm5, %v4506_v14  ;;  %1774 = vst.msk [vmem:[#allocation2] sm:$0x8] %vm663_vm5, %v4508_v15 }
 0x1cc   : > { %v1707_v17 = vpack.c.bf16 %v1706_v16, %v1705_v13  ;;  %1772 = vst.msk [vmem:[#allocation2 - $0x4] sm:$0x20] %vm665_vm6, %v4506_v14  ;;  %1775 = vst.msk [vmem:[#allocation2 - $0x1] sm:$0x20] %vm665_vm6, %v4508_v15 }
 0x1cd   : > { %1773 = vst.msk [vmem:[#allocation2 - $0x5] sm:$0x80] %vm872_vm9, %v4506_v14  ;;  %1776 = vst.msk [vmem:[#allocation2 - $0x2] sm:$0x80] %vm872_vm9, %v4508_v15  ;;  %v4025_v15 = vld [vmem:[%s5262_s5] sm:$0xff]  }
 0x1ce   : > { %1777 = vst.msk [vmem:[#allocation2 + $0x3] sm:$0x8] %vm663_vm5, %v4757_v53  ;;  %3803 = vmatmul.mubr.msk.bf16.vlgmr.msra.gmra.mrb[40].mxu1 %vm693_vm8, %v1707_v17 }
 0x1cf   : > { %1778 = vst.msk [vmem:[#allocation2 + $0x2] sm:$0x20] %vm665_vm6, %v4757_v53  ;;  %3822 = vmatprep.mubr.msk.bf16.mxu1 %vm4182_vm0, %v4181_v25  ;;  %3815 = vmatpush3.bf16.msra.mxu1 %v4026_v20 }
 0x1d0   : > { %1779 = vst.msk [vmem:[#allocation2 + $0x1] sm:$0x80] %vm872_vm9, %v4757_v53  ;;  %3816 = vmatprep.subr.bf16.mxu1 %v4181_v25 }
 0x1d3   : > { %3817 = vmatpush3.bf16.msra.mxu1 %v4028_v22 }
 0x1d4   : > { %3818 = vmatprep.subr.bf16.mxu1 %v4181_v25 }
 0x1d6   : > { %v1780_v14 = vld [vmem:[#allocation2] sm:$0xff] }
 0x1d7   : > { %v1781_v18 = vld [vmem:[#allocation2 + $0x8] sm:$0x1]  ;;  %3819 = vmatpush3.bf16.msra.mxu1 %v4030_v24 }
 0x1d8   : > { %v1782_v19 = vpack.c.bf16 %v1781_v18, %v1780_v14  ;;  %3820 = vmatprep.subr.bf16.mxu1 %v4181_v25 }
 0x1da   : > { %3811 = vmatmul.mubr.msk.bf16.vlgmr.msra.gmra.mrb[32].mxu0 %vm693_vm8, %v1782_v19 }
 0x1db   : > { %3834 = vmatprep.mubr.msk.bf16.mxu0 %vm4182_vm0, %v4181_v25  ;;  %3827 = vmatpush3.bf16.msra.mxu0 %v4025_v15 }
 0x1dc   : > { %3828 = vmatprep.subr.bf16.mxu0 %v4181_v25  ;;  %3821 = vmatpush3.bf16.msra.mxu1 %v4032_v27 }
 0x1dd   : > { %3838 = vmatprep.subr.bf16.mxu1 %v4181_v25 }
 0x1df   : > { %3829 = vmatpush3.bf16.msra.mxu0 %v4027_v21 }
 0x1e0   : > { %3830 = vmatprep.subr.bf16.mxu0 %v4181_v25 }
 0x1e3   : > { %3831 = vmatpush3.bf16.msra.mxu0 %v4029_v23 }
 0x1e4   : > { %3832 = vmatprep.subr.bf16.mxu0 %v4181_v25 }
 0x1e7   : > { %3833 = vmatpush3.bf16.msra.mxu0 %v4031_v26 }
 0x1e8   : > { %3850 = vmatprep.subr.bf16.mxu0 %v4181_v25 }
 0x205   : > { %v731_v28 = vpop.f32.mrb[0].mxu1 }
 0x206   : > { %v3692_v29 = vpop.f32.mrb[1].mxu1 }
 0x207   : > { %v734_v30 = vpop.f32.mrb[2].mxu1 }
 0x208   : > { %v3693_v31 = vpop.f32.mrb[3].mxu1 }
 0x20d   : > { %v787_v32 = vpop.f32.mrb[4].mxu1 }
 0x20e   : > { %v788_v33 = vadd.f32 %v787_v32, %v731_v28  ;;  %v3700_v34 = vpop.f32.mrb[5].mxu1 }
 0x20f   : > { %v790_v35 = vpop.f32.mrb[6].mxu1 }
 0x210   : > { %v791_v36 = vadd.f32 %v790_v35, %v734_v30  ;;  %v3701_v37 = vpop.f32.mrb[7].mxu1 }
 0x215   : > { %v861_v38 = vpop.f32.mrb[8].mxu1 }
 0x216   : > { %v868_v39 = vadd.f32 %v861_v38, %v788_v33  ;;  %v3708_v40 = vpop.f32.mrb[9].mxu1 }
 0x217   : > { %v864_v41 = vpop.f32.mrb[10].mxu1 }
 0x218   : > { %v869_v42 = vadd.f32 %v864_v41, %v791_v36  ;;  %v3709_v43 = vpop.f32.mrb[11].mxu1 }
 0x21d   : > { %v937_v44 = vpop.f32.mrb[12].mxu1 }
 0x21e   : > { %v944_v46 = vadd.f32 %v937_v44, %v868_v39  ;;  %v3716_v47 = vpop.f32.mrb[13].mxu1 }
 0x21f   : > { %v940_v48 = vpop.f32.mrb[14].mxu1 }
 0x220   : > { %v945_v49 = vadd.f32 %v940_v48, %v869_v42  ;;  %v3717_v50 = vpop.f32.mrb[15].mxu1 }
 0x229   : > { %v1012_v51 = vpop.f32.mrb[16].mxu1 }
 0x22a   : > { %v1019_v52 = vadd.f32 %v1012_v51, %v944_v46  ;;  %v3724_v54 = vpop.f32.mrb[17].mxu1 }
 0x22b   : > { %v1015_v55 = vpop.f32.mrb[18].mxu1 }
 0x22c   : > { %v1020_v56 = vadd.f32 %v1015_v55, %v945_v49  ;;  %v3725_v57 = vpop.f32.mrb[19].mxu1  ;;  %v3345_v55 = vld [vmem:[%s5261_s4] ss:$0 sm:$0xff] }
 0x235   : > { %v1087_v58 = vpop.f32.mrb[20].mxu1 }
 0x236   : > { %v1094_v59 = vadd.f32 %v1087_v58, %v1019_v52  ;;  %v3732_v60 = vpop.f32.mrb[21].mxu1 }
 0x237   : > { %v1090_v62 = vpop.f32.mrb[22].mxu1 }
 0x238   : > { %v1095_v45 = vadd.f32 %v1090_v62, %v1020_v56  ;;  %v3733_v53 = vpop.f32.mrb[23].mxu1 }
 0x241   : > { %v1162_v63 = vpop.f32.mrb[24].mxu1 }
 0x242   : > { %v1169_v1 = vadd.f32 %v1162_v63, %v1094_v59  ;;  %v3740_v61 = vpop.f32.mrb[25].mxu1 }
 0x243   : > { %v1165_v3 = vpop.f32.mrb[26].mxu1  ;;  %v4034_v61 = vld [vmem:[%s5262_s5 + $0x40] sm:$0xff]  }
 0x244   : > { %v1170_v6 = vadd.f32 %v1165_v3, %v1095_v45  ;;  %v3741_v7 = vpop.f32.mrb[27].mxu1  ;;  %v4035_v3 = vld [vmem:[%s5262_s5 + $0x68] sm:$0xff]  }
 0x245   : > { %v4039_v7 = vld [vmem:[%s5262_s5 + $0x78] sm:$0xff]  }
 0x24d   : > { %v1237_v0 = vpop.f32.mrb[16].mxu0 }
 0x24e   : > { %v3748_v2 = vpop.f32.mrb[17].mxu0  ;;  %v1244_v5 = vadd.f32 %v1237_v0, %v1169_v1  ;;  %v4033_v0 = vld [vmem:[%s5262_s5 + $0x60] sm:$0xff]  }
 0x24f   : > { %v1240_v4 = vpop.f32.mrb[18].mxu0 }
 0x250   : > { %v3749_v8 = vpop.f32.mrb[19].mxu0  ;;  %v1245_v9 = vadd.f32 %v1240_v4, %v1170_v6  ;;  %v4036_v4 = vld [vmem:[%s5262_s5 + $0x48] sm:$0xff]   ;;  %v4038_v6 = vld [vmem:[%s5262_s5 + $0x50] sm:$0xff]  }
 0x251   : > { %v4040_v8 = vld [vmem:[%s5262_s5 + $0x58] sm:$0xff]  }
 0x259   : > { %v1312_v10 = vpop.f32.mrb[28].mxu1 }
 0x25a   : > { %v1319_v11 = vadd.f32 %v1312_v10, %v1244_v5  ;;  %v3756_v12 = vpop.f32.mrb[29].mxu1  ;;  %v4037_v5 = vld [vmem:[%s5262_s5 + $0x70] sm:$0xff]  }
 0x25b   : > { %v1315_v13 = vpop.f32.mrb[30].mxu1 }
 0x25c   : > { %v1320_v16 = vadd.f32 %v1315_v13, %v1245_v9  ;;  %v3757_v17 = vpop.f32.mrb[31].mxu1  ;;  %v4041_v9 = vld [vmem:[%s5262_s5 + $0xa0] sm:$0xff]   ;;  %v4043_v13 = vld [vmem:[%s5262_s5 + $0xa8] sm:$0xff]  }
 0x25d   : > { %v4045_v17 = vld [vmem:[%s5262_s5 + $0xb0] sm:$0xff]  }
 0x265   : > { %v1387_v14 = vpop.f32.mrb[20].mxu0 }
 0x266   : > { %v1394_v18 = vadd.f32 %v1387_v14, %v1319_v11  ;;  %v3764_v19 = vpop.f32.mrb[21].mxu0  ;;  %v4042_v11 = vld [vmem:[%s5262_s5 + $0x80] sm:$0xff]   ;;  %v4046_v14 = vld [vmem:[%s5262_s5 + $0x90] sm:$0xff]  }
 0x267   : > { %v1390_v15 = vpop.f32.mrb[22].mxu0  ;;  %v4048_v19 = vld [vmem:[%s5262_s5 + $0x98] sm:$0xff]  }
 0x268   : > { %v1395_v20 = vadd.f32 %v1390_v15, %v1320_v16  ;;  %v3765_v21 = vpop.f32.mrb[23].mxu0  ;;  %v4044_v16 = vld [vmem:[%s5262_s5 + $0x88] sm:$0xff]   ;;  %v4049_v15 = vld [vmem:[%s5262_s5 + $0xe0] sm:$0xff]  }
 0x269   : > { %v4050_v21 = vld [vmem:[%s5262_s5 + $0xc0] sm:$0xff]  }
 0x271   : > { %v1462_v22 = vpop.f32.mrb[32].mxu1 }
 0x272   : > { %v1469_v23 = vadd.f32 %v1462_v22, %v1394_v18  ;;  %v3772_v24 = vpop.f32.mrb[33].mxu1  ;;  %v4047_v18 = vld [vmem:[%s5262_s5 + $0xb8] sm:$0xff]  }
 0x273   : > { %v1465_v26 = vpop.f32.mrb[34].mxu1  ;;  %v4052_v24 = vld [vmem:[%s5262_s5 + $0xc8] sm:$0xff]  }
 0x274   : > { %v1470_v27 = vadd.f32 %v1465_v26, %v1395_v20  ;;  %v3773_v28 = vpop.f32.mrb[35].mxu1  ;;  %v4053_v26 = vld [vmem:[%s5262_s5 + $0xf0] sm:$0xff]  }
 0x275   : > { %v4055_v28 = vld [vmem:[%s5262_s5 + $0xf8] sm:$0xff]  }
 0x27d   : > { %v1537_v29 = vpop.f32.mrb[24].mxu0 }
 0x27e   : > { %v1544_v30 = vadd.f32 %v1537_v29, %v1469_v23  ;;  %v3780_v31 = vpop.f32.mrb[25].mxu0  ;;  %v4051_v23 = vld [vmem:[%s5262_s5 + $0xe8] sm:$0xff]   ;;  %v4056_v29 = vld [vmem:[%s5262_s5 + $0xd8] sm:$0xff]  }
 0x27f   : > { %v1540_v32 = vpop.f32.mrb[26].mxu0  ;;  %v4057_v31 = vld [vmem:[%s5262_s5 + $0x100] sm:$0xff]  }
 0x280   : > { %v1545_v33 = vadd.f32 %v1540_v32, %v1470_v27  ;;  %v3781_v34 = vpop.f32.mrb[27].mxu0  ;;  %v4054_v27 = vld [vmem:[%s5262_s5 + $0xd0] sm:$0xff]  }
 0x281   : > { %v4059_v34 = vld [vmem:[%s5262_s5 + $0x110] sm:$0xff]  }
 0x289   : > { %v1612_v35 = vpop.f32.mrb[36].mxu1 }
 0x28a   : > { %v1619_v36 = vadd.f32 %v1612_v35, %v1544_v30  ;;  %v3788_v37 = vpop.f32.mrb[37].mxu1  ;;  %v4060_v35 = vld [vmem:[%s5262_s5 + $0x118] sm:$0xff]  }
 0x28b   : > { %v1615_v38 = vpop.f32.mrb[38].mxu1 }
 0x28c   : > { %v1620_v39 = vadd.f32 %v1615_v38, %v1545_v33  ;;  %v3789_v40 = vpop.f32.mrb[39].mxu1  ;;  %v4058_v33 = vld [vmem:[%s5262_s5 + $0x108] sm:$0xff]   ;;  %v4061_v38 = vld [vmem:[%s5264_s7] ss:$16 sps:$4 sm:$0xff]  }
 0x28d   : > { %v4064_v40 = vld [vmem:[%s5264_s7 + $0x8] ss:$16 sps:$4 sm:$0xff]  }
 0x295   : > { %v1687_v41 = vpop.f32.mrb[28].mxu0 }
 0x296   : > { %v1694_v42 = vadd.f32 %v1687_v41, %v1619_v36  ;;  %v3796_v43 = vpop.f32.mrb[29].mxu0  ;;  %v4069_v41 = vld [vmem:[%s5264_s7 + $0x24] ss:$16 sps:$4 sm:$0xff]  }
 0x297   : > { %v1690_v44 = vpop.f32.mrb[30].mxu0  ;;  %v4067_v43 = vld [vmem:[%s5264_s7 + $0x20] ss:$16 sps:$4 sm:$0xff]  }
 0x298   : > { %v1695_v46 = vadd.f32 %v1690_v44, %v1620_v39  ;;  %v3797_v47 = vpop.f32.mrb[31].mxu0  ;;  %v4063_v39 = vld [vmem:[%s5264_s7 + $0x4] ss:$16 sps:$4 sm:$0xff]   ;;  %v4070_v44 = vld [vmem:[%s5264_s7 + $0x28] ss:$16 sps:$4 sm:$0xff]  }
 0x299   : > { %v4078_v47 = vld [vmem:[%s5264_s7 + $0x4c] ss:$16 sps:$4 sm:$0xff]  }
 0x2a1   : > { %v1762_v48 = vpop.f32.mrb[40].mxu1 }
 0x2a2   : > { %v1769_v49 = vadd.f32 %v1762_v48, %v1694_v42  ;;  %v3804_v50 = vpop.f32.mrb[41].mxu1  ;;  %v4072_v42 = vld [vmem:[%s5264_s7 + $0x2c] ss:$16 sps:$4 sm:$0xff]   ;;  %v4073_v48 = vld [vmem:[%s5264_s7 + $0x40] ss:$16 sps:$4 sm:$0xff]  }
 0x2a3   : > { %v1765_v51 = vpop.f32.mrb[42].mxu1  ;;  %v4081_v50 = vld [vmem:[%s5264_s7 + $0x64] ss:$16 sps:$4 sm:$0xff]  }
 0x2a4   : > { %v1770_v52 = vadd.f32 %v1765_v51, %v1695_v46  ;;  %v3805_v54 = vpop.f32.mrb[43].mxu1  ;;  %v4075_v46 = vld [vmem:[%s5264_s7 + $0x44] ss:$16 sps:$4 sm:$0xff]   ;;  %v4084_v51 = vld [vmem:[%s5264_s7 + $0x6c] ss:$16 sps:$4 sm:$0xff]  }
 0x2a5   : > { %v4082_v54 = vld [vmem:[%s5264_s7 + $0x68] ss:$16 sps:$4 sm:$0xff]  }
 0x2ad   : > { %v1837_v56 = vpop.f32.mrb[32].mxu0 }
 0x2ae   : > { %v1844_v57 = vadd.f32 %v1837_v56, %v1769_v49  ;;  %v3812_v58 = vpop.f32.mrb[33].mxu0  ;;  %v4076_v49 = vld [vmem:[%s5264_s7 + $0x48] ss:$16 sps:$4 sm:$0xff]   ;;  %v4085_v56 = vld [vmem:[%s5266_s9 + $0x40] sm:$0xff]  }
 0x2af   : > { %v1840_v59 = vpop.f32.mrb[34].mxu0 }
 0x2b0   : > { %v1852_v60 = vadd.f32 %v3345_v55, %v1844_v57  ;;  %v1845_v62 = vadd.f32 %v1840_v59, %v1770_v52  ;;  %v3813_v45 = vpop.f32.mrb[35].mxu0  ;;  %v4079_v52 = vld [vmem:[%s5264_s7 + $0x60] ss:$16 sps:$4 sm:$0xff]  }
 0x2b1   : > { %v4086_v57 = vld [vmem:[%s5266_s9 + $0xc0] sm:$0xff]  }
 0x2b2   : > { %v1854_v53 = vmax.f32 %v1852_v60, 0.0  ;;  %v4906_v63 = vadd.f32 %v3345_v55, %v1845_v62  ;;  %v4183_v55 = vmov 0  }
 0x2b4   : > { %v4911_v1 = vpack.c.bf16 %v1854_v53, %v1854_v53  ;;  %v1855_v36 = vmax.f32 %v4906_v63, 0.0 }
 0x2b6   : > { %3835 = vmatmul.mubr.msk.bf16.vlgmr.msra.gmra.mrb[36].mxu0 %vm1902_vm10, %v4911_v1  ;;  %v4919_v2 = vshrl.u32 %v4911_v1, 16  ;;  %v2022_v12 = vrot.slane %v4911_v1, 1  ;;  %v2178_v22 = vrot.slane %v4911_v1, 2  ;;  %v2334_v32 = vrot.slane %v4911_v1, 3 }
 0x2b7   : > { %3851 = vmatpush3.bf16.msra.mxu0 %v4033_v0  ;;  %3858 = vmatprep.mubr.msk.bf16.mxu0 %vm4182_vm0, %v4181_v25  ;;  %v2481_v37 = vpack.c.bf16 %v1855_v36, %v1855_v36 }
 0x2b8   : > { %3823 = vmatmul.mubr.msk.bf16.vlgmr.msra.gmra.mrb[44].mxu1 %vm1902_vm10, %v4919_v2  ;;  %3852 = vmatprep.subr.bf16.mxu0 %v4181_v25  ;;  %v2100_v10 = vrot.slane %v4919_v2, 1  ;;  %v2256_v20 = vrot.slane %v4919_v2, 2  ;;  %v2412_v30 = vrot.slane %v4919_v2, 3 }
 0x2b9   : > { %3839 = vmatpush3.bf16.msra.mxu1 %v4034_v61  ;;  %3846 = vmatprep.mubr.msk.bf16.mxu1 %vm4182_vm0, %v4181_v25 }
 0x2ba   : > { %3840 = vmatprep.subr.bf16.mxu1 %v4181_v25 }
 0x2bb   : > { %3853 = vmatpush3.bf16.msra.mxu0 %v4035_v3 }
 0x2bc   : > { %3854 = vmatprep.subr.bf16.mxu0 %v4181_v25 }
 0x2bd   : > { %3841 = vmatpush3.bf16.msra.mxu1 %v4036_v4 }
 0x2be   : > { %3842 = vmatprep.subr.bf16.mxu1 %v4181_v25 }
 0x2bf   : > { %3855 = vmatpush3.bf16.msra.mxu0 %v4037_v5 }
 0x2c0   : > { %3856 = vmatprep.subr.bf16.mxu0 %v4181_v25 }
 0x2c1   : > { %3843 = vmatpush3.bf16.msra.mxu1 %v4038_v6 }
 0x2c2   : > { %3844 = vmatprep.subr.bf16.mxu1 %v4181_v25 }
 0x2c3   : > { %3857 = vmatpush3.bf16.msra.mxu0 %v4039_v7 }
 0x2c4   : > { %3874 = vmatprep.subr.bf16.mxu0 %v4181_v25 }
 0x2c5   : > { %3845 = vmatpush3.bf16.msra.mxu1 %v4040_v8 }
 0x2c6   : > { %3859 = vmatmul.mubr.msk.bf16.vlgmr.msra.gmra.mrb[40].mxu0 %vm1902_vm10, %v2100_v10  ;;  %3862 = vmatprep.subr.bf16.mxu1 %v4181_v25 }
 0x2c7   : > { %3875 = vmatpush3.bf16.msra.mxu0 %v4041_v9  ;;  %3882 = vmatprep.mubr.msk.bf16.mxu0 %vm4182_vm0, %v4181_v25 }
 0x2c8   : > { %3847 = vmatmul.mubr.msk.bf16.vlgmr.msra.gmra.mrb[48].mxu1 %vm1902_vm10, %v2022_v12  ;;  %3876 = vmatprep.subr.bf16.mxu0 %v4181_v25 }
 0x2c9   : > { %3863 = vmatpush3.bf16.msra.mxu1 %v4042_v11  ;;  %3870 = vmatprep.mubr.msk.bf16.mxu1 %vm4182_vm0, %v4181_v25 }
 0x2ca   : > { %3864 = vmatprep.subr.bf16.mxu1 %v4181_v25 }
 0x2cb   : > { %3877 = vmatpush3.bf16.msra.mxu0 %v4043_v13 }
 0x2cc   : > { %3878 = vmatprep.subr.bf16.mxu0 %v4181_v25 }
 0x2cd   : > { %3865 = vmatpush3.bf16.msra.mxu1 %v4044_v16 }
 0x2ce   : > { %3866 = vmatprep.subr.bf16.mxu1 %v4181_v25 }
 0x2cf   : > { %3879 = vmatpush3.bf16.msra.mxu0 %v4045_v17 }
 0x2d0   : > { %3880 = vmatprep.subr.bf16.mxu0 %v4181_v25 }
 0x2d1   : > { %3867 = vmatpush3.bf16.msra.mxu1 %v4046_v14 }
 0x2d2   : > { %3868 = vmatprep.subr.bf16.mxu1 %v4181_v25 }
 0x2d3   : > { %3881 = vmatpush3.bf16.msra.mxu0 %v4047_v18 }
 0x2d4   : > { %3898 = vmatprep.subr.bf16.mxu0 %v4181_v25 }
 0x2d5   : > { %3869 = vmatpush3.bf16.msra.mxu1 %v4048_v19 }
 0x2d6   : > { %3883 = vmatmul.mubr.msk.bf16.vlgmr.msra.gmra.mrb[44].mxu0 %vm1902_vm10, %v2256_v20  ;;  %3886 = vmatprep.subr.bf16.mxu1 %v4181_v25 }
 0x2d7   : > { %3899 = vmatpush3.bf16.msra.mxu0 %v4049_v15  ;;  %3906 = vmatprep.mubr.msk.bf16.mxu0 %vm4182_vm0, %v4181_v25 }
 0x2d8   : > { %3871 = vmatmul.mubr.msk.bf16.vlgmr.msra.gmra.mrb[52].mxu1 %vm1902_vm10, %v2178_v22  ;;  %3900 = vmatprep.subr.bf16.mxu0 %v4181_v25 }
 0x2d9   : > { %3887 = vmatpush3.bf16.msra.mxu1 %v4050_v21  ;;  %3894 = vmatprep.mubr.msk.bf16.mxu1 %vm4182_vm0, %v4181_v25 }
 0x2da   : > { %3888 = vmatprep.subr.bf16.mxu1 %v4181_v25 }
 0x2db   : > { %3901 = vmatpush3.bf16.msra.mxu0 %v4051_v23 }
 0x2dc   : > { %3902 = vmatprep.subr.bf16.mxu0 %v4181_v25 }
 0x2dd   : > { %3889 = vmatpush3.bf16.msra.mxu1 %v4052_v24 }
 0x2de   : > { %3890 = vmatprep.subr.bf16.mxu1 %v4181_v25 }
 0x2df   : > { %3903 = vmatpush3.bf16.msra.mxu0 %v4053_v26 }
 0x2e0   : > { %3904 = vmatprep.subr.bf16.mxu0 %v4181_v25 }
 0x2e1   : > { %3891 = vmatpush3.bf16.msra.mxu1 %v4054_v27 }
 0x2e2   : > { %3892 = vmatprep.subr.bf16.mxu1 %v4181_v25 }
 0x2e3   : > { %3905 = vmatpush3.bf16.msra.mxu0 %v4055_v28 }
 0x2e4   : > { %2662 = vmatprep.subr.bf16.mxu0 %v4063_v39 }
 0x2e5   : > { %3893 = vmatpush3.bf16.msra.mxu1 %v4056_v29 }
 0x2e6   : > { %3907 = vmatmul.mubr.msk.bf16.vlgmr.msra.gmra.mrb[48].mxu0 %vm1902_vm10, %v2412_v30  ;;  %3910 = vmatprep.subr.bf16.mxu1 %v4181_v25 }
 0x2e7   : > { %2663 = vmatpush1.bf16.msra.mxu0 %v4061_v38  ;;  %2694 = vmatprep.mubr.bf16.mxu0 %v4183_v55 }
 0x2e8   : > { %3895 = vmatmul.mubr.msk.bf16.vlgmr.msra.gmra.mrb[56].mxu1 %vm1902_vm10, %v2334_v32  ;;  %2664 = vmatprep.subr.bf16.mxu0 %v4069_v41  ;;  %v1856_v32 = vld [vmem:[%s5263_s6] sm:$0x1] }
 0x2e9   : > { %3911 = vmatpush3.bf16.msra.mxu1 %v4057_v31  ;;  %3918 = vmatprep.mubr.msk.bf16.mxu1 %vm4182_vm0, %v4181_v25 }
 0x2ea   : > { %3912 = vmatprep.subr.bf16.mxu1 %v4181_v25 }
 0x2eb   : > { %2665 = vmatpush1.bf16.msra.mxu0 %v4067_v43  ;;  %v4090_v43 = vld [vmem:[%s5266_s9 + $0xc8] sm:$0xff]  }
 0x2ec   : > { %2666 = vmatprep.subr.bf16.mxu0 %v4075_v46  ;;  %v4092_v46 = vld [vmem:[%s5266_s9 + $0x88] sm:$0xff]  }
 0x2ed   : > { %3913 = vmatpush3.bf16.msra.mxu1 %v4058_v33 }
 0x2ee   : > { %3914 = vmatprep.subr.bf16.mxu1 %v4181_v25 }
 0x2ef   : > { %2667 = vmatpush1.bf16.msra.mxu0 %v4073_v48  ;;  %v4094_v48 = vld [vmem:[%s5266_s9 + $0xd0] sm:$0xff]  }
 0x2f0   : > { %2668 = vmatprep.subr.bf16.mxu0 %v4081_v50  ;;  %v4096_v50 = vld [vmem:[%s5266_s9 + $0x90] sm:$0xff]  }
 0x2f1   : > { %3915 = vmatpush3.bf16.msra.mxu1 %v4059_v34 }
 0x2f2   : > { %3916 = vmatprep.subr.bf16.mxu1 %v4181_v25  ;;  %v4066_v25 = vld [vmem:[%s5264_s7 + $0xc] ss:$16 sps:$4 sm:$0xff]  }
 0x2f3   : > { %2669 = vmatpush1.bf16.msra.mxu0 %v4079_v52  ;;  %v4098_v52 = vld [vmem:[%s5266_s9 + $0xd8] sm:$0xff]  }
 0x2f4   : > { %3642 = vmatprep.subr.bf16.mxu0 %v4085_v56  ;;  %v4101_v56 = vld [vmem:[%s5266_s9 + $0x60] sm:$0xff]  }
 0x2f5   : > { %3917 = vmatpush3.bf16.msra.mxu1 %v4060_v35 }
 0x2f6   : > { %2703 = vmatprep.subr.bf16.mxu1 %v4066_v25  ;;  %v4088_v25 = vld [vmem:[%s5266_s9 + $0x80] sm:$0xff]  }
 0x2f8   : > { %3919 = vmatmul.mubr.msk.bf16.vlgmr.msra.gmra.mrb[60].mxu1 %vm1902_vm10, %v2481_v37 }
 0x2f9   : > { %2704 = vmatpush1.bf16.msra.mxu1 %v4064_v40  ;;  %2735 = vmatprep.mubr.bf16.mxu1 %v4183_v55  ;;  %v4087_v40 = vld [vmem:[%s5266_s9] sm:$0xff]   ;;  %v4100_v55 = vld [vmem:[%s5266_s9 + $0x98] sm:$0xff]  }
 0x2fa   : > { %2705 = vmatprep.subr.bf16.mxu1 %v4072_v42  ;;  %v4089_v42 = vld [vmem:[%s5266_s9 + $0x48] sm:$0xff]  }
 0x2fd   : > { %2706 = vmatpush1.bf16.msra.mxu1 %v4070_v44  ;;  %v4091_v44 = vld [vmem:[%s5266_s9 + $0x8] sm:$0xff]  }
 0x2fe   : > { %2707 = vmatprep.subr.bf16.mxu1 %v4078_v47  ;;  %v4093_v47 = vld [vmem:[%s5266_s9 + $0x50] sm:$0xff]  }
 0x301   : > { %2708 = vmatpush1.bf16.msra.mxu1 %v4076_v49  ;;  %v4095_v49 = vld [vmem:[%s5266_s9 + $0x10] sm:$0xff]  }
 0x302   : > { %2709 = vmatprep.subr.bf16.mxu1 %v4084_v51  ;;  %v4097_v51 = vld [vmem:[%s5266_s9 + $0x58] sm:$0xff]  }
 0x305   : > { %2710 = vmatpush1.bf16.msra.mxu1 %v4082_v54  ;;  %v4099_v54 = vld [vmem:[%s5266_s9 + $0x18] sm:$0xff]  }
 0x306   : > { %3664 = vmatprep.subr.bf16.mxu1 %v4086_v57  ;;  %v4102_v57 = vld [vmem:[%s5266_s9 + $0xe0] sm:$0xff]  }
 0x389   : > { %v2006_v58 = vpop.f32.mrb[36].mxu0 }
 0x38a   : > { %v3836_v59 = vpop.f32.mrb[37].mxu0 }
 0x38b   : > { %v1940_v60 = vpop.f32.mrb[44].mxu1  ;;  %v2009_v62 = vpop.f32.mrb[38].mxu0  ;;  %v4104_v59 = vld [vmem:[%s5266_s9 + $0xa0] sm:$0xff]  }
 0x38c   : > { %v2007_v45 = vadd.f32 %v2006_v58, %v1940_v60  ;;  %v3824_v53 = vpop.f32.mrb[45].mxu1  ;;  %v3837_v63 = vpop.f32.mrb[39].mxu0  ;;  %v4103_v58 = vld [vmem:[%s5266_s9 + $0x20] sm:$0xff]   ;;  %v4105_v60 = vld [vmem:[%s5266_s9 + $0x68] sm:$0xff]  }
 0x38d   : > { %v1943_v0 = vpop.f32.mrb[46].mxu1  ;;  %v4106_v62 = vld [vmem:[%s5266_s9 + $0xe8] sm:$0xff]   ;;  %v4109_v63 = vld [vmem:[%s5266_s9 + $0x70] sm:$0xff]  }
 0x38e   : > { %v3825_v1 = vpop.f32.mrb[47].mxu1  ;;  %v4108_v53 = vld [vmem:[%s5266_s9 + $0xa8] sm:$0xff]   ;;  %v4110_v0 = vld [vmem:[%s5266_s9 + $0xf0] sm:$0xff]  }
 0x38f   : > { %v4111_v1 = vld [vmem:[%s5266_s9 + $0x30] sm:$0xff]  }
 0x399   : > { %v2162_v61 = vpop.f32.mrb[40].mxu0 }
 0x39a   : > { %v3860_v2 = vpop.f32.mrb[41].mxu0 }
 0x39b   : > { %v2084_v3 = vpop.f32.mrb[48].mxu1  ;;  %v2165_v4 = vpop.f32.mrb[42].mxu0  ;;  %v4113_v2 = vld [vmem:[%s5266_s9 + $0x78] sm:$0xff]  }
 0x39c   : > { %v2090_v5 = vadd.f32 %v2084_v3, %v2007_v45  ;;  %v3848_v6 = vpop.f32.mrb[49].mxu1  ;;  %v3861_v7 = vpop.f32.mrb[43].mxu0  ;;  %v4107_v45 = vld [vmem:[%s5266_s9 + $0x28] sm:$0xff]   ;;  %v4114_v3 = vld [vmem:[%s5266_s9 + $0xf8] sm:$0xff]  }
 0x39d   : > { %v2087_v8 = vpop.f32.mrb[50].mxu1  ;;  %v4115_v4 = vld [vmem:[%s5266_s9 + $0x38] sm:$0xff]   ;;  %v4184_v6 = vmov 1966171168  }
 0x39e   : > { %v3849_v9 = vpop.f32.mrb[51].mxu1  ;;  %v2168_v10 = vadd.f32 %v2162_v61, %v2090_v5  ;;  %v4112_v61 = vld [vmem:[%s5266_s9 + $0xb0] sm:$0xff]   ;;  %v4116_v5 = vld [vmem:[%s5266_s9 + $0xb8] sm:$0xff]   ;;  %v2751_v7 = vunpack.c.l.s4 %v4184_v6  ;;  %v2753_v8 = vlaneseq }
 0x3a0   : > { %v2752_v9 = vunpack.c.0.s8 %v2751_v7 }
 0x3a9   : > { %v2318_v11 = vpop.f32.mrb[44].mxu0 }
 0x3aa   : > { %v3884_v12 = vpop.f32.mrb[45].mxu0 }
 0x3ab   : > { %v2240_v13 = vpop.f32.mrb[52].mxu1  ;;  %v2321_v16 = vpop.f32.mrb[46].mxu0 }
 0x3ac   : > { %v2246_v17 = vadd.f32 %v2240_v13, %v2168_v10  ;;  %v3872_v14 = vpop.f32.mrb[53].mxu1  ;;  %v3885_v18 = vpop.f32.mrb[47].mxu0  ;;  %v2754_v10 = vshrl.u32 %v2753_v8, 7 }
 0x3ad   : > { %v2243_v19 = vpop.f32.mrb[54].mxu1 }
 0x3ae   : > { %v3873_v15 = vpop.f32.mrb[55].mxu1  ;;  %v2324_v20 = vadd.f32 %v2318_v11, %v2246_v17  ;;  %v2755_v13 = vsub.s32 %v2752_v9, %v2754_v10 }
 0x3b9   : > { %v2474_v21 = vpop.f32.mrb[48].mxu0 }
 0x3ba   : > { %v3908_v22 = vpop.f32.mrb[49].mxu0 }
 0x3bb   : > { %v2396_v23 = vpop.f32.mrb[56].mxu1  ;;  %v2477_v24 = vpop.f32.mrb[50].mxu0 }
 0x3bc   : > { %v2402_v26 = vadd.f32 %v2396_v23, %v2324_v20  ;;  %v3896_v27 = vpop.f32.mrb[57].mxu1  ;;  %v3909_v28 = vpop.f32.mrb[51].mxu0 }
 0x3bd   : > { %v2399_v29 = vpop.f32.mrb[58].mxu1  ;;  %v2782_v28 = vsub.s32 1, %v2754_v10 }
 0x3be   : > { %v3897_v30 = vpop.f32.mrb[59].mxu1  ;;  %v2480_v31 = vadd.f32 %v2474_v21, %v2402_v26  ;;  %v2561_v26 = vld [vmem:[%s5265_s8] sm:$0xf] }
 0x3bf   : > { %v2790_v30 = vsub.s32 3, %v2754_v10 }
 0x3cb   : > { %v2552_v33 = vpop.f32.mrb[60].mxu1 }
 0x3cc   : > { %v2558_v34 = vadd.f32 %v2552_v33, %v2480_v31  ;;  %v3920_v35 = vpop.f32.mrb[61].mxu1  ;;  %v2778_v31 = vsub.s32 0, %v2754_v10 }
 0x3cd   : > { %v2555_v36 = vpop.f32.mrb[62].mxu1 }
 0x3ce   : > { %v2559_v37 = vadd.f32 %v2558_v34, %v1856_v32  ;;  %v3921_v38 = vpop.f32.mrb[63].mxu1  ;;  %v2786_v32 = vsub.s32 2, %v2754_v10 }
 0x3d0   : > { %v2560_v39 = vmax.f32 %v2559_v37, 0.0 }
 0x3d2   : > { %v2562_v41 = vpack.c.bf16 %v2560_v39, %v2560_v39 }
 0x3d4   : > { %3471 = vmatmul.mubr.msk.bf16.vlgmr.msra.gmra.mrb[52].mxu0 %vm1902_vm10, %v2562_v41  ;;  %3472 = vmatmul.mubr.msk.bf16.vlgmr.msra.gmra.mrb[64].mxu1 %vm1902_vm10, %v2562_v41 }
 0x3d5   : > { %3643 = vmatpush3.bf16.msra.mxu0 %v4087_v40  ;;  %3665 = vmatpush3.bf16.msra.mxu1 %v4088_v25 }
 0x3d6   : > { %3644 = vmatprep.subr.bf16.mxu0 %v4089_v42  ;;  %3666 = vmatprep.subr.bf16.mxu1 %v4090_v43  ;;  %v2864_v43 = vld [vmem:[%s5267_s10] sm:$0x1] }
 0x3d9   : > { %3645 = vmatpush3.bf16.msra.mxu0 %v4091_v44  ;;  %3667 = vmatpush3.bf16.msra.mxu1 %v4092_v46 }
 0x3da   : > { %3646 = vmatprep.subr.bf16.mxu0 %v4093_v47  ;;  %3668 = vmatprep.subr.bf16.mxu1 %v4094_v48 }
 0x3dd   : > { %3647 = vmatpush3.bf16.msra.mxu0 %v4095_v49  ;;  %3669 = vmatpush3.bf16.msra.mxu1 %v4096_v50 }
 0x3de   : > { %3648 = vmatprep.subr.bf16.mxu0 %v4097_v51  ;;  %3670 = vmatprep.subr.bf16.mxu1 %v4098_v52 }
 0x3e1   : > { %3649 = vmatpush3.bf16.msra.mxu0 %v4099_v54  ;;  %3671 = vmatpush3.bf16.msra.mxu1 %v4100_v55 }
 0x3e2   : > { %3650 = vmatprep.subr.bf16.mxu0 %v4101_v56  ;;  %3672 = vmatprep.subr.bf16.mxu1 %v4102_v57 }
 0x3e5   : > { %3651 = vmatpush3.bf16.msra.mxu0 %v4103_v58  ;;  %3673 = vmatpush3.bf16.msra.mxu1 %v4104_v59 }
 0x3e6   : > { %3652 = vmatprep.subr.bf16.mxu0 %v4105_v60  ;;  %3674 = vmatprep.subr.bf16.mxu1 %v4106_v62 }
 0x3e9   : > { %3653 = vmatpush3.bf16.msra.mxu0 %v4107_v45  ;;  %3675 = vmatpush3.bf16.msra.mxu1 %v4108_v53 }
 0x3ea   : > { %3654 = vmatprep.subr.bf16.mxu0 %v4109_v63  ;;  %3676 = vmatprep.subr.bf16.mxu1 %v4110_v0 }
 0x3ed   : > { %3655 = vmatpush3.bf16.msra.mxu0 %v4111_v1  ;;  %3677 = vmatpush3.bf16.msra.mxu1 %v4112_v61 }
 0x3ee   : > { %3656 = vmatprep.subr.bf16.mxu0 %v4113_v2  ;;  %3678 = vmatprep.subr.bf16.mxu1 %v4114_v3 }
 0x3f1   : > { %3657 = vmatpush3.bf16.msra.mxu0 %v4115_v4  ;;  %3679 = vmatpush3.bf16.msra.mxu1 %v4116_v5 }
 0x4a7   : > { %v2696_v11 = vpop.f32.mrb[52].mxu0  ;;  %v2737_v12 = vpop.f32.mrb[64].mxu1 }
 0x4a8   : > { %v2698_v16 = vpop.f32.mrb[53].mxu0  ;;  %v2739_v17 = vpop.f32.mrb[65].mxu1 }
 0x4a9   : > { %v2748_v14 = vcombine.low %v2696_v11, %v2698_v16  ;;  %v2749_v18 = vcombine.low %v2737_v12, %v2739_v17  ;;  %v2700_v19 = vpop.f32.mrb[54].mxu0  ;;  %v2741_v15 = vpop.f32.mrb[66].mxu1 }
 0x4aa   : > { %v2701_v20 = vpop.f32.mrb[55].mxu0  ;;  %v2742_v21 = vpop.f32.mrb[67].mxu1 }
 0x4ab   : > { %v2756_v22 = vrot.slane %v2748_v14, %v2755_v13  ;;  %v2763_v23 = vrot.slane %v2749_v18, %v2755_v13 }
 0x4ad   : > { %v2764_v24 = vcombine.low %v2756_v22, %v2763_v23 }
 0x4af   : > { %v2771_v27 = vrot.slane %v2764_v24, %v2755_v13 }
 0x4b1   : > { %v2773_v29 = vadd.f32 %v2771_v27, %v2561_v26 }
 0x4b3   : > { %v2774_v33 = vmax.f32 %v2773_v29, 0.0 }
 0x4b5   : > { %v2783_v34 = vrot.slane %v2774_v33, %v2782_v28  ;;  %v2791_v35 = vrot.slane %v2774_v33, %v2790_v30  ;;  %v2779_v36 = vrot.slane %v2774_v33, %v2778_v31  ;;  %v2787_v37 = vrot.slane %v2774_v33, %v2786_v32 }
 0x4b7   : > { %v2797_v38 = vpack.c.bf16 %v2783_v34, %v2783_v34  ;;  %v2799_v39 = vpack.c.bf16 %v2791_v35, %v2791_v35  ;;  %v2796_v40 = vpack.c.bf16 %v2779_v36, %v2779_v36  ;;  %v2798_v25 = vpack.c.bf16 %v2787_v37, %v2787_v37 }
 0x4b9   : > { %3089 = vmatprep.mubr.bf16.mxu0 %v2797_v38  ;;  %3129 = vmatprep.mubr.bf16.mxu1 %v2799_v39 }
 0x4ba   : > { %3090 = vmatmul.mubr.bf16.vlgmr.msra.gmra.mrb[56].mxu0 %v2796_v40  ;;  %3130 = vmatmul.mubr.bf16.vlgmr.msra.gmra.mrb[68].mxu1 %v2798_v25 }
 0x58d   : > { %v3658_v41 = vpop.f32.mrb[56].mxu0  ;;  %v3680_v42 = vpop.f32.mrb[68].mxu1 }
 0x58e   : > { %v3659_v44 = vpop.f32.mrb[57].mxu0  ;;  %v3681_v46 = vpop.f32.mrb[69].mxu1 }
 0x58f   : > { %v3660_v47 = vadd.f32 %v3659_v44, %v3658_v41  ;;  %v3682_v48 = vadd.f32 %v3681_v46, %v3680_v42  ;;  %v3661_v49 = vpop.f32.mrb[58].mxu0  ;;  %v3683_v50 = vpop.f32.mrb[70].mxu1 }
 0x590   : > { %v3662_v51 = vpop.f32.mrb[59].mxu0  ;;  %v3684_v52 = vpop.f32.mrb[71].mxu1 }
 0x591   : > { %v3092_v54 = vadd.f32 %v3660_v47, %v2864_v43 }
 0x593   : > { %v3132_v55 = vadd.f32 %v3682_v48, %v3092_v54 }
 0x595   : > { %3137 = vst [vmem:[%s378_s26] sm:$0x1] %v3132_v55 }
 0x596   : > { %4130 = shalt.err (!%p4127_p3)
}
 0x597   : > { %s4131_s15 = scalar_lea.hbm %s5215_s29, 16  ;;  %s4135_s30 = scalar_lea.hbm %s5268_s11, 32 }
 0x598   : > { %p4132_p4 = scmp.ne.s32.totalorder %s5215_s29, %s4131_s15  ;;  %p4136_p9 = scmp.lt.u32.totalorder %s5215_s29, %s5268_s11 }
 0x599   : > { %p4137_p10 = scmp.lt.u32.totalorder %s4135_s30, %s4131_s15  ;;  %p4139_p12 = scmp.lt.u32.totalorder %s4131_s15, %s5215_s29 }
 0x59a   : > { %p4133_p7 = pnand %p4132_p4, %p4284_p5 }
 0x59b   : > { %p4138_p11 = por %p4137_p10, %p4136_p9 }
 0x59c   : > { %p4134_p8 = pneg %p4133_p7 }
 0x59d   : > { %p4140_p13 = por %p4139_p12, %p4138_p11 }
 0x59f   : > { %p4141_p0 = pnand %p4140_p13, %p4134_p8 }
 0x5a1   : > { %4144 = shalt.err (!%p4141_p0)
}
 0x5a2   : > { %3922 = dma.vmem_to_hbm [thread:$0]  (%p4284_p5), %s5217_s22, 16, %s5215_s29, %s3139_s13  }
 0x5a3 PF: > { %p3928_p1 = scmp.ge.s32.totalorder %s4179_s20, 2  ;;  %s3163_s14 = sand.u32 1, %s4167_s17  }
 0x5a4   : > { %s3164_s12 = scalar_lea.sflag [#allocation5], %s3163_s14 }
 0x5a5   : > { %p3925_p2 = pnand %p3928_p1, %p4288_p6 }
 0x5a7   : > { %4162 = dma.done.wait (!%p3925_p2), %s3164_s12, 16  }
 0x5a8   : > { %4164 = vsyncadd (!%p3925_p2), %s3164_s12, 4294967280  ;;  %s5272_s16 = sld [smem:[#allocation7_spill]]  ;;  %p21_p3 = scmp.ge.s32.totalorder %s4271_s23, 4  }
 0x5a9   : > { %s5273_s17 = smov %s4171_s18  ;;  %s5274_s18 = smov %s4175_s19 }
 0x5aa   : > { %s5276_s20 = smov %s4271_s23  ;;  %23 = sbr.rel (!%p21_p3) target bundleno = 3 (0x3), region = 122 }
 0x5ae   : > { %s5275_s19 = smov %s5272_s16 }
 0x5b1   :  { %3168 = vsyncpa [#allocation5], 1 }
 0x5b2   :  { %3170 = vsyncpa [#allocation5 + $0x1], 1 }

</bundles_post_ra>
